<compile_context>
chip_gen: v5e
topology: v5e:2x2
jax: 0.10.0
libtpu: 0.0.40
codegen_flags: <defaults>
</compile_context>

<pallas_src>
import functools

import jax
import jax.numpy as jnp
from jax.experimental import pallas as pl
from jax.experimental.pallas import tpu as pltpu


def _round_up(x, m):
    return ((x + m - 1) // m) * m


def _pad_gate_cols(w, H, Hp):
    """Per-gate zero-pad the trailing 4H dim to 4*Hp so every i/f/g/o block
    starts on a 128-lane tile boundary.  Padded lanes contribute exact zeros."""
    if Hp == H:
        return w
    pad = [(0, 0)] * (w.ndim - 1) + [(0, Hp - H)]
    gates = [jnp.pad(w[..., g * H:(g + 1) * H], pad) for g in range(4)]
    return jnp.concatenate(gates, axis=-1)


# ---------------------------------------------------------------------------
# Kernel A: out = X @ W + b, tiled over BOTH rows (M) and output lanes (N).
# Used only for the output projection (the input-gate matmul is fused into
# the recurrence kernel below).  No reduction grid axis: K = Hp stays whole.
# ---------------------------------------------------------------------------
def _matmul_bias_kernel(x_ref, w_ref, b_ref, o_ref):
    o_ref[...] = (jnp.dot(x_ref[...], w_ref[...],
                          preferred_element_type=jnp.float32)
                  + b_ref[...]).astype(o_ref.dtype)


def matmul_bias_pallas(x, w, b, *, tm=256, tn=512):
    """x: (M, K), w: (K, N), b: (1, N) f32 -> (M, N) f32.

    M and N are zero-padded up to the tile grid and the padding is sliced
    off the result, so awkward vocab sizes never collapse to a single
    whole-array tile (which would blow VMEM at real V)."""
    M, K = x.shape
    N = w.shape[1]

    Np = _round_up(N, 128)
    tn = max(128, (min(tn, Np) // 128) * 128)
    Np = _round_up(Np, tn)

    Mp = _round_up(M, 8)
    tm = max(8, (min(tm, Mp) // 8) * 8)
    Mp = _round_up(Mp, tm)

    if Mp != M:
        x = jnp.pad(x, ((0, Mp - M), (0, 0)))
    if Np != N:
        w = jnp.pad(w, ((0, 0), (0, Np - N)))
        b = jnp.pad(b, ((0, 0), (0, Np - N)))

    out = pl.pallas_call(
        _matmul_bias_kernel,
        out_shape=jax.ShapeDtypeStruct((Mp, Np), jnp.float32),
        grid=(Mp // tm, Np // tn),
        in_specs=[
            pl.BlockSpec((tm, K), lambda i, j: (i, 0)),   # activation row tile
            pl.BlockSpec((K, tn), lambda i, j: (0, j)),   # weight column tile
            pl.BlockSpec((1, tn), lambda i, j: (0, j)),   # bias tile
        ],
        out_specs=pl.BlockSpec((tm, tn), lambda i, j: (i, j)),
        compiler_params=pltpu.CompilerParams(
            dimension_semantics=("parallel", "parallel")),
    )(x, w, b)
    return out[:M, :N]


# ---------------------------------------------------------------------------
# Kernel B: T-chunked LSTM recurrence with the input-gate matmul fused in.
# x is laid out time-major and flattened to (Tp*Bp, E) so no in-kernel
# reshapes are needed; per chunk: one (Tc*Bp, E)@(E, 4Hp) dot into VMEM
# scratch, then Tc serial steps of (Bp, Hp)@(Hp, 4Hp) + gate math.
# (h, c) live in VMEM scratch that persists across grid steps.
# ---------------------------------------------------------------------------
def _lstm_chunk_kernel(x_ref, w_ih_ref, w_hh_ref, b_ref, hs_ref,
                       xg_s, h_s, c_s):
    Bp, Hp = h_s.shape
    Tc = x_ref.shape[0] // Bp

    @pl.when(pl.program_id(0) == 0)
    def _():                                      # init_hidden(): zero h / c
        h_s[...] = jnp.zeros_like(h_s)
        c_s[...] = jnp.zeros_like(c_s)

    # Hoisted chunk-level input-gate matmul (bias = b_ih + b_hh folded in).
    xg_s[...] = (jnp.dot(x_ref[...], w_ih_ref[...],
                         preferred_element_type=jnp.float32)
                 + b_ref[...])

    def step(t, carry):
        h, c = carry
        row = pl.multiple_of(t * Bp, Bp)          # sublane-aligned chunk row
        gates = xg_s[pl.ds(row, Bp), :] + jnp.dot(
            h.astype(w_hh_ref.dtype), w_hh_ref[...],
            preferred_element_type=jnp.float32)
        # PyTorch gate order i, f, g, o; each slice is a whole 128-lane tile.
        i_g = jax.nn.sigmoid(gates[:, 0 * Hp:1 * Hp])
        f_g = jax.nn.sigmoid(gates[:, 1 * Hp:2 * Hp])
        g_g = jnp.tanh(gates[:, 2 * Hp:3 * Hp])
        o_g = jax.nn.sigmoid(gates[:, 3 * Hp:4 * Hp])
        c_new = f_g * c + i_g * g_g
        h_new = o_g * jnp.tanh(c_new)
        hs_ref[pl.ds(row, Bp), :] = h_new.astype(hs_ref.dtype)
        return h_new, c_new

    h_f, c_f = jax.lax.fori_loop(0, Tc, step, (h_s[...], c_s[...]),
                                 unroll=min(Tc, 8))
    h_s[...] = h_f
    c_s[...] = c_f


def lstm_recurrence_pallas(x_flat, w_ih, w_hh, bias, *, Bp, Tc):
    """x_flat: (Tp*Bp, E) time-major, w_ih: (E, 4Hp), w_hh: (Hp, 4Hp),
    bias: (1, 4Hp) f32.  Returns hs: (Tp*Bp, Hp) in x_flat.dtype."""
    TB, E = x_flat.shape
    Hp = w_hh.shape[0]
    chunk_rows = Tc * Bp
    n_chunks = TB // chunk_rows
    return pl.pallas_call(
        _lstm_chunk_kernel,
        out_shape=jax.ShapeDtypeStruct((TB, Hp), x_flat.dtype),
        grid=(n_chunks,),
        in_specs=[
            pl.BlockSpec((chunk_rows, E), lambda i: (i, 0)),
            pl.BlockSpec((E, 4 * Hp), lambda i: (0, 0)),
            pl.BlockSpec((Hp, 4 * Hp), lambda i: (0, 0)),
            pl.BlockSpec((1, 4 * Hp), lambda i: (0, 0)),
        ],
        out_specs=pl.BlockSpec((chunk_rows, Hp), lambda i: (i, 0)),
        scratch_shapes=[
            pltpu.VMEM((chunk_rows, 4 * Hp), jnp.float32),   # chunk gate acts
            pltpu.VMEM((Bp, Hp), jnp.float32),               # h carry
            pltpu.VMEM((Bp, Hp), jnp.float32),               # c carry
        ],
        compiler_params=pltpu.CompilerParams(
            dimension_semantics=("arbitrary",)),             # serial carry in T
    )(x_flat, w_ih, w_hh, bias)


# ---------------------------------------------------------------------------
# Module wrapper
# ---------------------------------------------------------------------------
class DecoderRNNPallas:
    """Mirror of the PyTorch DecoderRNN forward (num_layers=1)."""

    def __init__(self, embed_size, hidden_size, vocab_size, key,
                 compute_dtype=jnp.bfloat16, time_chunk=8,
                 proj_tm=256, proj_tn=512):
        self.embed_size = embed_size
        self.hidden_size = hidden_size
        self.vocab_size = vocab_size
        self.hidden_pad = _round_up(hidden_size, 128)     # lane-aligned gates
        self.compute_dtype = compute_dtype                # bf16 in, f32 acc
        self.time_chunk = time_chunk
        self.proj_tm = proj_tm
        self.proj_tn = proj_tn

        ks = jax.random.split(key, 7)
        k = 1.0 / jnp.sqrt(hidden_size)
        # Embedding: N(0, 1) like nn.Embedding default.
        self.embedding = jax.random.normal(ks[0], (vocab_size, embed_size),
                                           jnp.float32)
        # LSTM params, PyTorch layout (4H, E)/(4H, H); stored transposed.
        self.w_ih_t = jax.random.uniform(ks[1], (embed_size, 4 * hidden_size),
                                         jnp.float32, -k, k)
        self.w_hh_t = jax.random.uniform(ks[2], (hidden_size, 4 * hidden_size),
                                         jnp.float32, -k, k)
        b_ih = jax.random.uniform(ks[3], (4 * hidden_size,), jnp.float32, -k, k)
        b_hh = jax.random.uniform(ks[4], (4 * hidden_size,), jnp.float32, -k, k)
        self.bias = (b_ih + b_hh).reshape(1, 4 * hidden_size)
        # Linear(hidden, vocab)
        kl = 1.0 / jnp.sqrt(hidden_size)
        self.w_out_t = jax.random.uniform(ks[5], (hidden_size, vocab_size),
                                          jnp.float32, -kl, kl)
        self.b_out = jax.random.uniform(ks[6], (1, vocab_size),
                                        jnp.float32, -kl, kl)

        # Lane-aligned (per-gate zero-padded), compute-dtype copies for kernels.
        H, Hp = hidden_size, self.hidden_pad
        self.w_ih_p = _pad_gate_cols(self.w_ih_t, H, Hp).astype(compute_dtype)
        self.w_hh_p = _pad_gate_cols(
            jnp.pad(self.w_hh_t, ((0, Hp - H), (0, 0))), H, Hp
        ).astype(compute_dtype)                                       # (Hp,4Hp)
        self.bias_p = _pad_gate_cols(self.bias, H, Hp)                # f32
        self.w_out_p = jnp.pad(self.w_out_t,
                               ((0, Hp - H), (0, 0))).astype(compute_dtype)

    @functools.partial(jax.jit, static_argnums=0)
    def forward(self, features, captions):
        # features: (B, embed_size) f32, captions: (B, T_cap) int32
        B = features.shape[0]
        caps = captions[:, :-1]                                   # (B, T-1)
        T = caps.shape[1] + 1

        Bp = _round_up(B, 8)                  # full f32 sublanes per vreg
        Tc = min(self.time_chunk, _round_up(T, 1))
        Tp = _round_up(T, Tc)

        # TODO(synk): embedding gather (data-dependent) stays in XLA (jnp.take);
        # note jnp.take clips OOB indices where nn.Embedding would raise.
        emb_t = jnp.take(self.embedding, caps.T, axis=0)          # (T-1, B, E)
        x_tbe = jnp.concatenate([features[None].astype(jnp.float32), emb_t],
                                axis=0)                           # (T, B, E)
        # Pad batch to the sublane boundary and time to the chunk size.
        x_tbe = jnp.pad(x_tbe, ((0, Tp - T), (0, Bp - B), (0, 0)))
        x_flat = x_tbe.reshape(Tp * Bp, self.embed_size).astype(self.compute_dtype)

        # Fused input-gate matmul + chunked recurrence (no xg HBM round-trip).
        hs = lstm_recurrence_pallas(x_flat, self.w_ih_p, self.w_hh_p,
                                    self.bias_p, Bp=Bp, Tc=Tc)    # (Tp*Bp, Hp)

        # Transpose the small hs (not the big logits) to batch-major.
        hs_bt = (hs.reshape(Tp, Bp, self.hidden_pad)[:T, :B]
                 .transpose(1, 0, 2)
                 .reshape(B * T, self.hidden_pad))

        # Output projection: M x N tiled, 'parallel' on both axes.
        logits = matmul_bias_pallas(hs_bt, self.w_out_p, self.b_out,
                                    tm=self.proj_tm, tn=self.proj_tn)
        return logits.reshape(B, T, self.vocab_size)


# ---------------------------------------------------------------------------
# Pure-JAX reference (f32 lax.scan LSTM on the UNPADDED weights).
# ---------------------------------------------------------------------------
def _reference_forward(model, features, captions):
    caps = captions[:, :-1]
    emb = jnp.take(model.embedding, caps, axis=0)
    emb = jnp.concatenate([features[:, None, :], emb], axis=1)
    x_tbe = jnp.transpose(emb, (1, 0, 2))
    B = features.shape[0]
    H = model.hidden_size

    def step(carry, x):
        h, c = carry
        gates = x @ model.w_ih_t + h @ model.w_hh_t + model.bias
        i = jax.nn.sigmoid(gates[:, 0:H])
        f = jax.nn.sigmoid(gates[:, H:2 * H])
        g = jnp.tanh(gates[:, 2 * H:3 * H])
        o = jax.nn.sigmoid(gates[:, 3 * H:4 * H])
        c = f * c + i * g
        h = o * jnp.tanh(c)
        return (h, c), h @ model.w_out_t + model.b_out

    init = (jnp.zeros((B, H), jnp.float32), jnp.zeros((B, H), jnp.float32))
    _, out_tbv = jax.lax.scan(step, init, x_tbe)
    return jnp.transpose(out_tbv, (1, 0, 2))


if __name__ == "__main__":
    B, EMBED, HIDDEN, VOCAB, T_CAP = 2, 32, 32, 128, 8

    key = jax.random.PRNGKey(0)
    k_model, k_feat, k_cap = jax.random.split(key, 3)

    features = jax.random.normal(k_feat, (B, EMBED), jnp.float32)
    captions = jax.random.randint(k_cap, (B, T_CAP), 0, VOCAB, jnp.int32)

    # f32 compute path: tight structural check against the pure-JAX reference.
    model_f32 = DecoderRNNPallas(EMBED, HIDDEN, VOCAB, k_model,
                                 compute_dtype=jnp.float32)
    out_f32 = jax.block_until_ready(model_f32.forward(features, captions))
    assert out_f32.shape == (B, T_CAP, VOCAB), out_f32.shape

    ref = _reference_forward(model_f32, features, captions)
    err32 = float(jnp.max(jnp.abs(out_f32 - ref)))
    assert jnp.allclose(out_f32, ref, atol=1e-3, rtol=1e-3), err32

    # bf16-input / f32-accumulate path (recommended config): looser tolerance.
    model_b16 = DecoderRNNPallas(EMBED, HIDDEN, VOCAB, k_model,
                                 compute_dtype=jnp.bfloat16)
    out_b16 = jax.block_until_ready(model_b16.forward(features, captions))
    assert out_b16.shape == (B, T_CAP, VOCAB), out_b16.shape
    err16 = float(jnp.max(jnp.abs(out_b16 - ref)))
    assert jnp.allclose(out_b16, ref, atol=5e-2, rtol=5e-2), err16

    print("KERNEL_OK")
</pallas_src>

<mosaic_0001>
module attributes {stable_mosaic.version = 11 : i64} {
  func.func @_matmul_bias_kernel(%arg0: i32, %arg1: i32, %arg2: memref<16x128xf32, #tpu.memory_space<vmem>>, %arg3: memref<128x128xf32, #tpu.memory_space<vmem>>, %arg4: memref<1x128xf32, #tpu.memory_space<vmem>>, %arg5: memref<16x128xf32, #tpu.memory_space<vmem>>) attributes {dimension_semantics = [#tpu.dimension_semantics<parallel>, #tpu.dimension_semantics<parallel>], iteration_bounds = array<i64: 1, 1>, scalar_prefetch = 0 : i64, scratch_operands = 0 : i64, tpu.core_type = #tpu.core_type<tc>, window_params = [{transform_indices = @transform_0, window_bounds = array<i64: 16, 128>}, {transform_indices = @transform_1, window_bounds = array<i64: 128, 128>}, {transform_indices = @transform_2, window_bounds = array<i64: 1, 128>}, {transform_indices = @transform_3, window_bounds = array<i64: 16, 128>}]} {
    %c0 = arith.constant 0 : index
    %c0_0 = arith.constant 0 : index
    %0 = vector.load %arg2[%c0, %c0_0] : memref<16x128xf32, #tpu.memory_space<vmem>>, vector<16x128xf32>
    %c0_1 = arith.constant 0 : index
    %c0_2 = arith.constant 0 : index
    %1 = vector.load %arg3[%c0_1, %c0_2] : memref<128x128xf32, #tpu.memory_space<vmem>>, vector<128x128xf32>
    %cst = arith.constant dense<0.000000e+00> : vector<16x128xf32>
    %2 = tpu.matmul %0, %1, %cst {dimension_numbers = #tpu.dot_dimension_numbers<[1], [0], [0], [1], [0, 0, 1, 1], [], []>} : vector<16x128xf32>, vector<128x128xf32>, vector<16x128xf32> -> vector<16x128xf32>
    %c0_3 = arith.constant 0 : index
    %c0_4 = arith.constant 0 : index
    %3 = vector.load %arg4[%c0_3, %c0_4] : memref<1x128xf32, #tpu.memory_space<vmem>>, vector<1x128xf32>
    %4 = vector.broadcast %3 : vector<1x128xf32> to vector<16x128xf32>
    %5 = arith.addf %2, %4 : vector<16x128xf32>
    %c0_5 = arith.constant 0 : index
    %c0_6 = arith.constant 0 : index
    %6 = vector.load %arg5[%c0_5, %c0_6] : memref<16x128xf32, #tpu.memory_space<vmem>>, vector<16x128xf32>
    tpu.vector_store %arg5[%c0_5, %c0_6], %5 {strides = array<i32>} : memref<16x128xf32, #tpu.memory_space<vmem>>, vector<16x128xf32>,
    return
  }
  func.func @transform_0(%arg0: i32, %arg1: i32) -> (i32, i32) {
    %c0_i32 = arith.constant 0 : i32
    %c0_i32_0 = arith.constant 0 : i32
    return %arg0, %c0_i32 : i32, i32
  }
  func.func @transform_1(%arg0: i32, %arg1: i32) -> (i32, i32) {
    %c0_i32 = arith.constant 0 : i32
    %c0_i32_0 = arith.constant 0 : i32
    return %c0_i32, %arg1 : i32, i32
  }
  func.func @transform_2(%arg0: i32, %arg1: i32) -> (i32, i32) {
    %c0_i32 = arith.constant 0 : i32
    %c0_i32_0 = arith.constant 0 : i32
    return %c0_i32, %arg1 : i32, i32
  }
  func.func @transform_3(%arg0: i32, %arg1: i32) -> (i32, i32) {
    %c0_i32 = arith.constant 0 : i32
    return %arg0, %arg1 : i32, i32
  }
}

module attributes {stable_mosaic.version = 11 : i64} {
  func.func @_lstm_chunk_kernel(%arg0: i32, %arg1: memref<64x32xf32, #tpu.memory_space<vmem>>, %arg2: memref<32x512xf32, #tpu.memory_space<vmem>>, %arg3: memref<128x512xf32, #tpu.memory_space<vmem>>, %arg4: memref<1x512xf32, #tpu.memory_space<vmem>>, %arg5: memref<64x128xf32, #tpu.memory_space<vmem>>, %arg6: memref<64x512xf32, #tpu.memory_space<vmem>>, %arg7: memref<8x128xf32, #tpu.memory_space<vmem>>, %arg8: memref<8x128xf32, #tpu.memory_space<vmem>>) attributes {dimension_semantics = [#tpu.dimension_semantics<arbitrary>], iteration_bounds = array<i64: 1>, scalar_prefetch = 0 : i64, scratch_operands = 3 : i64, tpu.core_type = #tpu.core_type<tc>, window_params = [{transform_indices = @transform_0, window_bounds = array<i64: 64, 32>}, {pipeline_mode = #tpu.pipeline_mode<synchronous>, transform_indices = @transform_1, window_bounds = array<i64: 32, 512>}, {pipeline_mode = #tpu.pipeline_mode<synchronous>, transform_indices = @transform_2, window_bounds = array<i64: 128, 512>}, {pipeline_mode = #tpu.pipeline_mode<synchronous>, transform_indices = @transform_3, window_bounds = array<i64: 1, 512>}, {transform_indices = @transform_4, window_bounds = array<i64: 64, 128>}]} {
    %c0_i32 = arith.constant 0 : i32
    %0 = arith.cmpi eq, %arg0, %c0_i32 : i32
    %1 = arith.extui %0 : i1 to i32
    %c0_i32_0 = arith.constant 0 : i32
    %2 = arith.cmpi ne, %1, %c0_i32_0 : i32
    scf.if %2 {
      %cst_89 = arith.constant 0.000000e+00 : f32
      %286 = vector.broadcast %cst_89 : f32 to vector<8x128xf32>
      %c0_90 = arith.constant 0 : index
      %c0_91 = arith.constant 0 : index
      %287 = vector.load %arg7[%c0_90, %c0_91] : memref<8x128xf32, #tpu.memory_space<vmem>>, vector<8x128xf32>
      tpu.vector_store %arg7[%c0_90, %c0_91], %286 {strides = array<i32>} : memref<8x128xf32, #tpu.memory_space<vmem>>, vector<8x128xf32>,
      %cst_92 = arith.constant 0.000000e+00 : f32
      %288 = vector.broadcast %cst_92 : f32 to vector<8x128xf32>
      %c0_93 = arith.constant 0 : index
      %c0_94 = arith.constant 0 : index
      %289 = vector.load %arg8[%c0_93, %c0_94] : memref<8x128xf32, #tpu.memory_space<vmem>>, vector<8x128xf32>
      tpu.vector_store %arg8[%c0_93, %c0_94], %288 {strides = array<i32>} : memref<8x128xf32, #tpu.memory_space<vmem>>, vector<8x128xf32>,
    } else {
    }
    %c0 = arith.constant 0 : index
    %c0_1 = arith.constant 0 : index
    %3 = vector.load %arg1[%c0, %c0_1] : memref<64x32xf32, #tpu.memory_space<vmem>>, vector<64x32xf32>
    %c0_2 = arith.constant 0 : index
    %c0_3 = arith.constant 0 : index
    %4 = vector.load %arg2[%c0_2, %c0_3] : memref<32x512xf32, #tpu.memory_space<vmem>>, vector<32x512xf32>
    %cst = arith.constant dense<0.000000e+00> : vector<64x512xf32>
    %5 = tpu.matmul %3, %4, %cst {dimension_numbers = #tpu.dot_dimension_numbers<[1], [0], [0], [1], [0, 0, 1, 1], [], []>} : vector<64x32xf32>, vector<32x512xf32>, vector<64x512xf32> -> vector<64x512xf32>
    %c0_4 = arith.constant 0 : index
    %c0_5 = arith.constant 0 : index
    %6 = vector.load %arg4[%c0_4, %c0_5] : memref<1x512xf32, #tpu.memory_space<vmem>>, vector<1x512xf32>
    %7 = vector.broadcast %6 : vector<1x512xf32> to vector<64x512xf32>
    %8 = arith.addf %5, %7 : vector<64x512xf32>
    %c0_6 = arith.constant 0 : index
    %c0_7 = arith.constant 0 : index
    %9 = vector.load %arg6[%c0_6, %c0_7] : memref<64x512xf32, #tpu.memory_space<vmem>>, vector<64x512xf32>
    tpu.vector_store %arg6[%c0_6, %c0_7], %8 {strides = array<i32>} : memref<64x512xf32, #tpu.memory_space<vmem>>, vector<64x512xf32>,
    %c0_8 = arith.constant 0 : index
    %c0_9 = arith.constant 0 : index
    %10 = vector.load %arg7[%c0_8, %c0_9] : memref<8x128xf32, #tpu.memory_space<vmem>>, vector<8x128xf32>
    %c0_10 = arith.constant 0 : index
    %c0_11 = arith.constant 0 : index
    %11 = vector.load %arg8[%c0_10, %c0_11] : memref<8x128xf32, #tpu.memory_space<vmem>>, vector<8x128xf32>
    %c0_i32_12 = arith.constant 0 : i32
    %c8_i32 = arith.constant 8 : i32
    %12 = arith.muli %c0_i32_12, %c8_i32 : i32
    %13 = tpu.assume_multiple %12, 8 : i32
    %14 = arith.index_cast %13 : i32 to index
    %c0_13 = arith.constant 0 : index
    %15 = vector.load %arg6[%14, %c0_13] : memref<64x512xf32, #tpu.memory_space<vmem>>, vector<8x512xf32>
    %c0_14 = arith.constant 0 : index
    %c0_15 = arith.constant 0 : index
    %16 = vector.load %arg3[%c0_14, %c0_15] : memref<128x512xf32, #tpu.memory_space<vmem>>, vector<128x512xf32>
    %cst_16 = arith.constant dense<0.000000e+00> : vector<8x512xf32>
    %17 = tpu.matmul %10, %16, %cst_16 {dimension_numbers = #tpu.dot_dimension_numbers<[1], [0], [0], [1], [0, 0, 1, 1], [], []>} : vector<8x128xf32>, vector<128x512xf32>, vector<8x512xf32> -> vector<8x512xf32>
    %18 = arith.addf %15, %17 : vector<8x512xf32>
    %19 = vector.extract_strided_slice %18 {offsets = [0, 0], sizes = [8, 128], strides = [1, 1]} : vector<8x512xf32> to vector<8x128xf32>
    %20 = arith.negf %19 : vector<8x128xf32>
    %21 = math.exp %20 : vector<8x128xf32>
    %cst_17 = arith.constant 1.000000e+00 : f32
    %22 = vector.broadcast %cst_17 : f32 to vector<8x128xf32>
    %23 = arith.addf %22, %21 : vector<8x128xf32>
    %24 = arith.divf %22, %23 : vector<8x128xf32>
    %25 = vector.extract_strided_slice %18 {offsets = [0, 128], sizes = [8, 128], strides = [1, 1]} : vector<8x512xf32> to vector<8x128xf32>
    %26 = arith.negf %25 : vector<8x128xf32>
    %27 = math.exp %26 : vector<8x128xf32>
    %cst_18 = arith.constant 1.000000e+00 : f32
    %28 = vector.broadcast %cst_18 : f32 to vector<8x128xf32>
    %29 = arith.addf %28, %27 : vector<8x128xf32>
    %30 = arith.divf %28, %29 : vector<8x128xf32>
    %31 = vector.extract_strided_slice %18 {offsets = [0, 256], sizes = [8, 128], strides = [1, 1]} : vector<8x512xf32> to vector<8x128xf32>
    %32 = math.tanh %31 : vector<8x128xf32>
    %33 = vector.extract_strided_slice %18 {offsets = [0, 384], sizes = [8, 128], strides = [1, 1]} : vector<8x512xf32> to vector<8x128xf32>
    %34 = arith.negf %33 : vector<8x128xf32>
    %35 = math.exp %34 : vector<8x128xf32>
    %cst_19 = arith.constant 1.000000e+00 : f32
    %36 = vector.broadcast %cst_19 : f32 to vector<8x128xf32>
    %37 = arith.addf %36, %35 : vector<8x128xf32>
    %38 = arith.divf %36, %37 : vector<8x128xf32>
    %39 = arith.mulf %30, %11 : vector<8x128xf32>
    %40 = arith.mulf %24, %32 : vector<8x128xf32>
    %41 = arith.addf %39, %40 : vector<8x128xf32>
    %42 = math.tanh %41 : vector<8x128xf32>
    %43 = arith.mulf %38, %42 : vector<8x128xf32>
    %44 = arith.index_cast %13 : i32 to index
    %c0_20 = arith.constant 0 : index
    %45 = vector.load %arg5[%44, %c0_20] : memref<64x128xf32, #tpu.memory_space<vmem>>, vector<8x128xf32>
    tpu.vector_store %arg5[%44, %c0_20], %43 {strides = array<i32>} : memref<64x128xf32, #tpu.memory_space<vmem>>, vector<8x128xf32>,
    %c1_i32 = arith.constant 1 : i32
    %c8_i32_21 = arith.constant 8 : i32
    %46 = arith.muli %c1_i32, %c8_i32_21 : i32
    %47 = tpu.assume_multiple %46, 8 : i32
    %48 = arith.index_cast %47 : i32 to index
    %c0_22 = arith.constant 0 : index
    %49 = vector.load %arg6[%48, %c0_22] : memref<64x512xf32, #tpu.memory_space<vmem>>, vector<8x512xf32>
    %c0_23 = arith.constant 0 : index
    %c0_24 = arith.constant 0 : index
    %50 = vector.load %arg3[%c0_23, %c0_24] : memref<128x512xf32, #tpu.memory_space<vmem>>, vector<128x512xf32>
    %cst_25 = arith.constant dense<0.000000e+00> : vector<8x512xf32>
    %51 = tpu.matmul %43, %50, %cst_25 {dimension_numbers = #tpu.dot_dimension_numbers<[1], [0], [0], [1], [0, 0, 1, 1], [], []>} : vector<8x128xf32>, vector<128x512xf32>, vector<8x512xf32> -> vector<8x512xf32>
    %52 = arith.addf %49, %51 : vector<8x512xf32>
    %53 = vector.extract_strided_slice %52 {offsets = [0, 0], sizes = [8, 128], strides = [1, 1]} : vector<8x512xf32> to vector<8x128xf32>
    %54 = arith.negf %53 : vector<8x128xf32>
    %55 = math.exp %54 : vector<8x128xf32>
    %cst_26 = arith.constant 1.000000e+00 : f32
    %56 = vector.broadcast %cst_26 : f32 to vector<8x128xf32>
    %57 = arith.addf %56, %55 : vector<8x128xf32>
    %58 = arith.divf %56, %57 : vector<8x128xf32>
    %59 = vector.extract_strided_slice %52 {offsets = [0, 128], sizes = [8, 128], strides = [1, 1]} : vector<8x512xf32> to vector<8x128xf32>
    %60 = arith.negf %59 : vector<8x128xf32>
    %61 = math.exp %60 : vector<8x128xf32>
    %cst_27 = arith.constant 1.000000e+00 : f32
    %62 = vector.broadcast %cst_27 : f32 to vector<8x128xf32>
    %63 = arith.addf %62, %61 : vector<8x128xf32>
    %64 = arith.divf %62, %63 : vector<8x128xf32>
    %65 = vector.extract_strided_slice %52 {offsets = [0, 256], sizes = [8, 128], strides = [1, 1]} : vector<8x512xf32> to vector<8x128xf32>
    %66 = math.tanh %65 : vector<8x128xf32>
    %67 = vector.extract_strided_slice %52 {offsets = [0, 384], sizes = [8, 128], strides = [1, 1]} : vector<8x512xf32> to vector<8x128xf32>
    %68 = arith.negf %67 : vector<8x128xf32>
    %69 = math.exp %68 : vector<8x128xf32>
    %cst_28 = arith.constant 1.000000e+00 : f32
    %70 = vector.broadcast %cst_28 : f32 to vector<8x128xf32>
    %71 = arith.addf %70, %69 : vector<8x128xf32>
    %72 = arith.divf %70, %71 : vector<8x128xf32>
    %73 = arith.mulf %64, %41 : vector<8x128xf32>
    %74 = arith.mulf %58, %66 : vector<8x128xf32>
    %75 = arith.addf %73, %74 : vector<8x128xf32>
    %76 = math.tanh %75 : vector<8x128xf32>
    %77 = arith.mulf %72, %76 : vector<8x128xf32>
    %78 = arith.index_cast %47 : i32 to index
    %c0_29 = arith.constant 0 : index
    %79 = vector.load %arg5[%78, %c0_29] : memref<64x128xf32, #tpu.memory_space<vmem>>, vector<8x128xf32>
    tpu.vector_store %arg5[%78, %c0_29], %77 {strides = array<i32>} : memref<64x128xf32, #tpu.memory_space<vmem>>, vector<8x128xf32>,
    %c2_i32 = arith.constant 2 : i32
    %c8_i32_30 = arith.constant 8 : i32
    %80 = arith.muli %c2_i32, %c8_i32_30 : i32
    %81 = tpu.assume_multiple %80, 8 : i32
    %82 = arith.index_cast %81 : i32 to index
    %c0_31 = arith.constant 0 : index
    %83 = vector.load %arg6[%82, %c0_31] : memref<64x512xf32, #tpu.memory_space<vmem>>, vector<8x512xf32>
    %c0_32 = arith.constant 0 : index
    %c0_33 = arith.constant 0 : index
    %84 = vector.load %arg3[%c0_32, %c0_33] : memref<128x512xf32, #tpu.memory_space<vmem>>, vector<128x512xf32>
    %cst_34 = arith.constant dense<0.000000e+00> : vector<8x512xf32>
    %85 = tpu.matmul %77, %84, %cst_34 {dimension_numbers = #tpu.dot_dimension_numbers<[1], [0], [0], [1], [0, 0, 1, 1], [], []>} : vector<8x128xf32>, vector<128x512xf32>, vector<8x512xf32> -> vector<8x512xf32>
    %86 = arith.addf %83, %85 : vector<8x512xf32>
    %87 = vector.extract_strided_slice %86 {offsets = [0, 0], sizes = [8, 128], strides = [1, 1]} : vector<8x512xf32> to vector<8x128xf32>
    %88 = arith.negf %87 : vector<8x128xf32>
    %89 = math.exp %88 : vector<8x128xf32>
    %cst_35 = arith.constant 1.000000e+00 : f32
    %90 = vector.broadcast %cst_35 : f32 to vector<8x128xf32>
    %91 = arith.addf %90, %89 : vector<8x128xf32>
    %92 = arith.divf %90, %91 : vector<8x128xf32>
    %93 = vector.extract_strided_slice %86 {offsets = [0, 128], sizes = [8, 128], strides = [1, 1]} : vector<8x512xf32> to vector<8x128xf32>
    %94 = arith.negf %93 : vector<8x128xf32>
    %95 = math.exp %94 : vector<8x128xf32>
    %cst_36 = arith.constant 1.000000e+00 : f32
    %96 = vector.broadcast %cst_36 : f32 to vector<8x128xf32>
    %97 = arith.addf %96, %95 : vector<8x128xf32>
    %98 = arith.divf %96, %97 : vector<8x128xf32>
    %99 = vector.extract_strided_slice %86 {offsets = [0, 256], sizes = [8, 128], strides = [1, 1]} : vector<8x512xf32> to vector<8x128xf32>
    %100 = math.tanh %99 : vector<8x128xf32>
    %101 = vector.extract_strided_slice %86 {offsets = [0, 384], sizes = [8, 128], strides = [1, 1]} : vector<8x512xf32> to vector<8x128xf32>
    %102 = arith.negf %101 : vector<8x128xf32>
    %103 = math.exp %102 : vector<8x128xf32>
    %cst_37 = arith.constant 1.000000e+00 : f32
    %104 = vector.broadcast %cst_37 : f32 to vector<8x128xf32>
    %105 = arith.addf %104, %103 : vector<8x128xf32>
    %106 = arith.divf %104, %105 : vector<8x128xf32>
    %107 = arith.mulf %98, %75 : vector<8x128xf32>
    %108 = arith.mulf %92, %100 : vector<8x128xf32>
    %109 = arith.addf %107, %108 : vector<8x128xf32>
    %110 = math.tanh %109 : vector<8x128xf32>
    %111 = arith.mulf %106, %110 : vector<8x128xf32>
    %112 = arith.index_cast %81 : i32 to index
    %c0_38 = arith.constant 0 : index
    %113 = vector.load %arg5[%112, %c0_38] : memref<64x128xf32, #tpu.memory_space<vmem>>, vector<8x128xf32>
    tpu.vector_store %arg5[%112, %c0_38], %111 {strides = array<i32>} : memref<64x128xf32, #tpu.memory_space<vmem>>, vector<8x128xf32>,
    %c3_i32 = arith.constant 3 : i32
    %c8_i32_39 = arith.constant 8 : i32
    %114 = arith.muli %c3_i32, %c8_i32_39 : i32
    %115 = tpu.assume_multiple %114, 8 : i32
    %116 = arith.index_cast %115 : i32 to index
    %c0_40 = arith.constant 0 : index
    %117 = vector.load %arg6[%116, %c0_40] : memref<64x512xf32, #tpu.memory_space<vmem>>, vector<8x512xf32>
    %c0_41 = arith.constant 0 : index
    %c0_42 = arith.constant 0 : index
    %118 = vector.load %arg3[%c0_41, %c0_42] : memref<128x512xf32, #tpu.memory_space<vmem>>, vector<128x512xf32>
    %cst_43 = arith.constant dense<0.000000e+00> : vector<8x512xf32>
    %119 = tpu.matmul %111, %118, %cst_43 {dimension_numbers = #tpu.dot_dimension_numbers<[1], [0], [0], [1], [0, 0, 1, 1], [], []>} : vector<8x128xf32>, vector<128x512xf32>, vector<8x512xf32> -> vector<8x512xf32>
    %120 = arith.addf %117, %119 : vector<8x512xf32>
    %121 = vector.extract_strided_slice %120 {offsets = [0, 0], sizes = [8, 128], strides = [1, 1]} : vector<8x512xf32> to vector<8x128xf32>
    %122 = arith.negf %121 : vector<8x128xf32>
    %123 = math.exp %122 : vector<8x128xf32>
    %cst_44 = arith.constant 1.000000e+00 : f32
    %124 = vector.broadcast %cst_44 : f32 to vector<8x128xf32>
    %125 = arith.addf %124, %123 : vector<8x128xf32>
    %126 = arith.divf %124, %125 : vector<8x128xf32>
    %127 = vector.extract_strided_slice %120 {offsets = [0, 128], sizes = [8, 128], strides = [1, 1]} : vector<8x512xf32> to vector<8x128xf32>
    %128 = arith.negf %127 : vector<8x128xf32>
    %129 = math.exp %128 : vector<8x128xf32>
    %cst_45 = arith.constant 1.000000e+00 : f32
    %130 = vector.broadcast %cst_45 : f32 to vector<8x128xf32>
    %131 = arith.addf %130, %129 : vector<8x128xf32>
    %132 = arith.divf %130, %131 : vector<8x128xf32>
    %133 = vector.extract_strided_slice %120 {offsets = [0, 256], sizes = [8, 128], strides = [1, 1]} : vector<8x512xf32> to vector<8x128xf32>
    %134 = math.tanh %133 : vector<8x128xf32>
    %135 = vector.extract_strided_slice %120 {offsets = [0, 384], sizes = [8, 128], strides = [1, 1]} : vector<8x512xf32> to vector<8x128xf32>
    %136 = arith.negf %135 : vector<8x128xf32>
    %137 = math.exp %136 : vector<8x128xf32>
    %cst_46 = arith.constant 1.000000e+00 : f32
    %138 = vector.broadcast %cst_46 : f32 to vector<8x128xf32>
    %139 = arith.addf %138, %137 : vector<8x128xf32>
    %140 = arith.divf %138, %139 : vector<8x128xf32>
    %141 = arith.mulf %132, %109 : vector<8x128xf32>
    %142 = arith.mulf %126, %134 : vector<8x128xf32>
    %143 = arith.addf %141, %142 : vector<8x128xf32>
    %144 = math.tanh %143 : vector<8x128xf32>
    %145 = arith.mulf %140, %144 : vector<8x128xf32>
    %146 = arith.index_cast %115 : i32 to index
    %c0_47 = arith.constant 0 : index
    %147 = vector.load %arg5[%146, %c0_47] : memref<64x128xf32, #tpu.memory_space<vmem>>, vector<8x128xf32>
    tpu.vector_store %arg5[%146, %c0_47], %145 {strides = array<i32>} : memref<64x128xf32, #tpu.memory_space<vmem>>, vector<8x128xf32>,
    %c4_i32 = arith.constant 4 : i32
    %c8_i32_48 = arith.constant 8 : i32
    %148 = arith.muli %c4_i32, %c8_i32_48 : i32
    %149 = tpu.assume_multiple %148, 8 : i32
    %150 = arith.index_cast %149 : i32 to index
    %c0_49 = arith.constant 0 : index
    %151 = vector.load %arg6[%150, %c0_49] : memref<64x512xf32, #tpu.memory_space<vmem>>, vector<8x512xf32>
    %c0_50 = arith.constant 0 : index
    %c0_51 = arith.constant 0 : index
    %152 = vector.load %arg3[%c0_50, %c0_51] : memref<128x512xf32, #tpu.memory_space<vmem>>, vector<128x512xf32>
    %cst_52 = arith.constant dense<0.000000e+00> : vector<8x512xf32>
    %153 = tpu.matmul %145, %152, %cst_52 {dimension_numbers = #tpu.dot_dimension_numbers<[1], [0], [0], [1], [0, 0, 1, 1], [], []>} : vector<8x128xf32>, vector<128x512xf32>, vector<8x512xf32> -> vector<8x512xf32>
    %154 = arith.addf %151, %153 : vector<8x512xf32>
    %155 = vector.extract_strided_slice %154 {offsets = [0, 0], sizes = [8, 128], strides = [1, 1]} : vector<8x512xf32> to vector<8x128xf32>
    %156 = arith.negf %155 : vector<8x128xf32>
    %157 = math.exp %156 : vector<8x128xf32>
    %cst_53 = arith.constant 1.000000e+00 : f32
    %158 = vector.broadcast %cst_53 : f32 to vector<8x128xf32>
    %159 = arith.addf %158, %157 : vector<8x128xf32>
    %160 = arith.divf %158, %159 : vector<8x128xf32>
    %161 = vector.extract_strided_slice %154 {offsets = [0, 128], sizes = [8, 128], strides = [1, 1]} : vector<8x512xf32> to vector<8x128xf32>
    %162 = arith.negf %161 : vector<8x128xf32>
    %163 = math.exp %162 : vector<8x128xf32>
    %cst_54 = arith.constant 1.000000e+00 : f32
    %164 = vector.broadcast %cst_54 : f32 to vector<8x128xf32>
    %165 = arith.addf %164, %163 : vector<8x128xf32>
    %166 = arith.divf %164, %165 : vector<8x128xf32>
    %167 = vector.extract_strided_slice %154 {offsets = [0, 256], sizes = [8, 128], strides = [1, 1]} : vector<8x512xf32> to vector<8x128xf32>
    %168 = math.tanh %167 : vector<8x128xf32>
    %169 = vector.extract_strided_slice %154 {offsets = [0, 384], sizes = [8, 128], strides = [1, 1]} : vector<8x512xf32> to vector<8x128xf32>
    %170 = arith.negf %169 : vector<8x128xf32>
    %171 = math.exp %170 : vector<8x128xf32>
    %cst_55 = arith.constant 1.000000e+00 : f32
    %172 = vector.broadcast %cst_55 : f32 to vector<8x128xf32>
    %173 = arith.addf %172, %171 : vector<8x128xf32>
    %174 = arith.divf %172, %173 : vector<8x128xf32>
    %175 = arith.mulf %166, %143 : vector<8x128xf32>
    %176 = arith.mulf %160, %168 : vector<8x128xf32>
    %177 = arith.addf %175, %176 : vector<8x128xf32>
    %178 = math.tanh %177 : vector<8x128xf32>
    %179 = arith.mulf %174, %178 : vector<8x128xf32>
    %180 = arith.index_cast %149 : i32 to index
    %c0_56 = arith.constant 0 : index
    %181 = vector.load %arg5[%180, %c0_56] : memref<64x128xf32, #tpu.memory_space<vmem>>, vector<8x128xf32>
    tpu.vector_store %arg5[%180, %c0_56], %179 {strides = array<i32>} : memref<64x128xf32, #tpu.memory_space<vmem>>, vector<8x128xf32>,
    %c5_i32 = arith.constant 5 : i32
    %c8_i32_57 = arith.constant 8 : i32
    %182 = arith.muli %c5_i32, %c8_i32_57 : i32
    %183 = tpu.assume_multiple %182, 8 : i32
    %184 = arith.index_cast %183 : i32 to index
    %c0_58 = arith.constant 0 : index
    %185 = vector.load %arg6[%184, %c0_58] : memref<64x512xf32, #tpu.memory_space<vmem>>, vector<8x512xf32>
    %c0_59 = arith.constant 0 : index
    %c0_60 = arith.constant 0 : index
    %186 = vector.load %arg3[%c0_59, %c0_60] : memref<128x512xf32, #tpu.memory_space<vmem>>, vector<128x512xf32>
    %cst_61 = arith.constant dense<0.000000e+00> : vector<8x512xf32>
    %187 = tpu.matmul %179, %186, %cst_61 {dimension_numbers = #tpu.dot_dimension_numbers<[1], [0], [0], [1], [0, 0, 1, 1], [], []>} : vector<8x128xf32>, vector<128x512xf32>, vector<8x512xf32> -> vector<8x512xf32>
    %188 = arith.addf %185, %187 : vector<8x512xf32>
    %189 = vector.extract_strided_slice %188 {offsets = [0, 0], sizes = [8, 128], strides = [1, 1]} : vector<8x512xf32> to vector<8x128xf32>
    %190 = arith.negf %189 : vector<8x128xf32>
    %191 = math.exp %190 : vector<8x128xf32>
    %cst_62 = arith.constant 1.000000e+00 : f32
    %192 = vector.broadcast %cst_62 : f32 to vector<8x128xf32>
    %193 = arith.addf %192, %191 : vector<8x128xf32>
    %194 = arith.divf %192, %193 : vector<8x128xf32>
    %195 = vector.extract_strided_slice %188 {offsets = [0, 128], sizes = [8, 128], strides = [1, 1]} : vector<8x512xf32> to vector<8x128xf32>
    %196 = arith.negf %195 : vector<8x128xf32>
    %197 = math.exp %196 : vector<8x128xf32>
    %cst_63 = arith.constant 1.000000e+00 : f32
    %198 = vector.broadcast %cst_63 : f32 to vector<8x128xf32>
    %199 = arith.addf %198, %197 : vector<8x128xf32>
    %200 = arith.divf %198, %199 : vector<8x128xf32>
    %201 = vector.extract_strided_slice %188 {offsets = [0, 256], sizes = [8, 128], strides = [1, 1]} : vector<8x512xf32> to vector<8x128xf32>
    %202 = math.tanh %201 : vector<8x128xf32>
    %203 = vector.extract_strided_slice %188 {offsets = [0, 384], sizes = [8, 128], strides = [1, 1]} : vector<8x512xf32> to vector<8x128xf32>
    %204 = arith.negf %203 : vector<8x128xf32>
    %205 = math.exp %204 : vector<8x128xf32>
    %cst_64 = arith.constant 1.000000e+00 : f32
    %206 = vector.broadcast %cst_64 : f32 to vector<8x128xf32>
    %207 = arith.addf %206, %205 : vector<8x128xf32>
    %208 = arith.divf %206, %207 : vector<8x128xf32>
    %209 = arith.mulf %200, %177 : vector<8x128xf32>
    %210 = arith.mulf %194, %202 : vector<8x128xf32>
    %211 = arith.addf %209, %210 : vector<8x128xf32>
    %212 = math.tanh %211 : vector<8x128xf32>
    %213 = arith.mulf %208, %212 : vector<8x128xf32>
    %214 = arith.index_cast %183 : i32 to index
    %c0_65 = arith.constant 0 : index
    %215 = vector.load %arg5[%214, %c0_65] : memref<64x128xf32, #tpu.memory_space<vmem>>, vector<8x128xf32>
    tpu.vector_store %arg5[%214, %c0_65], %213 {strides = array<i32>} : memref<64x128xf32, #tpu.memory_space<vmem>>, vector<8x128xf32>,
    %c6_i32 = arith.constant 6 : i32
    %c8_i32_66 = arith.constant 8 : i32
    %216 = arith.muli %c6_i32, %c8_i32_66 : i32
    %217 = tpu.assume_multiple %216, 8 : i32
    %218 = arith.index_cast %217 : i32 to index
    %c0_67 = arith.constant 0 : index
    %219 = vector.load %arg6[%218, %c0_67] : memref<64x512xf32, #tpu.memory_space<vmem>>, vector<8x512xf32>
    %c0_68 = arith.constant 0 : index
    %c0_69 = arith.constant 0 : index
    %220 = vector.load %arg3[%c0_68, %c0_69] : memref<128x512xf32, #tpu.memory_space<vmem>>, vector<128x512xf32>
    %cst_70 = arith.constant dense<0.000000e+00> : vector<8x512xf32>
    %221 = tpu.matmul %213, %220, %cst_70 {dimension_numbers = #tpu.dot_dimension_numbers<[1], [0], [0], [1], [0, 0, 1, 1], [], []>} : vector<8x128xf32>, vector<128x512xf32>, vector<8x512xf32> -> vector<8x512xf32>
    %222 = arith.addf %219, %221 : vector<8x512xf32>
    %223 = vector.extract_strided_slice %222 {offsets = [0, 0], sizes = [8, 128], strides = [1, 1]} : vector<8x512xf32> to vector<8x128xf32>
    %224 = arith.negf %223 : vector<8x128xf32>
    %225 = math.exp %224 : vector<8x128xf32>
    %cst_71 = arith.constant 1.000000e+00 : f32
    %226 = vector.broadcast %cst_71 : f32 to vector<8x128xf32>
    %227 = arith.addf %226, %225 : vector<8x128xf32>
    %228 = arith.divf %226, %227 : vector<8x128xf32>
    %229 = vector.extract_strided_slice %222 {offsets = [0, 128], sizes = [8, 128], strides = [1, 1]} : vector<8x512xf32> to vector<8x128xf32>
    %230 = arith.negf %229 : vector<8x128xf32>
    %231 = math.exp %230 : vector<8x128xf32>
    %cst_72 = arith.constant 1.000000e+00 : f32
    %232 = vector.broadcast %cst_72 : f32 to vector<8x128xf32>
    %233 = arith.addf %232, %231 : vector<8x128xf32>
    %234 = arith.divf %232, %233 : vector<8x128xf32>
    %235 = vector.extract_strided_slice %222 {offsets = [0, 256], sizes = [8, 128], strides = [1, 1]} : vector<8x512xf32> to vector<8x128xf32>
    %236 = math.tanh %235 : vector<8x128xf32>
    %237 = vector.extract_strided_slice %222 {offsets = [0, 384], sizes = [8, 128], strides = [1, 1]} : vector<8x512xf32> to vector<8x128xf32>
    %238 = arith.negf %237 : vector<8x128xf32>
    %239 = math.exp %238 : vector<8x128xf32>
    %cst_73 = arith.constant 1.000000e+00 : f32
    %240 = vector.broadcast %cst_73 : f32 to vector<8x128xf32>
    %241 = arith.addf %240, %239 : vector<8x128xf32>
    %242 = arith.divf %240, %241 : vector<8x128xf32>
    %243 = arith.mulf %234, %211 : vector<8x128xf32>
    %244 = arith.mulf %228, %236 : vector<8x128xf32>
    %245 = arith.addf %243, %244 : vector<8x128xf32>
    %246 = math.tanh %245 : vector<8x128xf32>
    %247 = arith.mulf %242, %246 : vector<8x128xf32>
    %248 = arith.index_cast %217 : i32 to index
    %c0_74 = arith.constant 0 : index
    %249 = vector.load %arg5[%248, %c0_74] : memref<64x128xf32, #tpu.memory_space<vmem>>, vector<8x128xf32>
    tpu.vector_store %arg5[%248, %c0_74], %247 {strides = array<i32>} : memref<64x128xf32, #tpu.memory_space<vmem>>, vector<8x128xf32>,
    %c7_i32 = arith.constant 7 : i32
    %c8_i32_75 = arith.constant 8 : i32
    %250 = arith.muli %c7_i32, %c8_i32_75 : i32
    %251 = tpu.assume_multiple %250, 8 : i32
    %252 = arith.index_cast %251 : i32 to index
    %c0_76 = arith.constant 0 : index
    %253 = vector.load %arg6[%252, %c0_76] : memref<64x512xf32, #tpu.memory_space<vmem>>, vector<8x512xf32>
    %c0_77 = arith.constant 0 : index
    %c0_78 = arith.constant 0 : index
    %254 = vector.load %arg3[%c0_77, %c0_78] : memref<128x512xf32, #tpu.memory_space<vmem>>, vector<128x512xf32>
    %cst_79 = arith.constant dense<0.000000e+00> : vector<8x512xf32>
    %255 = tpu.matmul %247, %254, %cst_79 {dimension_numbers = #tpu.dot_dimension_numbers<[1], [0], [0], [1], [0, 0, 1, 1], [], []>} : vector<8x128xf32>, vector<128x512xf32>, vector<8x512xf32> -> vector<8x512xf32>
    %256 = arith.addf %253, %255 : vector<8x512xf32>
    %257 = vector.extract_strided_slice %256 {offsets = [0, 0], sizes = [8, 128], strides = [1, 1]} : vector<8x512xf32> to vector<8x128xf32>
    %258 = arith.negf %257 : vector<8x128xf32>
    %259 = math.exp %258 : vector<8x128xf32>
    %cst_80 = arith.constant 1.000000e+00 : f32
    %260 = vector.broadcast %cst_80 : f32 to vector<8x128xf32>
    %261 = arith.addf %260, %259 : vector<8x128xf32>
    %262 = arith.divf %260, %261 : vector<8x128xf32>
    %263 = vector.extract_strided_slice %256 {offsets = [0, 128], sizes = [8, 128], strides = [1, 1]} : vector<8x512xf32> to vector<8x128xf32>
    %264 = arith.negf %263 : vector<8x128xf32>
    %265 = math.exp %264 : vector<8x128xf32>
    %cst_81 = arith.constant 1.000000e+00 : f32
    %266 = vector.broadcast %cst_81 : f32 to vector<8x128xf32>
    %267 = arith.addf %266, %265 : vector<8x128xf32>
    %268 = arith.divf %266, %267 : vector<8x128xf32>
    %269 = vector.extract_strided_slice %256 {offsets = [0, 256], sizes = [8, 128], strides = [1, 1]} : vector<8x512xf32> to vector<8x128xf32>
    %270 = math.tanh %269 : vector<8x128xf32>
    %271 = vector.extract_strided_slice %256 {offsets = [0, 384], sizes = [8, 128], strides = [1, 1]} : vector<8x512xf32> to vector<8x128xf32>
    %272 = arith.negf %271 : vector<8x128xf32>
    %273 = math.exp %272 : vector<8x128xf32>
    %cst_82 = arith.constant 1.000000e+00 : f32
    %274 = vector.broadcast %cst_82 : f32 to vector<8x128xf32>
    %275 = arith.addf %274, %273 : vector<8x128xf32>
    %276 = arith.divf %274, %275 : vector<8x128xf32>
    %277 = arith.mulf %268, %245 : vector<8x128xf32>
    %278 = arith.mulf %262, %270 : vector<8x128xf32>
    %279 = arith.addf %277, %278 : vector<8x128xf32>
    %280 = math.tanh %279 : vector<8x128xf32>
    %281 = arith.mulf %276, %280 : vector<8x128xf32>
    %282 = arith.index_cast %251 : i32 to index
    %c0_83 = arith.constant 0 : index
    %283 = vector.load %arg5[%282, %c0_83] : memref<64x128xf32, #tpu.memory_space<vmem>>, vector<8x128xf32>
    tpu.vector_store %arg5[%282, %c0_83], %281 {strides = array<i32>} : memref<64x128xf32, #tpu.memory_space<vmem>>, vector<8x128xf32>,
    %c8_i32_84 = arith.constant 8 : i32
    %c0_85 = arith.constant 0 : index
    %c0_86 = arith.constant 0 : index
    %284 = vector.load %arg7[%c0_85, %c0_86] : memref<8x128xf32, #tpu.memory_space<vmem>>, vector<8x128xf32>
    tpu.vector_store %arg7[%c0_85, %c0_86], %281 {strides = array<i32>} : memref<8x128xf32, #tpu.memory_space<vmem>>, vector<8x128xf32>,
    %c0_87 = arith.constant 0 : index
    %c0_88 = arith.constant 0 : index
    %285 = vector.load %arg8[%c0_87, %c0_88] : memref<8x128xf32, #tpu.memory_space<vmem>>, vector<8x128xf32>
    tpu.vector_store %arg8[%c0_87, %c0_88], %279 {strides = array<i32>} : memref<8x128xf32, #tpu.memory_space<vmem>>, vector<8x128xf32>,
    return
  }
  func.func @transform_0(%arg0: i32) -> (i32, i32) {
    %c0_i32 = arith.constant 0 : i32
    %c0_i32_0 = arith.constant 0 : i32
    return %arg0, %c0_i32 : i32, i32
  }
  func.func @transform_1(%arg0: i32) -> (i32, i32) {
    %c0_i32 = arith.constant 0 : i32
    %c0_i32_0 = arith.constant 0 : i32
    %c0_i32_1 = arith.constant 0 : i32
    return %c0_i32, %c0_i32_0 : i32, i32
  }
  func.func @transform_2(%arg0: i32) -> (i32, i32) {
    %c0_i32 = arith.constant 0 : i32
    %c0_i32_0 = arith.constant 0 : i32
    %c0_i32_1 = arith.constant 0 : i32
    return %c0_i32, %c0_i32_0 : i32, i32
  }
  func.func @transform_3(%arg0: i32) -> (i32, i32) {
    %c0_i32 = arith.constant 0 : i32
    %c0_i32_0 = arith.constant 0 : i32
    %c0_i32_1 = arith.constant 0 : i32
    return %c0_i32, %c0_i32_0 : i32, i32
  }
  func.func @transform_4(%arg0: i32) -> (i32, i32) {
    %c0_i32 = arith.constant 0 : i32
    %c0_i32_0 = arith.constant 0 : i32
    return %arg0, %c0_i32 : i32, i32
  }
}

</mosaic_0001>

<bundles_post_ra>
// kernel: forward.3
= control target key start
LH: loop header
LB: loop body
LE: loop exit
PB: predicated region body
PF: predicated region fallthrough
CT: control target
= control target key end

     0   :  { %s209_s0 = inlined_call_operand.vmem [shape: f32[16,128], index: 0, kind: input, shape index: {}]   ;;  %s210_s1 = inlined_call_operand.vmem [shape: f32[128,128], index: 1, kind: input, shape index: {}]   ;;  %s211_s2 = inlined_call_operand.vmem [shape: f32[1,128], index: 2, kind: input, shape index: {}]   ;;  %s212_s3 = inlined_call_operand.hbm [shape: f32[16,128], index: 3, kind: output, shape index: {}]  }
   0x1   :  { %v32_v0 = vld [vmem:[%s210_s1 + $0x78] sm:$0xff]  ;;  %v31_v1 = vld [vmem:[%s210_s1 + $0x70] sm:$0xff]  ;;  %v30_v2 = vld [vmem:[%s210_s1 + $0x68] sm:$0xff] }
   0x2   :  { %37 = vmatpush.msra.mxu0 %v32_v0  ;;  %80 = vmatpush.msra.mxu1 %v32_v0  ;;  %v29_v3 = vld [vmem:[%s210_s1 + $0x60] sm:$0xff]  ;;  %v28_v4 = vld [vmem:[%s210_s1 + $0x58] sm:$0xff] }
   0x4   :  { %38 = vmatpush.msra.mxu0 %v31_v1  ;;  %81 = vmatpush.msra.mxu1 %v31_v1 }
   0x6   :  { %39 = vmatpush.msra.mxu0 %v30_v2  ;;  %82 = vmatpush.msra.mxu1 %v30_v2 }
   0x7   :  { %8 = vsyncpa [#allocation3], 0  ;;  %v27_v5 = vld [vmem:[%s210_s1 + $0x50] sm:$0xff]  ;;  %v26_v6 = vld [vmem:[%s210_s1 + $0x48] sm:$0xff]  ;;  %s126_s23 = smov [#allocation2]   ;;  %s68_s26 = sshll.u32 %s212_s3, 4  ;;  %s69_s26 = int_to_ptr.hbm [resolvable:$true] %s68_s26 }
   0x8   :  { %40 = vmatpush.msra.mxu0 %v29_v3  ;;  %83 = vmatpush.msra.mxu1 %v29_v3  ;;  %v25_v7 = vld [vmem:[%s210_s1 + $0x40] sm:$0xff]  ;;  %v24_v8 = vld [vmem:[%s210_s1 + $0x38] sm:$0xff]  ;;  %v23_v9 = vld [vmem:[%s210_s1 + $0x30] sm:$0xff]  ;;  %s128_s27 = smov 8  }
   0x9   :  { %v22_v10 = vld [vmem:[%s210_s1 + $0x28] sm:$0xff]  ;;  %v21_v11 = vld [vmem:[%s210_s1 + $0x20] sm:$0xff]  ;;  %v20_v12 = vld [vmem:[%s210_s1 + $0x18] sm:$0xff] }
   0xa   :  { %41 = vmatpush.msra.mxu0 %v28_v4  ;;  %84 = vmatpush.msra.mxu1 %v28_v4  ;;  %v19_v13 = vld [vmem:[%s210_s1 + $0x10] sm:$0xff]  ;;  %v18_v14 = vld [vmem:[%s210_s1 + $0x8] sm:$0xff]  ;;  %v17_v15 = vld [vmem:[%s210_s1] sm:$0xff]  ;;  %s66_s1 = sshll.u32 %s126_s23, 4  ;;  %s67_s1 = int_to_ptr.vmem [resolvable:$true] %s66_s1 }
   0xb   :  { %v15_v16 = vld [vmem:[%s209_s0] sm:$0xff]  ;;  %v16_v17 = vld [vmem:[%s209_s0 + $0x8] sm:$0xff]  ;;  %s127_s0 = smov 128  }
   0xc   :  { %42 = vmatpush.msra.mxu0 %v27_v5  ;;  %85 = vmatpush.msra.mxu1 %v27_v5  ;;  %v99_v18 = vld [vmem:[%s211_s2] ss:$0 sm:$0xff] }
   0xe   :  { %43 = vmatpush.msra.mxu0 %v26_v6  ;;  %86 = vmatpush.msra.mxu1 %v26_v6 }
  0x10   :  { %44 = vmatpush.msra.mxu0 %v25_v7  ;;  %87 = vmatpush.msra.mxu1 %v25_v7 }
  0x12   :  { %45 = vmatpush.msra.mxu0 %v24_v8  ;;  %88 = vmatpush.msra.mxu1 %v24_v8 }
  0x14   :  { %46 = vmatpush.msra.mxu0 %v23_v9  ;;  %89 = vmatpush.msra.mxu1 %v23_v9 }
  0x16   :  { %47 = vmatpush.msra.mxu0 %v22_v10  ;;  %90 = vmatpush.msra.mxu1 %v22_v10 }
  0x18   :  { %48 = vmatpush.msra.mxu0 %v21_v11  ;;  %91 = vmatpush.msra.mxu1 %v21_v11 }
  0x1a   :  { %49 = vmatpush.msra.mxu0 %v20_v12  ;;  %92 = vmatpush.msra.mxu1 %v20_v12 }
  0x1c   :  { %50 = vmatpush.msra.mxu0 %v19_v13  ;;  %93 = vmatpush.msra.mxu1 %v19_v13 }
  0x1e   :  { %51 = vmatpush.msra.mxu0 %v18_v14  ;;  %94 = vmatpush.msra.mxu1 %v18_v14 }
  0x20   :  { %52 = vmatpush.msra.mxu0 %v17_v15  ;;  %95 = vmatpush.msra.mxu1 %v17_v15 }
  0x21   :  { %53 = vmatmul.f32.vlgmr.msra.gmra.mxu0 %v15_v16  ;;  %56 = vmatmul.f32.vlgmr.msra.gmra.mxu1 %v16_v17 }
  0x9e   :  { %v54_v19 = vpop.f32.mrf.mxu0  ;;  %v57_v20 = vpop.f32.mrf.mxu1 }
  0x9f   :  { %v55_v21 = vadd.f32 %v99_v18, %v54_v19  ;;  %v58_v22 = vadd.f32 %v99_v18, %v57_v20 }
  0xa1   :  { %60 = vst [vmem:[#allocation2] sm:$0xff] %v55_v21 }
  0xa2   :  { %61 = vst [vmem:[#allocation2 + $0x8] sm:$0xff] %v58_v22 }
  0xa3   :  { %74 = dma.vmem_to_hbm [thread:$0]  %s67_s1, 256, %s69_s26, [#allocation3], %s127_s0, %s127_s0, %s128_s27  }
  0xa4   :  { %124 = dma.done.wait [#allocation3], 256  }
  0xa5   :  { %125 = vsyncadd [#allocation3], 4294967040 }
  0xa6   :  { %79 = vsyncpa [#allocation3], 1 }

// kernel: forward.2
= control target key start
LH: loop header
LB: loop body
LE: loop exit
PB: predicated region body
PF: predicated region fallthrough
CT: control target
= control target key end

     0   :  { %9 = vsyncpa [#allocation6], 0  ;;  %s2290_s18 = smov [#allocation5]   ;;  %s2291_s20 = smov 512   ;;  %s3537_s0 = inlined_call_operand.vmem [shape: f32[64,32], index: 0, kind: input, shape index: {}]   ;;  %s3538_s1 = inlined_call_operand.vmem [shape: f32[32,512], index: 1, kind: input, shape index: {}]   ;;  %s3539_s2 = inlined_call_operand.hbm [shape: f32[128,512], index: 2, kind: input, shape index: {}]   ;;  %s3540_s3 = inlined_call_operand.vmem [shape: f32[1,512], index: 3, kind: input, shape index: {}]   ;;  %s3541_s4 = inlined_call_operand.vmem [shape: f32[64,128], index: 4, kind: output, shape index: {}]  }
   0x1   :  { %s18_s17 = sshll.u32 %s3539_s2, 4  ;;  %s20_s19 = sshll.u32 %s2290_s18, 4  ;;  %s19_s17 = int_to_ptr.hbm [resolvable:$true] %s18_s17  ;;  %s21_s19 = int_to_ptr.vmem [resolvable:$true] %s20_s19 }
   0x2   :  { %s2292_s21 = smov 32  }
   0x3   :  { %26 = dma.hbm_to_vmem [thread:$0]  %s19_s17, 8192, %s21_s19, [#allocation6], %s2291_s20, %s2291_s20, %s2292_s21  }
   0x4   :  { %2288 = dma.done.wait [#allocation6], 8192  }
   0x5   :  { %2289 = vsyncadd [#allocation6], 4294959104  ;;  %v59_v0 = vld [vmem:[%s3538_s1 + $0x60] sm:$0xff]  ;;  %v60_v1 = vld [vmem:[%s3538_s1 + $0x68] sm:$0xff]  ;;  %vm73_vm0 = vcmask 261120  }
   0x6   :  { %v61_v2 = vld [vmem:[%s3538_s1 + $0x70] sm:$0xff]  ;;  %110 = vmatpush.msra.mxu0 %v59_v0  ;;  %151 = vmatpush.msra.mxu1 %v60_v1  ;;  %v62_v3 = vld [vmem:[%s3538_s1 + $0x78] sm:$0xff]  ;;  %v55_v4 = vld [vmem:[%s3538_s1 + $0x40] sm:$0xff] }
   0x7   :  { %v56_v5 = vld [vmem:[%s3538_s1 + $0x48] sm:$0xff]  ;;  %192 = vmatpush.msra.mxu2 %v61_v2  ;;  %233 = vmatpush.msra.mxu3 %v62_v3  ;;  %v57_v6 = vld [vmem:[%s3538_s1 + $0x50] sm:$0xff]  ;;  %v58_v7 = vld [vmem:[%s3538_s1 + $0x58] sm:$0xff] }
   0x8   :  { %v51_v8 = vld [vmem:[%s3538_s1 + $0x20] sm:$0xff]  ;;  %111 = vmatpush.msra.mxu0 %v55_v4  ;;  %152 = vmatpush.msra.mxu1 %v56_v5  ;;  %v52_v9 = vld [vmem:[%s3538_s1 + $0x28] sm:$0xff]  ;;  %v53_v10 = vld [vmem:[%s3538_s1 + $0x30] sm:$0xff] }
   0x9   :  { %v54_v11 = vld [vmem:[%s3538_s1 + $0x38] sm:$0xff]  ;;  %193 = vmatpush.msra.mxu2 %v57_v6  ;;  %234 = vmatpush.msra.mxu3 %v58_v7  ;;  %v47_v12 = vld [vmem:[%s3538_s1] sm:$0xff]  ;;  %v48_v13 = vld [vmem:[%s3538_s1 + $0x8] sm:$0xff] }
   0xa   :  { %112 = vmatpush.msra.mxu0 %v51_v8  ;;  %153 = vmatpush.msra.mxu1 %v52_v9  ;;  %v49_v14 = vld [vmem:[%s3538_s1 + $0x10] sm:$0xff]  ;;  %v50_v15 = vld [vmem:[%s3538_s1 + $0x18] sm:$0xff]  ;;  %v39_v16 = vld [vmem:[%s3537_s0] sm:$0xff] }
   0xb   :  { %194 = vmatpush.msra.mxu2 %v53_v10  ;;  %235 = vmatpush.msra.mxu3 %v54_v11  ;;  %v2373_v17 = vld [vmem:[#allocation5 + $0x1e0] sm:$0xff]  ;;  %v2375_v18 = vld [vmem:[#allocation5 + $0x1e8] sm:$0xff]  ;;  %v2379_v19 = vld [vmem:[#allocation5 + $0x1f8] sm:$0xff] }
   0xc   :  { %113 = vmatpush.msra.mxu0 %v47_v12  ;;  %154 = vmatpush.msra.mxu1 %v48_v13  ;;  %v2381_v20 = vld [vmem:[#allocation5 + $0x1f0] sm:$0xff]  ;;  %v2385_v21 = vld [vmem:[#allocation5 + $0x1c0] sm:$0xff]  ;;  %v2387_v22 = vld [vmem:[#allocation5 + $0x1c8] sm:$0xff] }
   0xd   :  { %195 = vmatpush.msra.mxu2 %v49_v14  ;;  %236 = vmatpush.msra.mxu3 %v50_v15  ;;  %v2391_v23 = vld [vmem:[#allocation5 + $0x1d8] sm:$0xff]  ;;  %v2393_v24 = vld [vmem:[#allocation5 + $0x1d0] sm:$0xff]  ;;  %v2396_v25 = vld [vmem:[#allocation5 + $0x1a0] sm:$0xff] }
   0xe   :  { %2069 = vmatmul.msk.f32.vlgmr.msra.gmra.mxu0 %vm73_vm0, %v39_v16  ;;  %2077 = vmatmul.msk.f32.vlgmr.msra.gmra.mxu1 %vm73_vm0, %v39_v16  ;;  %v2398_v26 = vld [vmem:[#allocation5 + $0x1a8] sm:$0xff]  ;;  %v2403_v27 = vld [vmem:[#allocation5 + $0x1b8] sm:$0xff]  ;;  %v2405_v28 = vld [vmem:[#allocation5 + $0x1b0] sm:$0xff] }
   0xf   :  { %2085 = vmatmul.msk.f32.vlgmr.msra.gmra.mxu2 %vm73_vm0, %v39_v16  ;;  %2093 = vmatmul.msk.f32.vlgmr.msra.gmra.mxu3 %vm73_vm0, %v39_v16  ;;  %v40_v29 = vld [vmem:[%s3537_s0 + $0x8] sm:$0xff]  ;;  %v2414_v30 = vld [vmem:[#allocation5 + $0x180] sm:$0xff]  ;;  %v2422_v32 = vld [vmem:[#allocation5 + $0x198] sm:$0xff] }
  0x10   :  { %367 = vmatpush.msrb.mxu0 %v2373_v17  ;;  %387 = vmatpush.msrb.mxu1 %v2375_v18  ;;  %v2416_v31 = vld [vmem:[#allocation5 + $0x188] sm:$0xff]  ;;  %v2424_v33 = vld [vmem:[#allocation5 + $0x190] sm:$0xff]  ;;  %v2428_v34 = vld [vmem:[#allocation5 + $0x160] sm:$0xff] }
  0x11   :  { %427 = vmatpush.msrb.mxu3 %v2379_v19  ;;  %407 = vmatpush.msrb.mxu2 %v2381_v20  ;;  %v2430_v35 = vld [vmem:[#allocation5 + $0x168] sm:$0xff]  ;;  %v2434_v36 = vld [vmem:[#allocation5 + $0x178] sm:$0xff]  ;;  %v2436_v37 = vld [vmem:[#allocation5 + $0x170] sm:$0xff] }
  0x12   :  { %368 = vmatpush.msrb.mxu0 %v2385_v21  ;;  %388 = vmatpush.msrb.mxu1 %v2387_v22  ;;  %v2439_v38 = vld [vmem:[#allocation5 + $0x140] sm:$0xff]  ;;  %v2441_v39 = vld [vmem:[#allocation5 + $0x148] sm:$0xff]  ;;  %v2446_v40 = vld [vmem:[#allocation5 + $0x158] sm:$0xff] }
  0x13   :  { %428 = vmatpush.msrb.mxu3 %v2391_v23  ;;  %408 = vmatpush.msrb.mxu2 %v2393_v24  ;;  %v2448_v41 = vld [vmem:[#allocation5 + $0x150] sm:$0xff]  ;;  %v2457_v43 = vld [vmem:[#allocation5 + $0x120] sm:$0xff]  ;;  %v2459_v44 = vld [vmem:[#allocation5 + $0x128] sm:$0xff] }
  0x14   :  { %369 = vmatpush.msrb.mxu0 %v2396_v25  ;;  %389 = vmatpush.msrb.mxu1 %v2398_v26  ;;  %v41_v42 = vld [vmem:[%s3537_s0 + $0x10] sm:$0xff]  ;;  %v2465_v45 = vld [vmem:[#allocation5 + $0x138] sm:$0xff]  ;;  %v2471_v47 = vld [vmem:[#allocation5 + $0x100] sm:$0xff] }
  0x15   :  { %429 = vmatpush.msrb.mxu3 %v2403_v27  ;;  %409 = vmatpush.msrb.mxu2 %v2405_v28  ;;  %v2467_v46 = vld [vmem:[#allocation5 + $0x130] sm:$0xff]  ;;  %v2473_v48 = vld [vmem:[#allocation5 + $0x108] sm:$0xff]  ;;  %v2477_v49 = vld [vmem:[#allocation5 + $0x118] sm:$0xff] }
  0x16   :  { %2070 = vmatmul.msk.f32.gmra.mxu0 %vm73_vm0, %v40_v29  ;;  %2078 = vmatmul.msk.f32.gmra.mxu1 %vm73_vm0, %v40_v29  ;;  %v2479_v50 = vld [vmem:[#allocation5 + $0x110] sm:$0xff]  ;;  %v2482_v51 = vld [vmem:[#allocation5 + $0xe0] sm:$0xff]  ;;  %v2484_v52 = vld [vmem:[#allocation5 + $0xe8] sm:$0xff] }
  0x17   :  { %2086 = vmatmul.msk.f32.gmra.mxu2 %vm73_vm0, %v40_v29  ;;  %2094 = vmatmul.msk.f32.gmra.mxu3 %vm73_vm0, %v40_v29  ;;  %v2489_v53 = vld [vmem:[#allocation5 + $0xf8] sm:$0xff]  ;;  %v2491_v54 = vld [vmem:[#allocation5 + $0xf0] sm:$0xff]  ;;  %v2500_v56 = vld [vmem:[#allocation5 + $0xc0] sm:$0xff] }
  0x18   :  { %370 = vmatpush.msrb.mxu0 %v2414_v30  ;;  %390 = vmatpush.msrb.mxu1 %v2416_v31  ;;  %v42_v55 = vld [vmem:[%s3537_s0 + $0x18] sm:$0xff]  ;;  %v2502_v57 = vld [vmem:[#allocation5 + $0xc8] sm:$0xff]  ;;  %v2510_v59 = vld [vmem:[#allocation5 + $0xd0] sm:$0xff] }
  0x19   :  { %430 = vmatpush.msrb.mxu3 %v2422_v32  ;;  %410 = vmatpush.msrb.mxu2 %v2424_v33  ;;  %v2508_v58 = vld [vmem:[#allocation5 + $0xd8] sm:$0xff]  ;;  %v2514_v60 = vld [vmem:[#allocation5 + $0xa0] sm:$0xff]  ;;  %v2516_v61 = vld [vmem:[#allocation5 + $0xa8] sm:$0xff] }
  0x1a   :  { %371 = vmatpush.msrb.mxu0 %v2428_v34  ;;  %391 = vmatpush.msrb.mxu1 %v2430_v35  ;;  %v2520_v62 = vld [vmem:[#allocation5 + $0xb8] sm:$0xff]  ;;  %v2522_v63 = vld [vmem:[#allocation5 + $0xb0] sm:$0xff]  ;;  %v2525_v0 = vld [vmem:[#allocation5 + $0x80] sm:$0xff] }
  0x1b   :  { %431 = vmatpush.msrb.mxu3 %v2434_v36  ;;  %411 = vmatpush.msrb.mxu2 %v2436_v37  ;;  %v2527_v1 = vld [vmem:[#allocation5 + $0x88] sm:$0xff]  ;;  %v2532_v2 = vld [vmem:[#allocation5 + $0x98] sm:$0xff]  ;;  %v2534_v3 = vld [vmem:[#allocation5 + $0x90] sm:$0xff] }
  0x1c   :  { %372 = vmatpush.msrb.mxu0 %v2439_v38  ;;  %392 = vmatpush.msrb.mxu1 %v2441_v39  ;;  %v43_v4 = vld [vmem:[%s3537_s0 + $0x20] sm:$0xff]  ;;  %v2545_v6 = vld [vmem:[#allocation5 + $0x68] sm:$0xff]  ;;  %v2551_v7 = vld [vmem:[#allocation5 + $0x78] sm:$0xff] }
  0x1d   :  { %432 = vmatpush.msrb.mxu3 %v2446_v40  ;;  %412 = vmatpush.msrb.mxu2 %v2448_v41  ;;  %v2543_v5 = vld [vmem:[#allocation5 + $0x60] sm:$0xff]  ;;  %v2553_v8 = vld [vmem:[#allocation5 + $0x70] sm:$0xff]  ;;  %v2559_v10 = vld [vmem:[#allocation5 + $0x48] sm:$0xff] }
  0x1e   :  { %2071 = vmatmul.msk.f32.gmra.mxu0 %vm73_vm0, %v41_v42  ;;  %2079 = vmatmul.msk.f32.gmra.mxu1 %vm73_vm0, %v41_v42  ;;  %v2557_v9 = vld [vmem:[#allocation5 + $0x40] sm:$0xff]  ;;  %v2563_v11 = vld [vmem:[#allocation5 + $0x58] sm:$0xff]  ;;  %v2565_v12 = vld [vmem:[#allocation5 + $0x50] sm:$0xff] }
  0x1f   :  { %2087 = vmatmul.msk.f32.gmra.mxu2 %vm73_vm0, %v41_v42  ;;  %2095 = vmatmul.msk.f32.gmra.mxu3 %vm73_vm0, %v41_v42  ;;  %3579 = vst [vmem:[#allocation8_spill] sm:$0xff] %v2563_v11  ;;  %v2568_v13 = vld [vmem:[#allocation5 + $0x20] sm:$0xff]  ;;  %v2570_v14 = vld [vmem:[#allocation5 + $0x28] sm:$0xff]  ;;  %v2575_v15 = vld [vmem:[#allocation5 + $0x30] sm:$0xff] }
  0x20   :  { %373 = vmatpush.msrb.mxu0 %v2457_v43  ;;  %393 = vmatpush.msrb.mxu1 %v2459_v44  ;;  %v2577_v16 = vld [vmem:[#allocation5 + $0x38] sm:$0xff]  ;;  %v44_v29 = vld [vmem:[%s3537_s0 + $0x28] sm:$0xff]  ;;  %v2586_v42 = vld [vmem:[#allocation5] sm:$0xff] }
  0x21   :  { %433 = vmatpush.msrb.mxu3 %v2465_v45  ;;  %413 = vmatpush.msrb.mxu2 %v2467_v46  ;;  %3580 = vst [vmem:[#allocation9_spill] sm:$0xff] %v2577_v16 }
  0x22   :  { %374 = vmatpush.msrb.mxu0 %v2471_v47  ;;  %394 = vmatpush.msrb.mxu1 %v2473_v48 }
  0x23   :  { %434 = vmatpush.msrb.mxu3 %v2477_v49  ;;  %414 = vmatpush.msrb.mxu2 %v2479_v50 }
  0x24   :  { %375 = vmatpush.msrb.mxu0 %v2482_v51  ;;  %395 = vmatpush.msrb.mxu1 %v2484_v52 }
  0x25   :  { %435 = vmatpush.msrb.mxu3 %v2489_v53  ;;  %415 = vmatpush.msrb.mxu2 %v2491_v54 }
  0x26   :  { %2072 = vmatmul.msk.f32.gmra.mxu0 %vm73_vm0, %v42_v55  ;;  %2080 = vmatmul.msk.f32.gmra.mxu1 %vm73_vm0, %v42_v55 }
  0x27   :  { %2088 = vmatmul.msk.f32.gmra.mxu2 %vm73_vm0, %v42_v55  ;;  %2096 = vmatmul.msk.f32.gmra.mxu3 %vm73_vm0, %v42_v55  ;;  %v2588_v55 = vld [vmem:[#allocation5 + $0x8] sm:$0xff] }
  0x28   :  { %376 = vmatpush.msrb.mxu0 %v2500_v56  ;;  %396 = vmatpush.msrb.mxu1 %v2502_v57 }
  0x29   :  { %436 = vmatpush.msrb.mxu3 %v2508_v58  ;;  %416 = vmatpush.msrb.mxu2 %v2510_v59 }
  0x2a   :  { %377 = vmatpush.msrb.mxu0 %v2514_v60  ;;  %397 = vmatpush.msrb.mxu1 %v2516_v61 }
  0x2b   :  { %437 = vmatpush.msrb.mxu3 %v2520_v62  ;;  %417 = vmatpush.msrb.mxu2 %v2522_v63 }
  0x2c   :  { %378 = vmatpush.msrb.mxu0 %v2525_v0  ;;  %398 = vmatpush.msrb.mxu1 %v2527_v1 }
  0x2d   :  { %438 = vmatpush.msrb.mxu3 %v2532_v2  ;;  %418 = vmatpush.msrb.mxu2 %v2534_v3 }
  0x2e   :  { %2073 = vmatmul.msk.f32.gmra.mxu0 %vm73_vm0, %v43_v4  ;;  %2081 = vmatmul.msk.f32.gmra.mxu1 %vm73_vm0, %v43_v4 }
  0x2f   :  { %2089 = vmatmul.msk.f32.gmra.mxu2 %vm73_vm0, %v43_v4  ;;  %2097 = vmatmul.msk.f32.gmra.mxu3 %vm73_vm0, %v43_v4  ;;  %v2594_v4 = vld [vmem:[#allocation5 + $0x10] sm:$0xff] }
  0x30   :  { %379 = vmatpush.msrb.mxu0 %v2543_v5  ;;  %399 = vmatpush.msrb.mxu1 %v2545_v6 }
  0x31   :  { %439 = vmatpush.msrb.mxu3 %v2551_v7  ;;  %419 = vmatpush.msrb.mxu2 %v2553_v8 }
  0x32   :  { %380 = vmatpush.msrb.mxu0 %v2557_v9  ;;  %400 = vmatpush.msrb.mxu1 %v2559_v10 }
  0x33   :  { %440 = vmatpush.msrb.mxu3 %v2563_v11  ;;  %420 = vmatpush.msrb.mxu2 %v2565_v12  ;;  %v2596_v11 = vld [vmem:[#allocation5 + $0x18] sm:$0xff] }
  0x34   :  { %381 = vmatpush.msrb.mxu0 %v2568_v13  ;;  %401 = vmatpush.msrb.mxu1 %v2570_v14 }
  0x35   :  { %421 = vmatpush.msrb.mxu2 %v2575_v15  ;;  %441 = vmatpush.msrb.mxu3 %v2577_v16  ;;  %v45_v16 = vld [vmem:[%s3537_s0 + $0x30] sm:$0xff] }
  0x36   :  { %2074 = vmatmul.msk.f32.gmra.mxu0 %vm73_vm0, %v44_v29  ;;  %2082 = vmatmul.msk.f32.gmra.mxu1 %vm73_vm0, %v44_v29 }
  0x37   :  { %2090 = vmatmul.msk.f32.gmra.mxu2 %vm73_vm0, %v44_v29  ;;  %2098 = vmatmul.msk.f32.gmra.mxu3 %vm73_vm0, %v44_v29  ;;  %v46_v29 = vld [vmem:[%s3537_s0 + $0x38] sm:$0xff] }
  0x38   :  { %382 = vmatpush.msrb.mxu0 %v2586_v42  ;;  %402 = vmatpush.msrb.mxu1 %v2588_v55 }
  0x39   :  { %422 = vmatpush.msrb.mxu2 %v2594_v4  ;;  %442 = vmatpush.msrb.mxu3 %v2596_v11 }
  0x3a   :  { %586 = vmatpush.msra.mxu0 %v2373_v17  ;;  %606 = vmatpush.msra.mxu1 %v2375_v18 }
  0x3b   :  { %626 = vmatpush.msra.mxu2 %v2381_v20  ;;  %646 = vmatpush.msra.mxu3 %v2379_v19 }
  0x3c   :  { %587 = vmatpush.msra.mxu0 %v2385_v21  ;;  %607 = vmatpush.msra.mxu1 %v2387_v22 }
  0x3d   :  { %627 = vmatpush.msra.mxu2 %v2393_v24  ;;  %647 = vmatpush.msra.mxu3 %v2391_v23 }
  0x3e   :  { %2075 = vmatmul.msk.f32.gmra.mxu0 %vm73_vm0, %v45_v16  ;;  %2083 = vmatmul.msk.f32.gmra.mxu1 %vm73_vm0, %v45_v16 }
  0x3f   :  { %2091 = vmatmul.msk.f32.gmra.mxu2 %vm73_vm0, %v45_v16  ;;  %2099 = vmatmul.msk.f32.gmra.mxu3 %vm73_vm0, %v45_v16  ;;  %v2293_v16 = vmov 0.0  }
  0x40   :  { %588 = vmatpush.msra.mxu0 %v2396_v25  ;;  %608 = vmatpush.msra.mxu1 %v2398_v26 }
  0x41   :  { %628 = vmatpush.msra.mxu2 %v2405_v28  ;;  %648 = vmatpush.msra.mxu3 %v2403_v27 }
  0x42   :  { %589 = vmatpush.msra.mxu0 %v2414_v30  ;;  %609 = vmatpush.msra.mxu1 %v2416_v31 }
  0x43   :  { %629 = vmatpush.msra.mxu2 %v2424_v33  ;;  %649 = vmatpush.msra.mxu3 %v2422_v32 }
  0x44   :  { %590 = vmatpush.msra.mxu0 %v2428_v34  ;;  %610 = vmatpush.msra.mxu1 %v2430_v35 }
  0x45   :  { %630 = vmatpush.msra.mxu2 %v2436_v37  ;;  %650 = vmatpush.msra.mxu3 %v2434_v36 }
  0x46   :  { %2076 = vmatmul.msk.f32.gmra.mxu0 %vm73_vm0, %v46_v29  ;;  %2084 = vmatmul.msk.f32.gmra.mxu1 %vm73_vm0, %v46_v29 }
  0x47   :  { %2092 = vmatmul.msk.f32.gmra.mxu2 %vm73_vm0, %v46_v29  ;;  %2100 = vmatmul.msk.f32.gmra.mxu3 %vm73_vm0, %v46_v29  ;;  %v3581_v29 = vld [vmem:[#allocation8_spill] sm:$0xff] }
  0x48   :  { %591 = vmatpush.msra.mxu0 %v2439_v38  ;;  %611 = vmatpush.msra.mxu1 %v2441_v39 }
  0x49   :  { %631 = vmatpush.msra.mxu2 %v2448_v41  ;;  %651 = vmatpush.msra.mxu3 %v2446_v40 }
  0x4a   :  { %592 = vmatpush.msra.mxu0 %v2457_v43  ;;  %612 = vmatpush.msra.mxu1 %v2459_v44 }
  0x4b   :  { %632 = vmatpush.msra.mxu2 %v2467_v46  ;;  %652 = vmatpush.msra.mxu3 %v2465_v45 }
  0x4c   :  { %593 = vmatpush.msra.mxu0 %v2471_v47  ;;  %613 = vmatpush.msra.mxu1 %v2473_v48 }
  0x4d   :  { %633 = vmatpush.msra.mxu2 %v2479_v50  ;;  %653 = vmatpush.msra.mxu3 %v2477_v49 }
  0x4e   :  { %383 = vmatmul.f32.vlgmr.msrb.gmra.mxu0 %v2293_v16  ;;  %403 = vmatmul.f32.vlgmr.msrb.gmra.mxu1 %v2293_v16 }
  0x4f   :  { %423 = vmatmul.f32.vlgmr.msrb.gmra.mxu2 %v2293_v16  ;;  %443 = vmatmul.f32.vlgmr.msrb.gmra.mxu3 %v2293_v16  ;;  %v3582_v16 = vld [vmem:[#allocation9_spill] sm:$0xff] }
  0x50   :  { %594 = vmatpush.msra.mxu0 %v2482_v51  ;;  %614 = vmatpush.msra.mxu1 %v2484_v52 }
  0x51   :  { %634 = vmatpush.msra.mxu2 %v2491_v54  ;;  %654 = vmatpush.msra.mxu3 %v2489_v53 }
  0x52   :  { %595 = vmatpush.msra.mxu0 %v2500_v56  ;;  %615 = vmatpush.msra.mxu1 %v2502_v57 }
  0x53   :  { %635 = vmatpush.msra.mxu2 %v2510_v59  ;;  %655 = vmatpush.msra.mxu3 %v2508_v58 }
  0x54   :  { %596 = vmatpush.msra.mxu0 %v2514_v60  ;;  %616 = vmatpush.msra.mxu1 %v2516_v61 }
  0x55   :  { %636 = vmatpush.msra.mxu2 %v2522_v63  ;;  %656 = vmatpush.msra.mxu3 %v2520_v62 }
  0x56   :  { %597 = vmatpush.msra.mxu0 %v2525_v0  ;;  %617 = vmatpush.msra.mxu1 %v2527_v1 }
  0x57   :  { %637 = vmatpush.msra.mxu2 %v2534_v3  ;;  %657 = vmatpush.msra.mxu3 %v2532_v2 }
  0x58   :  { %598 = vmatpush.msra.mxu0 %v2543_v5  ;;  %618 = vmatpush.msra.mxu1 %v2545_v6 }
  0x59   :  { %638 = vmatpush.msra.mxu2 %v2553_v8  ;;  %658 = vmatpush.msra.mxu3 %v2551_v7 }
  0x5a   :  { %599 = vmatpush.msra.mxu0 %v2557_v9  ;;  %619 = vmatpush.msra.mxu1 %v2559_v10 }
  0x5b   :  { %639 = vmatpush.msra.mxu2 %v2565_v12  ;;  %659 = vmatpush.msra.mxu3 %v3581_v29 }
  0x5c   :  { %600 = vmatpush.msra.mxu0 %v2568_v13  ;;  %620 = vmatpush.msra.mxu1 %v2570_v14 }
  0x5d   :  { %640 = vmatpush.msra.mxu2 %v2575_v15  ;;  %660 = vmatpush.msra.mxu3 %v3582_v16 }
  0x5e   :  { %601 = vmatpush.msra.mxu0 %v2586_v42  ;;  %621 = vmatpush.msra.mxu1 %v2588_v55 }
  0x5f   :  { %641 = vmatpush.msra.mxu2 %v2594_v4  ;;  %661 = vmatpush.msra.mxu3 %v2596_v11 }
  0x60   :  { %806 = vmatpush.msrb.mxu0 %v2373_v17  ;;  %826 = vmatpush.msrb.mxu1 %v2375_v18 }
  0x61   :  { %846 = vmatpush.msrb.mxu2 %v2381_v20  ;;  %866 = vmatpush.msrb.mxu3 %v2379_v19  ;;  %v63_v19 = vld [vmem:[%s3540_s3] sm:$0xf] }
  0x62   :  { %807 = vmatpush.msrb.mxu0 %v2385_v21  ;;  %827 = vmatpush.msrb.mxu1 %v2387_v22  ;;  %v65_v20 = vperm.slane %v63_v19, 0  ;;  %v66_v21 = vperm.slane %v63_v19, 1 }
  0x63   :  { %847 = vmatpush.msrb.mxu2 %v2393_v24  ;;  %867 = vmatpush.msrb.mxu3 %v2391_v23 }
  0x64   :  { %808 = vmatpush.msrb.mxu0 %v2396_v25  ;;  %828 = vmatpush.msrb.mxu1 %v2398_v26 }
  0x65   :  { %848 = vmatpush.msrb.mxu2 %v2405_v28  ;;  %868 = vmatpush.msrb.mxu3 %v2403_v27  ;;  %v2757_v28 = vperm.slane %v63_v19, 2 }
  0x66   :  { %809 = vmatpush.msrb.mxu0 %v2414_v30  ;;  %829 = vmatpush.msrb.mxu1 %v2416_v31  ;;  %v68_v30 = vperm.slane %v63_v19, 3 }
  0x67   :  { %849 = vmatpush.msrb.mxu2 %v2424_v33  ;;  %869 = vmatpush.msrb.mxu3 %v2422_v32 }
  0x68   :  { %810 = vmatpush.msrb.mxu0 %v2428_v34  ;;  %830 = vmatpush.msrb.mxu1 %v2430_v35 }
  0x69   :  { %850 = vmatpush.msrb.mxu2 %v2436_v37  ;;  %870 = vmatpush.msrb.mxu3 %v2434_v36 }
  0x6a   :  { %811 = vmatpush.msrb.mxu0 %v2439_v38  ;;  %831 = vmatpush.msrb.mxu1 %v2441_v39 }
  0x6b   :  { %851 = vmatpush.msrb.mxu2 %v2448_v41  ;;  %871 = vmatpush.msrb.mxu3 %v2446_v40 }
  0x6c   :  { %812 = vmatpush.msrb.mxu0 %v2457_v43  ;;  %832 = vmatpush.msrb.mxu1 %v2459_v44 }
  0x6d   :  { %852 = vmatpush.msrb.mxu2 %v2467_v46  ;;  %872 = vmatpush.msrb.mxu3 %v2465_v45 }
  0x6e   :  { %813 = vmatpush.msrb.mxu0 %v2471_v47  ;;  %833 = vmatpush.msrb.mxu1 %v2473_v48 }
  0x6f   :  { %853 = vmatpush.msrb.mxu2 %v2479_v50  ;;  %873 = vmatpush.msrb.mxu3 %v2477_v49 }
  0x70   :  { %814 = vmatpush.msrb.mxu0 %v2482_v51  ;;  %834 = vmatpush.msrb.mxu1 %v2484_v52 }
  0x71   :  { %854 = vmatpush.msrb.mxu2 %v2491_v54  ;;  %874 = vmatpush.msrb.mxu3 %v2489_v53 }
  0x72   :  { %815 = vmatpush.msrb.mxu0 %v2500_v56  ;;  %835 = vmatpush.msrb.mxu1 %v2502_v57 }
  0x73   :  { %855 = vmatpush.msrb.mxu2 %v2510_v59  ;;  %875 = vmatpush.msrb.mxu3 %v2508_v58 }
  0x74   :  { %816 = vmatpush.msrb.mxu0 %v2514_v60  ;;  %836 = vmatpush.msrb.mxu1 %v2516_v61 }
  0x75   :  { %856 = vmatpush.msrb.mxu2 %v2522_v63  ;;  %876 = vmatpush.msrb.mxu3 %v2520_v62 }
  0x76   :  { %817 = vmatpush.msrb.mxu0 %v2525_v0  ;;  %837 = vmatpush.msrb.mxu1 %v2527_v1 }
  0x77   :  { %857 = vmatpush.msrb.mxu2 %v2534_v3  ;;  %877 = vmatpush.msrb.mxu3 %v2532_v2 }
  0x78   :  { %818 = vmatpush.msrb.mxu0 %v2543_v5  ;;  %838 = vmatpush.msrb.mxu1 %v2545_v6 }
  0x79   :  { %858 = vmatpush.msrb.mxu2 %v2553_v8  ;;  %878 = vmatpush.msrb.mxu3 %v2551_v7 }
  0x7a   :  { %819 = vmatpush.msrb.mxu0 %v2557_v9  ;;  %839 = vmatpush.msrb.mxu1 %v2559_v10 }
  0x7b   :  { %859 = vmatpush.msrb.mxu2 %v2565_v12  ;;  %879 = vmatpush.msrb.mxu3 %v3581_v29 }
  0x7c   :  { %820 = vmatpush.msrb.mxu0 %v2568_v13  ;;  %840 = vmatpush.msrb.mxu1 %v2570_v14 }
  0x7d   :  { %860 = vmatpush.msrb.mxu2 %v2575_v15  ;;  %880 = vmatpush.msrb.mxu3 %v3582_v16 }
  0x7e   :  { %821 = vmatpush.msrb.mxu0 %v2586_v42  ;;  %841 = vmatpush.msrb.mxu1 %v2588_v55 }
  0x7f   :  { %861 = vmatpush.msrb.mxu2 %v2594_v4  ;;  %881 = vmatpush.msrb.mxu3 %v2596_v11 }
  0x8b   :  { %v115_v17 = vpop.f32.mrf.mxu0  ;;  %v156_v18 = vpop.f32.mrf.mxu1 }
  0x8c   :  { %v116_v4 = vadd.f32 %v115_v17, %v65_v20  ;;  %v157_v29 = vadd.f32 %v156_v18, %v66_v21 }
  0x92   :  { %v2749_v22 = vpop.f32.mrf.mxu2  ;;  %v2751_v23 = vpop.f32.mrf.mxu3 }
  0x93   :  { %v118_v24 = vpop.f32.mrf.mxu0  ;;  %v159_v25 = vpop.f32.mrf.mxu1 }
  0x94   :  { %v2753_v26 = vadd.f32 %v118_v24, %v65_v20  ;;  %v2755_v27 = vadd.f32 %v159_v25, %v66_v21 }
  0x9a   :  { %v200_v31 = vpop.f32.mrf.mxu2  ;;  %v241_v32 = vpop.f32.mrf.mxu3 }
  0x9b   :  { %v2760_v33 = vadd.f32 %v200_v31, %v2757_v28  ;;  %v2762_v34 = vadd.f32 %v241_v32, %v68_v30  ;;  %v121_v35 = vpop.f32.mrf.mxu0  ;;  %v162_v36 = vpop.f32.mrf.mxu1 }
  0x9c   :  { %v2764_v37 = vadd.f32 %v121_v35, %v65_v20  ;;  %v2766_v38 = vadd.f32 %v162_v36, %v66_v21 }
  0xa2   :  { %v203_v39 = vpop.f32.mrf.mxu2  ;;  %v244_v40 = vpop.f32.mrf.mxu3 }
  0xa3   :  { %v2769_v41 = vadd.f32 %v203_v39, %v2757_v28  ;;  %v2771_v43 = vadd.f32 %v244_v40, %v68_v30  ;;  %v124_v44 = vpop.f32.mrf.mxu0  ;;  %v165_v45 = vpop.f32.mrf.mxu1 }
  0xa4   :  { %v2773_v46 = vadd.f32 %v124_v44, %v65_v20  ;;  %v2775_v47 = vadd.f32 %v165_v45, %v66_v21  ;;  %v239_v44 = vadd.f32 %v2751_v23, %v68_v30 }
  0xa6   :  { %3583 = vst [vmem:[#allocation8_spill] sm:$0xff] %v2773_v46  ;;  %v3011_v46 = vld [vmem:[#allocation5 + $0x30] sm:$0xff] }
  0xa7   :  { %3584 = vst [vmem:[#allocation9_spill] sm:$0xff] %v2775_v47  ;;  %v3007_v47 = vld [vmem:[#allocation5 + $0x28] sm:$0xff] }
  0xaa   :  { %v206_v48 = vpop.f32.mrf.mxu2  ;;  %v247_v49 = vpop.f32.mrf.mxu3 }
  0xab   :  { %v2778_v50 = vadd.f32 %v206_v48, %v2757_v28  ;;  %v2780_v51 = vadd.f32 %v247_v49, %v68_v30  ;;  %v127_v52 = vpop.f32.mrf.mxu0  ;;  %v168_v53 = vpop.f32.mrf.mxu1 }
  0xac   :  { %v2782_v54 = vadd.f32 %v127_v52, %v65_v20  ;;  %v2784_v56 = vadd.f32 %v168_v53, %v66_v21 }
  0xad   :  { %3585 = vst [vmem:[#allocation10_spill] sm:$0xff] %v2778_v50 }
  0xae   :  { %3586 = vst [vmem:[#allocation11_spill] sm:$0xff] %v2780_v51  ;;  %v3005_v51 = vld [vmem:[#allocation5 + $0x20] sm:$0xff] }
  0xaf   :  { %3587 = vst [vmem:[#allocation12_spill] sm:$0xff] %v2782_v54  ;;  %v2998_v54 = vld [vmem:[#allocation5 + $0x50] sm:$0xff] }
  0xb0   :  { %3588 = vst [vmem:[#allocation13_spill] sm:$0xff] %v2784_v56  ;;  %v2996_v56 = vld [vmem:[#allocation5 + $0x48] sm:$0xff] }
  0xb1   :  { %3622 = vst [vmem:[#allocation47_spill] sm:$0xff] %v2996_v56 }
  0xb2   :  { %v209_v57 = vpop.f32.mrf.mxu2  ;;  %v250_v58 = vpop.f32.mrf.mxu3 }
  0xb3   :  { %v2787_v59 = vadd.f32 %v209_v57, %v2757_v28  ;;  %v2789_v60 = vadd.f32 %v250_v58, %v68_v30  ;;  %v130_v61 = vpop.f32.mrf.mxu0  ;;  %v171_v62 = vpop.f32.mrf.mxu1  ;;  %v198_v57 = vadd.f32 %v2749_v22, %v2757_v28 }
  0xb4   :  { %v2791_v63 = vadd.f32 %v130_v61, %v65_v20  ;;  %v2793_v0 = vadd.f32 %v171_v62, %v66_v21 }
  0xb5   :  { %3589 = vst [vmem:[#allocation14_spill] sm:$0xff] %v2787_v59  ;;  %v2990_v59 = vld [vmem:[#allocation5 + $0x78] sm:$0xff] }
  0xb6   :  { %3590 = vst [vmem:[#allocation15_spill] sm:$0xff] %v2789_v60 }
  0xb7   :  { %3591 = vst [vmem:[#allocation16_spill] sm:$0xff] %v2791_v63  ;;  %v2988_v63 = vld [vmem:[#allocation5 + $0x70] sm:$0xff] }
  0xb8   :  { %3592 = vst [vmem:[#allocation17_spill] sm:$0xff] %v2793_v0  ;;  %v2984_v0 = vld [vmem:[#allocation5 + $0x68] sm:$0xff] }
  0xb9   :  { %3618 = vst [vmem:[#allocation43_spill] sm:$0xff] %v2984_v0 }
  0xba   :  { %v212_v1 = vpop.f32.mrf.mxu2  ;;  %v253_v2 = vpop.f32.mrf.mxu3  ;;  %3619 = vst [vmem:[#allocation44_spill] sm:$0xff] %v2988_v63 }
  0xbb   :  { %v2796_v3 = vadd.f32 %v212_v1, %v2757_v28  ;;  %v2798_v5 = vadd.f32 %v253_v2, %v68_v30  ;;  %v133_v6 = vpop.f32.mrf.mxu0  ;;  %v174_v7 = vpop.f32.mrf.mxu1  ;;  %3620 = vst [vmem:[#allocation45_spill] sm:$0xff] %v2990_v59 }
  0xbc   :  { %v2800_v8 = vadd.f32 %v133_v6, %v65_v20  ;;  %v2802_v9 = vadd.f32 %v174_v7, %v66_v21 }
  0xbd   :  { %3593 = vst [vmem:[#allocation18_spill] sm:$0xff] %v2796_v3 }
  0xbe   :  { %3594 = vst [vmem:[#allocation19_spill] sm:$0xff] %v2798_v5  ;;  %v2976_v5 = vld [vmem:[#allocation5 + $0x90] sm:$0xff] }
  0xbf   :  { %3595 = vst [vmem:[#allocation20_spill] sm:$0xff] %v2800_v8  ;;  %v2964_v8 = vld [vmem:[#allocation5 + $0xb0] sm:$0xff] }
  0xc0   :  { %3596 = vst [vmem:[#allocation21_spill] sm:$0xff] %v2802_v9  ;;  %v2962_v9 = vld [vmem:[#allocation5 + $0xa8] sm:$0xff] }
  0xc2   :  { %v215_v10 = vpop.f32.mrf.mxu2  ;;  %v256_v11 = vpop.f32.mrf.mxu3 }
  0xc3   :  { %v2805_v12 = vadd.f32 %v215_v10, %v2757_v28  ;;  %v2807_v13 = vadd.f32 %v256_v11, %v68_v30  ;;  %v136_v14 = vpop.f32.mrf.mxu0  ;;  %v177_v15 = vpop.f32.mrf.mxu1 }
  0xc4   :  { %v2809_v42 = vadd.f32 %v136_v14, %v65_v20  ;;  %v2811_v55 = vadd.f32 %v177_v15, %v66_v21 }
  0xc5   :  { %3597 = vst [vmem:[#allocation22_spill] sm:$0xff] %v2805_v12  ;;  %v2956_v12 = vld [vmem:[#allocation5 + $0xd8] sm:$0xff] }
  0xc6   :  { %3598 = vst [vmem:[#allocation23_spill] sm:$0xff] %v2807_v13  ;;  %v2960_v13 = vld [vmem:[#allocation5 + $0xa0] sm:$0xff] }
  0xc7   :  { %3599 = vst [vmem:[#allocation24_spill] sm:$0xff] %v2809_v42 }
  0xc8   :  { %3600 = vst [vmem:[#allocation25_spill] sm:$0xff] %v2811_v55 }
  0xca   :  { %v218_v16 = vpop.f32.mrf.mxu2  ;;  %v259_v19 = vpop.f32.mrf.mxu3 }
  0xcb   :  { %v2814_v24 = vadd.f32 %v218_v16, %v2757_v28  ;;  %v2816_v25 = vadd.f32 %v259_v19, %v68_v30  ;;  %v384_v31 = vpop.f32.mrf.mxu0  ;;  %v404_v32 = vpop.f32.mrf.mxu1 }
  0xcc   :  { %v447_v35 = vadd.f32 %v384_v31, %v116_v4  ;;  %v448_v36 = vadd.f32 %v404_v32, %v157_v29 }
  0xcd   :  { %3601 = vst [vmem:[#allocation26_spill] sm:$0xff] %v2814_v24  ;;  %v2948_v24 = vld [vmem:[#allocation5 + $0xc8] sm:$0xff] }
  0xce   :  { %3602 = vst [vmem:[#allocation27_spill] sm:$0xff] %v2816_v25  ;;  %v2101_v39 = vmul.f32 -1.442695, %v447_v35  ;;  %v2102_v40 = vmul.f32 -1.442695, %v448_v36  ;;  %v2950_v25 = vld [vmem:[#allocation5 + $0xd0] sm:$0xff] }
  0xd0   :  { %2136 = vpow2.f32 %v2101_v39 }
  0xd1   :  { %2138 = vpow2.f32 %v2102_v40 }
  0xd2   :  { %v444_v45 = vpop.f32.mrf.mxu3  ;;  %v424_v52 = vpop.f32.mrf.mxu2 }
  0xd3   :  { %v450_v17 = vadd.f32 %v444_v45, %v239_v44  ;;  %v449_v62 = vadd.f32 %v424_v52, %v198_v57 }
  0xd5   :  { %v2103_v18 = vmul.f32 -1.442695, %v450_v17 }
  0xd6   :  { %v2137_v20 = vpop.eup %2136 }
  0xd7   :  { %v2139_v21 = vpop.eup %2138  ;;  %v454_v48 = vadd.f32 1.0, %v2137_v20  ;;  %2140 = vpow2.f32 %v2103_v18 }
  0xd8   :  { %v473_v49 = vadd.f32 1.0, %v2139_v21 }
  0xd9   :  { %2142 = vrcp.f32 %v454_v48  ;;  %v466_v7 = vand.u32 2147483648, %v454_v48  ;;  %v464_v14 = vand.u32 2147483647, %v454_v48  ;;  %vm460_vm3 = vweird.f32 %v454_v48 }
  0xda   :  { %2144 = vrcp.f32 %v473_v49  ;;  %v485_v10 = vand.u32 2147483648, %v473_v49  ;;  %v483_v4 = vand.u32 2147483647, %v473_v49  ;;  %vm479_vm4 = vweird.f32 %v473_v49 }
  0xdb   :  { %v467_v28 = vor.u32 1.1754944e-38, %v466_v7  ;;  %vm465_vm6 = vcmp.eq.f32.partialorder %v464_v14, 8.507059e+37 }
  0xdc   :  { %v486_v31 = vor.u32 1.1754944e-38, %v485_v10  ;;  %vm484_vm8 = vcmp.eq.f32.partialorder %v483_v4, 8.507059e+37 }
  0xdd   :  { %v2141_v53 = vpop.eup %2140 }
  0xde   :  { %v493_v58 = vadd.f32 1.0, %v2141_v53 }
  0xdf   :  { %v2143_v61 = vpop.eup %2142 }
  0xe0   :  { %v2145_v23 = vpop.eup %2144  ;;  %v456_v30 = vmul.f32 %v2143_v61, %v454_v48  ;;  %2146 = vrcp.f32 %v493_v58  ;;  %vm461_vm1 = vweird.f32 %v2143_v61  ;;  %v505_v48 = vand.u32 2147483648, %v493_v58 }
  0xe1   :  { %v475_v1 = vmul.f32 %v2145_v23, %v473_v49  ;;  %2148 = vtanh.f32 %v449_v62  ;;  %vm480_vm2 = vweird.f32 %v2145_v23  ;;  %vm462_vm5 = vmor %vm460_vm3, %vm461_vm1  ;;  %vm499_vm10 = vweird.f32 %v493_v58 }
  0xe2   :  { %v457_v2 = vsub.f32 1.0, %v456_v30  ;;  %vm481_vm7 = vmor %vm479_vm4, %vm480_vm2  ;;  %v503_v49 = vand.u32 2147483647, %v493_v58  ;;  %v506_v53 = vor.u32 1.1754944e-38, %v505_v48 }
  0xe3   :  { %v476_v6 = vsub.f32 1.0, %v475_v1 }
  0xe4   :  { %v458_v11 = vmul.f32 %v2143_v61, %v457_v2  ;;  %vm504_vm12 = vcmp.eq.f32.partialorder %v503_v49, 8.507059e+37 }
  0xe5   :  { %v477_v15 = vmul.f32 %v2145_v23, %v476_v6 }
  0xe6   :  { %v2147_v29 = vpop.eup %2146  ;;  %v459_v22 = vadd.f32 %v2143_v61, %v458_v11 }
  0xe7   :  { %v478_v16 = vadd.f32 %v2145_v23, %v477_v15  ;;  %v495_v19 = vmul.f32 %v2147_v29, %v493_v58  ;;  %v2149_v35 = vpop.eup %2148  ;;  %vm500_vm9 = vweird.f32 %v2147_v29 }
  0xe8   :  { %v463_v32 = vsel %vm462_vm5, %v2143_v61, %v459_v22  ;;  %vm501_vm11 = vmor %vm499_vm10, %vm500_vm9 }
  0xe9   :  { %v468_v36 = vsel %vm465_vm6, %v467_v28, %v463_v32  ;;  %v482_v39 = vsel %vm481_vm7, %v2145_v23, %v478_v16  ;;  %v496_v40 = vsub.f32 1.0, %v495_v19 }
  0xea   :  { %v487_v44 = vsel %vm484_vm8, %v486_v31, %v482_v39  ;;  %v510_v45 = vmul.f32 %v2149_v35, %v468_v36 }
  0xeb   :  { %v509_v17 = vmul.f32 0.0, %v487_v44  ;;  %v497_v18 = vmul.f32 %v2147_v29, %v496_v40 }
  0xed   :  { %v2821_v20 = vadd.f32 %v510_v45, %v509_v17  ;;  %v498_v21 = vadd.f32 %v2147_v29, %v497_v18 }
  0xef   :  { %2150 = vtanh.f32 %v2821_v20  ;;  %v502_v52 = vsel %vm501_vm11, %v2147_v29, %v498_v21 }
  0xf0   :  { %v507_v61 = vsel %vm504_vm12, %v506_v53, %v502_v52 }
  0xf5   :  { %v2151_v57 = vpop.eup %2150 }
  0xf6   :  { %v513_v62 = vmul.f32 %v2151_v57, %v507_v61 }
  0xf8   :  { %514 = vst [vmem:[%s3541_s4] sm:$0xff] %v513_v62  ;;  %602 = vmatmul.f32.vlgmr.msra.gmra.mxu0 %v513_v62  ;;  %622 = vmatmul.f32.vlgmr.msra.gmra.mxu1 %v513_v62 }
  0xf9   :  { %642 = vmatmul.f32.vlgmr.msra.gmra.mxu2 %v513_v62  ;;  %662 = vmatmul.f32.vlgmr.msra.gmra.mxu3 %v513_v62 }
 0x175   :  { %v603_v23 = vpop.f32.mrf.mxu0  ;;  %v623_v30 = vpop.f32.mrf.mxu1 }
 0x176   :  { %v666_v1 = vadd.f32 %v603_v23, %v2753_v26  ;;  %v667_v58 = vadd.f32 %v623_v30, %v2755_v27 }
 0x178   :  { %v2104_v2 = vmul.f32 -1.442695, %v666_v1  ;;  %v2105_v6 = vmul.f32 -1.442695, %v667_v58 }
 0x17a   :  { %2152 = vpow2.f32 %v2104_v2 }
 0x17b   :  { %2154 = vpow2.f32 %v2105_v6 }
 0x17c   :  { %v663_v7 = vpop.f32.mrf.mxu3  ;;  %v643_v22 = vpop.f32.mrf.mxu2 }
 0x17d   :  { %v669_v10 = vadd.f32 %v663_v7, %v2762_v34  ;;  %v668_v27 = vadd.f32 %v643_v22, %v2760_v33 }
 0x17f   :  { %v2106_v11 = vmul.f32 -1.442695, %v669_v10 }
 0x180   :  { %v2153_v14 = vpop.eup %2152 }
 0x181   :  { %v2155_v15 = vpop.eup %2154  ;;  %v673_v4 = vadd.f32 1.0, %v2153_v14  ;;  %2156 = vpow2.f32 %v2106_v11 }
 0x182   :  { %v692_v29 = vadd.f32 1.0, %v2155_v15 }
 0x183   :  { %2158 = vrcp.f32 %v673_v4  ;;  %v685_v36 = vand.u32 2147483648, %v673_v4  ;;  %v683_v44 = vand.u32 2147483647, %v673_v4  ;;  %vm679_vm15 = vweird.f32 %v673_v4 }
 0x184   :  { %2160 = vrcp.f32 %v692_v29  ;;  %v704_v39 = vand.u32 2147483648, %v692_v29  ;;  %v702_v17 = vand.u32 2147483647, %v692_v29  ;;  %vm698_vm0 = vweird.f32 %v692_v29 }
 0x185   :  { %v686_v33 = vor.u32 1.1754944e-38, %v685_v36  ;;  %vm684_vm3 = vcmp.eq.f32.partialorder %v683_v44, 8.507059e+37  ;;  %v2866_v36 = vld [vmem:[#allocation5 + $0x1b0] sm:$0xff]  ;;  %v2876_v44 = vld [vmem:[#allocation5 + $0x188] sm:$0xff] }
 0x186   :  { %v705_v52 = vor.u32 1.1754944e-38, %v704_v39  ;;  %vm703_vm4 = vcmp.eq.f32.partialorder %v702_v17, 8.507059e+37  ;;  %v2870_v39 = vld [vmem:[#allocation5 + $0x1b8] sm:$0xff]  ;;  %3609 = vst [vmem:[#allocation34_spill] sm:$0xff] %v2876_v44 }
 0x187   :  { %v2157_v28 = vpop.eup %2156  ;;  %3607 = vst [vmem:[#allocation32_spill] sm:$0xff] %v2870_v39  ;;  %v2882_v17 = vld [vmem:[#allocation5 + $0x198] sm:$0xff] }
 0x188   :  { %v712_v26 = vadd.f32 1.0, %v2157_v28  ;;  %v2840_v28 = vld [vmem:[#allocation5 + $0x1e8] sm:$0xff] }
 0x189   :  { %v2159_v16 = vpop.eup %2158  ;;  %3603 = vst [vmem:[#allocation28_spill] sm:$0xff] %v2840_v28  ;;  %1046 = vmatpush.msra.mxu1 %v2840_v28 }
 0x18a   :  { %v2161_v19 = vpop.eup %2160  ;;  %v675_v31 = vmul.f32 %v2159_v16, %v673_v4  ;;  %2162 = vrcp.f32 %v712_v26  ;;  %vm680_vm13 = vweird.f32 %v2159_v16  ;;  %v724_v10 = vand.u32 2147483648, %v712_v26 }
 0x18b   :  { %v694_v32 = vmul.f32 %v2161_v19, %v692_v29  ;;  %2164 = vtanh.f32 %v668_v27  ;;  %vm699_vm14 = vweird.f32 %v2161_v19  ;;  %vm681_vm1 = vmor %vm679_vm15, %vm680_vm13  ;;  %vm718_vm6 = vweird.f32 %v712_v26  ;;  %v2850_v27 = vld [vmem:[#allocation5 + $0x1c0] sm:$0xff] }
 0x18c   :  { %v676_v35 = vsub.f32 1.0, %v675_v31  ;;  %vm700_vm2 = vmor %vm698_vm0, %vm699_vm14  ;;  %v722_v11 = vand.u32 2147483647, %v712_v26  ;;  %v725_v15 = vor.u32 1.1754944e-38, %v724_v10  ;;  %3605 = vst [vmem:[#allocation30_spill] sm:$0xff] %v2850_v27  ;;  %v2854_v31 = vld [vmem:[#allocation5 + $0x1d0] sm:$0xff] }
 0x18d   :  { %v695_v34 = vsub.f32 1.0, %v694_v32  ;;  %v2858_v32 = vld [vmem:[#allocation5 + $0x1d8] sm:$0xff]  ;;  %v2934_v10 = vld [vmem:[#allocation5 + $0xe0] sm:$0xff] }
 0x18e   :  { %v677_v40 = vmul.f32 %v2159_v16, %v676_v35  ;;  %vm723_vm8 = vcmp.eq.f32.partialorder %v722_v11, 8.507059e+37  ;;  %v2862_v35 = vld [vmem:[#allocation5 + $0x1a0] sm:$0xff]  ;;  %v2936_v11 = vld [vmem:[#allocation5 + $0xe8] sm:$0xff] }
 0x18f   :  { %v696_v45 = vmul.f32 %v2161_v19, %v695_v34  ;;  %v2864_v34 = vld [vmem:[#allocation5 + $0x1a8] sm:$0xff] }
 0x190   :  { %v2163_v18 = vpop.eup %2162  ;;  %v678_v21 = vadd.f32 %v2159_v16, %v677_v40  ;;  %v2874_v40 = vld [vmem:[#allocation5 + $0x180] sm:$0xff] }
 0x191   :  { %v697_v48 = vadd.f32 %v2161_v19, %v696_v45  ;;  %v714_v49 = vmul.f32 %v2163_v18, %v712_v26  ;;  %v2165_v57 = vpop.eup %2164  ;;  %vm719_vm5 = vweird.f32 %v2163_v18  ;;  %v2842_v26 = vld [vmem:[#allocation5 + $0x1f0] sm:$0xff]  ;;  %3608 = vst [vmem:[#allocation33_spill] sm:$0xff] %v2874_v40 }
 0x192   :  { %v682_v53 = vsel %vm681_vm1, %v2159_v16, %v678_v21  ;;  %vm720_vm7 = vmor %vm718_vm6, %vm719_vm5  ;;  %3604 = vst [vmem:[#allocation29_spill] sm:$0xff] %v2842_v26  ;;  %v2846_v16 = vld [vmem:[#allocation5 + $0x1f8] sm:$0xff]  ;;  %1066 = vmatpush.msra.mxu2 %v2842_v26  ;;  %v2878_v45 = vld [vmem:[#allocation5 + $0x190] sm:$0xff] }
 0x193   :  { %v687_v61 = vsel %vm684_vm3, %v686_v33, %v682_v53  ;;  %v701_v62 = vsel %vm700_vm2, %v2161_v19, %v697_v48  ;;  %v715_v23 = vsub.f32 1.0, %v714_v49  ;;  %1086 = vmatpush.msra.mxu3 %v2846_v16  ;;  %v2852_v19 = vld [vmem:[#allocation5 + $0x1c8] sm:$0xff]  ;;  %3610 = vst [vmem:[#allocation35_spill] sm:$0xff] %v2878_v45  ;;  %v2890_v33 = vld [vmem:[#allocation5 + $0x170] sm:$0xff]  ;;  %v2894_v48 = vld [vmem:[#allocation5 + $0x178] sm:$0xff] }
 0x194   :  { %v706_v30 = vsel %vm703_vm4, %v705_v52, %v701_v62  ;;  %v729_v1 = vmul.f32 %v2165_v57, %v687_v61  ;;  %3606 = vst [vmem:[#allocation31_spill] sm:$0xff] %v2852_v19  ;;  %1047 = vmatpush.msra.mxu1 %v2852_v19  ;;  %1067 = vmatpush.msra.mxu2 %v2854_v31  ;;  %v2888_v21 = vld [vmem:[#allocation5 + $0x168] sm:$0xff]  ;;  %v2898_v49 = vld [vmem:[#allocation5 + $0x140] sm:$0xff]  ;;  %v2902_v53 = vld [vmem:[#allocation5 + $0x150] sm:$0xff] }
 0x195   :  { %v728_v58 = vmul.f32 %v706_v30, %v2821_v20  ;;  %v716_v2 = vmul.f32 %v2163_v18, %v715_v23  ;;  %v2838_v20 = vld [vmem:[#allocation5 + $0x1e0] sm:$0xff]  ;;  %1087 = vmatpush.msra.mxu3 %v2858_v32  ;;  %3611 = vst [vmem:[#allocation36_spill] sm:$0xff] %v2894_v48  ;;  %v2900_v52 = vld [vmem:[#allocation5 + $0x148] sm:$0xff]  ;;  %v2906_v57 = vld [vmem:[#allocation5 + $0x158] sm:$0xff] }
 0x196   :  { %1026 = vmatpush.msra.mxu0 %v2838_v20  ;;  %1048 = vmatpush.msra.mxu1 %v2864_v34  ;;  %3612 = vst [vmem:[#allocation37_spill] sm:$0xff] %v2902_v53  ;;  %v2910_v61 = vld [vmem:[#allocation5 + $0x120] sm:$0xff]  ;;  %v2912_v62 = vld [vmem:[#allocation5 + $0x128] sm:$0xff]  ;;  %v2914_v23 = vld [vmem:[#allocation5 + $0x130] sm:$0xff] }
 0x197   :  { %v2832_v6 = vadd.f32 %v729_v1, %v728_v58  ;;  %v717_v7 = vadd.f32 %v2163_v18, %v716_v2  ;;  %1068 = vmatpush.msra.mxu2 %v2866_v36  ;;  %1088 = vmatpush.msra.mxu3 %v2870_v39  ;;  %3613 = vst [vmem:[#allocation38_spill] sm:$0xff] %v2912_v62  ;;  %v2918_v30 = vld [vmem:[#allocation5 + $0x138] sm:$0xff]  ;;  %v2922_v1 = vld [vmem:[#allocation5 + $0x100] sm:$0xff]  ;;  %v2924_v58 = vld [vmem:[#allocation5 + $0x108] sm:$0xff] }
 0x198   :  { %1027 = vmatpush.msra.mxu0 %v2850_v27  ;;  %1049 = vmatpush.msra.mxu1 %v2876_v44  ;;  %3614 = vst [vmem:[#allocation39_spill] sm:$0xff] %v2914_v23  ;;  %v2926_v2 = vld [vmem:[#allocation5 + $0x110] sm:$0xff] }
 0x199   :  { %2166 = vtanh.f32 %v2832_v6  ;;  %v721_v14 = vsel %vm720_vm7, %v2163_v18, %v717_v7  ;;  %1069 = vmatpush.msra.mxu2 %v2878_v45  ;;  %1089 = vmatpush.msra.mxu3 %v2882_v17  ;;  %v2886_v18 = vld [vmem:[#allocation5 + $0x160] sm:$0xff]  ;;  %3615 = vst [vmem:[#allocation40_spill] sm:$0xff] %v2918_v30  ;;  %v2930_v7 = vld [vmem:[#allocation5 + $0x118] sm:$0xff] }
 0x19a   :  { %v726_v29 = vsel %vm723_vm8, %v725_v15, %v721_v14  ;;  %1028 = vmatpush.msra.mxu0 %v2862_v35  ;;  %1050 = vmatpush.msra.mxu1 %v2888_v21  ;;  %v2938_v14 = vld [vmem:[#allocation5 + $0xf0] sm:$0xff]  ;;  %v2942_v15 = vld [vmem:[#allocation5 + $0xf8] sm:$0xff] }
 0x19b   :  { %1070 = vmatpush.msra.mxu2 %v2890_v33  ;;  %1090 = vmatpush.msra.mxu3 %v2894_v48 }
 0x19c   :  { %1029 = vmatpush.msra.mxu0 %v2874_v40  ;;  %1051 = vmatpush.msra.mxu1 %v2900_v52 }
 0x19d   :  { %1071 = vmatpush.msra.mxu2 %v2902_v53  ;;  %1091 = vmatpush.msra.mxu3 %v2906_v57 }
 0x19e   :  { %1030 = vmatpush.msra.mxu0 %v2886_v18  ;;  %1052 = vmatpush.msra.mxu1 %v2912_v62 }
 0x19f   :  { %v2167_v4 = vpop.eup %2166  ;;  %1072 = vmatpush.msra.mxu2 %v2914_v23  ;;  %1092 = vmatpush.msra.mxu3 %v2918_v30 }
 0x1a0   :  { %v732_v22 = vmul.f32 %v2167_v4, %v726_v29  ;;  %1031 = vmatpush.msra.mxu0 %v2898_v49  ;;  %1053 = vmatpush.msra.mxu1 %v2924_v58 }
 0x1a1   :  { %1073 = vmatpush.msra.mxu2 %v2926_v2  ;;  %1093 = vmatpush.msra.mxu3 %v2930_v7 }
 0x1a2   :  { %2107 = vst [vmem:[%s3541_s4 + $0x8] sm:$0xff] %v732_v22  ;;  %822 = vmatmul.f32.vlgmr.msrb.gmra.mxu0 %v732_v22  ;;  %842 = vmatmul.f32.vlgmr.msrb.gmra.mxu1 %v732_v22 }
 0x1a3   :  { %862 = vmatmul.f32.vlgmr.msrb.gmra.mxu2 %v732_v22  ;;  %882 = vmatmul.f32.vlgmr.msrb.gmra.mxu3 %v732_v22  ;;  %v2946_v22 = vld [vmem:[#allocation5 + $0xc0] sm:$0xff] }
 0x1a4   :  { %1032 = vmatpush.msra.mxu0 %v2910_v61  ;;  %1054 = vmatpush.msra.mxu1 %v2936_v11 }
 0x1a5   :  { %1074 = vmatpush.msra.mxu2 %v2938_v14  ;;  %1094 = vmatpush.msra.mxu3 %v2942_v15 }
 0x1a6   :  { %1033 = vmatpush.msra.mxu0 %v2922_v1  ;;  %1055 = vmatpush.msra.mxu1 %v2948_v24 }
 0x1a7   :  { %1075 = vmatpush.msra.mxu2 %v2950_v25  ;;  %1095 = vmatpush.msra.mxu3 %v2956_v12 }
 0x1a8   :  { %1034 = vmatpush.msra.mxu0 %v2934_v10  ;;  %1056 = vmatpush.msra.mxu1 %v2962_v9 }
 0x1a9   :  { %1076 = vmatpush.msra.mxu2 %v2964_v8 }
 0x1aa   :  { %1035 = vmatpush.msra.mxu0 %v2946_v22 }
 0x1ab   :  { %1077 = vmatpush.msra.mxu2 %v2976_v5 }
 0x1ac   :  { %1036 = vmatpush.msra.mxu0 %v2960_v13 }
 0x1ad   :  { %1078 = vmatpush.msra.mxu2 %v2988_v63 }
 0x1af   :  { %1079 = vmatpush.msra.mxu2 %v2998_v54 }
 0x1b1   :  { %1080 = vmatpush.msra.mxu2 %v3011_v46 }
 0x21f   :  { %v823_v4 = vpop.f32.mrf.mxu0  ;;  %v843_v29 = vpop.f32.mrf.mxu1 }
 0x220   :  { %v886_v55 = vadd.f32 %v823_v4, %v2764_v37  ;;  %v887_v42 = vadd.f32 %v843_v29, %v2766_v38  ;;  %v2968_v38 = vld [vmem:[#allocation5 + $0xb8] sm:$0xff]  ;;  %v2972_v4 = vld [vmem:[#allocation5 + $0x80] sm:$0xff]  ;;  %v2974_v29 = vld [vmem:[#allocation5 + $0x88] sm:$0xff] }
 0x221   :  { %1096 = vmatpush.msra.mxu3 %v2968_v38  ;;  %1037 = vmatpush.msra.mxu0 %v2972_v4 }
 0x222   :  { %v2108_v3 = vmul.f32 -1.442695, %v886_v55  ;;  %v2109_v37 = vmul.f32 -1.442695, %v887_v42  ;;  %1057 = vmatpush.msra.mxu1 %v2974_v29  ;;  %v2980_v42 = vld [vmem:[#allocation5 + $0x98] sm:$0xff]  ;;  %v2982_v55 = vld [vmem:[#allocation5 + $0x60] sm:$0xff] }
 0x223   :  { %3616 = vst [vmem:[#allocation41_spill] sm:$0xff] %v2980_v42  ;;  %1097 = vmatpush.msra.mxu3 %v2980_v42  ;;  %1038 = vmatpush.msra.mxu0 %v2982_v55 }
 0x224   :  { %2168 = vpow2.f32 %v2108_v3  ;;  %3617 = vst [vmem:[#allocation42_spill] sm:$0xff] %v2982_v55  ;;  %v2992_v3 = vld [vmem:[#allocation5 + $0x40] sm:$0xff]  ;;  %1058 = vmatpush.msra.mxu1 %v2984_v0  ;;  %v3013_v0 = vld [vmem:[#allocation5 + $0x38] sm:$0xff] }
 0x225   :  { %2170 = vpow2.f32 %v2109_v37  ;;  %3621 = vst [vmem:[#allocation46_spill] sm:$0xff] %v2992_v3  ;;  %v3000_v37 = vld [vmem:[#allocation5 + $0x58] sm:$0xff]  ;;  %1098 = vmatpush.msra.mxu3 %v2990_v59  ;;  %1039 = vmatpush.msra.mxu0 %v2992_v3  ;;  %v3023_v3 = vld [vmem:[#allocation5 + $0x10] sm:$0xff] }
 0x226   :  { %v883_v60 = vpop.f32.mrf.mxu3  ;;  %1059 = vmatpush.msra.mxu1 %v2996_v56  ;;  %v3025_v56 = vld [vmem:[#allocation5 + $0x18] sm:$0xff]  ;;  %1081 = vmatpush.msra.mxu2 %v3023_v3 }
 0x227   :  { %v889_v50 = vadd.f32 %v883_v60, %v2771_v43  ;;  %1099 = vmatpush.msra.mxu3 %v3000_v37  ;;  %v3017_v43 = vld [vmem:[#allocation5] sm:$0xff]  ;;  %v3019_v60 = vld [vmem:[#allocation5 + $0x8] sm:$0xff]  ;;  %1040 = vmatpush.msra.mxu0 %v3005_v51 }
 0x228   :  { %1060 = vmatpush.msra.mxu1 %v3007_v47  ;;  %1286 = vmatpush.msrb.mxu2 %v2842_v26 }
 0x229   :  { %v2110_v55 = vmul.f32 -1.442695, %v889_v50  ;;  %1100 = vmatpush.msra.mxu3 %v3013_v0  ;;  %1041 = vmatpush.msra.mxu0 %v3017_v43 }
 0x22a   :  { %v2169_v59 = vpop.eup %2168  ;;  %1061 = vmatpush.msra.mxu1 %v3019_v60  ;;  %1287 = vmatpush.msrb.mxu2 %v2854_v31 }
 0x22b   :  { %v2171_v63 = vpop.eup %2170  ;;  %v3027_v42 = vadd.f32 1.0, %v2169_v59  ;;  %2172 = vpow2.f32 %v2110_v55  ;;  %1101 = vmatpush.msra.mxu3 %v3025_v56  ;;  %1246 = vmatpush.msrb.mxu0 %v2838_v20  ;;  %v863_v59 = vpop.f32.mrf.mxu2 }
 0x22c   :  { %v3031_v50 = vadd.f32 1.0, %v2171_v63  ;;  %1266 = vmatpush.msrb.mxu1 %v2840_v28  ;;  %v888_v26 = vadd.f32 %v863_v59, %v2769_v41  ;;  %1288 = vmatpush.msrb.mxu2 %v2866_v36 }
 0x22d   :  { %2174 = vrcp.f32 %v3027_v42  ;;  %1306 = vmatpush.msrb.mxu3 %v2846_v16  ;;  %1247 = vmatpush.msrb.mxu0 %v2850_v27  ;;  %vm899_vm11 = vweird.f32 %v3027_v42 }
 0x22e   :  { %2176 = vrcp.f32 %v3031_v50  ;;  %1267 = vmatpush.msrb.mxu1 %v2852_v19  ;;  %1289 = vmatpush.msrb.mxu2 %v2878_v45  ;;  %v903_v45 = vand.u32 2147483647, %v3027_v42  ;;  %vm918_vm12 = vweird.f32 %v3031_v50 }
 0x22f   :  { %1307 = vmatpush.msrb.mxu3 %v2858_v32  ;;  %1248 = vmatpush.msrb.mxu0 %v2862_v35 }
 0x230   :  { %1268 = vmatpush.msrb.mxu1 %v2864_v34  ;;  %1290 = vmatpush.msrb.mxu2 %v2890_v33  ;;  %vm904_vm15 = vcmp.eq.f32.partialorder %v903_v45, 8.507059e+37 }
 0x231   :  { %v2173_v63 = vpop.eup %2172  ;;  %1308 = vmatpush.msrb.mxu3 %v2870_v39  ;;  %1249 = vmatpush.msrb.mxu0 %v2874_v40  ;;  %v905_v39 = vand.u32 2147483648, %v3027_v42 }
 0x232   :  { %v3047_v55 = vadd.f32 1.0, %v2173_v63  ;;  %1269 = vmatpush.msrb.mxu1 %v2876_v44  ;;  %v924_v44 = vand.u32 2147483648, %v3031_v50  ;;  %1291 = vmatpush.msrb.mxu2 %v2902_v53 }
 0x233   :  { %v2175_v28 = vpop.eup %2174  ;;  %1309 = vmatpush.msrb.mxu3 %v2882_v17  ;;  %1250 = vmatpush.msrb.mxu0 %v2886_v18 }
 0x234   :  { %v2177_v27 = vpop.eup %2176  ;;  %v895_v19 = vmul.f32 %v2175_v28, %v3027_v42  ;;  %2178 = vrcp.f32 %v3047_v55  ;;  %1270 = vmatpush.msrb.mxu1 %v2888_v21  ;;  %vm900_vm9 = vweird.f32 %v2175_v28  ;;  %1292 = vmatpush.msrb.mxu2 %v2914_v23  ;;  %v944_v45 = vand.u32 2147483648, %v3047_v55 }
 0x235   :  { %v914_v63 = vmul.f32 %v2177_v27, %v3031_v50  ;;  %2180 = vtanh.f32 %v888_v26  ;;  %1310 = vmatpush.msrb.mxu3 %v2894_v48  ;;  %1251 = vmatpush.msrb.mxu0 %v2898_v49  ;;  %vm919_vm10 = vweird.f32 %v2177_v27  ;;  %vm901_vm13 = vmor %vm899_vm11, %vm900_vm9  ;;  %vm938_vm2 = vweird.f32 %v3047_v55 }
 0x236   :  { %v896_v41 = vsub.f32 1.0, %v895_v19  ;;  %1271 = vmatpush.msrb.mxu1 %v2900_v52  ;;  %vm920_vm14 = vmor %vm918_vm12, %vm919_vm10  ;;  %1293 = vmatpush.msrb.mxu2 %v2926_v2 }
 0x237   :  { %v915_v59 = vsub.f32 1.0, %v914_v63  ;;  %v922_v63 = vand.u32 2147483647, %v3031_v50  ;;  %1311 = vmatpush.msrb.mxu3 %v2906_v57  ;;  %1252 = vmatpush.msrb.mxu0 %v2910_v61 }
 0x238   :  { %v897_v40 = vmul.f32 %v2175_v28, %v896_v41  ;;  %1272 = vmatpush.msrb.mxu1 %v2912_v62  ;;  %v906_v41 = vor.u32 1.1754944e-38, %v905_v39  ;;  %1294 = vmatpush.msrb.mxu2 %v2938_v14 }
 0x239   :  { %v916_v19 = vmul.f32 %v2177_v27, %v915_v59  ;;  %1312 = vmatpush.msrb.mxu3 %v2918_v30  ;;  %1253 = vmatpush.msrb.mxu0 %v2922_v1  ;;  %vm923_vm0 = vcmp.eq.f32.partialorder %v922_v63, 8.507059e+37  ;;  %v945_v63 = vor.u32 1.1754944e-38, %v944_v45  ;;  %v3636_v45 = vld [vmem:[#allocation34_spill] sm:$0xff] }
 0x23a   :  { %v3073_v26 = vpop.eup %2178  ;;  %v898_v48 = vadd.f32 %v2175_v28, %v897_v40  ;;  %v925_v40 = vor.u32 1.1754944e-38, %v924_v44  ;;  %1273 = vmatpush.msrb.mxu1 %v2924_v58  ;;  %1295 = vmatpush.msrb.mxu2 %v2950_v25 }
 0x23b   :  { %v917_v59 = vadd.f32 %v2177_v27, %v916_v19  ;;  %v934_v53 = vmul.f32 %v3073_v26, %v3047_v55  ;;  %v2181_v50 = vpop.eup %2180  ;;  %1313 = vmatpush.msrb.mxu3 %v2930_v7  ;;  %1254 = vmatpush.msrb.mxu0 %v2934_v10  ;;  %vm939_vm1 = vweird.f32 %v3073_v26 }
 0x23c   :  { %v902_v42 = vsel %vm901_vm13, %v2175_v28, %v898_v48  ;;  %1274 = vmatpush.msrb.mxu1 %v2936_v11  ;;  %1296 = vmatpush.msrb.mxu2 %v2964_v8  ;;  %v942_v48 = vand.u32 2147483647, %v3047_v55  ;;  %vm940_vm3 = vmor %vm938_vm2, %vm939_vm1  ;;  %v3628_v55 = vld [vmem:[#allocation46_spill] sm:$0xff] }
 0x23d   :  { %v907_v62 = vsel %vm904_vm15, %v906_v41, %v902_v42  ;;  %v921_v39 = vsel %vm920_vm14, %v2177_v27, %v917_v59  ;;  %v935_v19 = vsub.f32 1.0, %v934_v53  ;;  %1314 = vmatpush.msrb.mxu3 %v2942_v15  ;;  %1255 = vmatpush.msrb.mxu0 %v2946_v22  ;;  %v3623_v53 = vld [vmem:[#allocation41_spill] sm:$0xff]  ;;  %v3626_v41 = vld [vmem:[#allocation44_spill] sm:$0xff] }
 0x23e   :  { %v926_v23 = vsel %vm923_vm0, %v925_v40, %v921_v39  ;;  %v949_v30 = vmul.f32 %v2181_v50, %v907_v62  ;;  %1275 = vmatpush.msrb.mxu1 %v2948_v24  ;;  %1297 = vmatpush.msrb.mxu2 %v2976_v5  ;;  %v3627_v59 = vld [vmem:[#allocation45_spill] sm:$0xff]  ;;  %vm943_vm4 = vcmp.eq.f32.partialorder %v942_v48, 8.507059e+37  ;;  %v3629_v40 = vld [vmem:[#allocation47_spill] sm:$0xff]  ;;  %v3630_v39 = vld [vmem:[#allocation28_spill] sm:$0xff] }
 0x23f   :  { %v948_v28 = vmul.f32 %v926_v23, %v2832_v6  ;;  %v936_v44 = vmul.f32 %v3073_v26, %v935_v19  ;;  %1315 = vmatpush.msrb.mxu3 %v2956_v12  ;;  %1256 = vmatpush.msrb.mxu0 %v2960_v13  ;;  %v3624_v23 = vld [vmem:[#allocation42_spill] sm:$0xff]  ;;  %v3631_v19 = vld [vmem:[#allocation29_spill] sm:$0xff] }
 0x240   :  { %1276 = vmatpush.msrb.mxu1 %v2962_v9  ;;  %1298 = vmatpush.msrb.mxu2 %v3626_v41 }
 0x241   :  { %v3097_v27 = vadd.f32 %v949_v30, %v948_v28  ;;  %v937_v6 = vadd.f32 %v3073_v26, %v936_v44  ;;  %1316 = vmatpush.msrb.mxu3 %v2968_v38  ;;  %1257 = vmatpush.msrb.mxu0 %v2972_v4  ;;  %v3625_v30 = vld [vmem:[#allocation43_spill] sm:$0xff]  ;;  %v3632_v28 = vld [vmem:[#allocation30_spill] sm:$0xff] }
 0x242   :  { %1277 = vmatpush.msrb.mxu1 %v2974_v29  ;;  %1299 = vmatpush.msrb.mxu2 %v2998_v54  ;;  %v3633_v44 = vld [vmem:[#allocation31_spill] sm:$0xff] }
 0x243   :  { %2182 = vtanh.f32 %v3097_v27  ;;  %1317 = vmatpush.msrb.mxu3 %v3623_v53  ;;  %v941_v62 = vsel %vm940_vm3, %v3073_v26, %v937_v6  ;;  %1258 = vmatpush.msrb.mxu0 %v3624_v23  ;;  %v3635_v6 = vld [vmem:[#allocation33_spill] sm:$0xff] }
 0x244   :  { %1278 = vmatpush.msrb.mxu1 %v3625_v30  ;;  %v946_v50 = vsel %vm943_vm4, %v945_v63, %v941_v62  ;;  %1300 = vmatpush.msrb.mxu2 %v3011_v46 }
 0x245   :  { %1318 = vmatpush.msrb.mxu3 %v3627_v59  ;;  %1259 = vmatpush.msrb.mxu0 %v3628_v55 }
 0x246   :  { %1279 = vmatpush.msrb.mxu1 %v3629_v40  ;;  %1301 = vmatpush.msrb.mxu2 %v3023_v3 }
 0x247   :  { %1319 = vmatpush.msrb.mxu3 %v3000_v37  ;;  %1260 = vmatpush.msrb.mxu0 %v3005_v51 }
 0x248   :  { %1280 = vmatpush.msrb.mxu1 %v3007_v47 }
 0x249   :  { %v2183_v42 = vpop.eup %2182  ;;  %1320 = vmatpush.msrb.mxu3 %v3013_v0  ;;  %1261 = vmatpush.msrb.mxu0 %v3017_v43 }
 0x24a   :  { %v952_v26 = vmul.f32 %v2183_v42, %v946_v50  ;;  %1281 = vmatpush.msrb.mxu1 %v3019_v60 }
 0x24b   :  { %1321 = vmatpush.msrb.mxu3 %v3025_v56 }
 0x24c   :  { %2111 = vst [vmem:[%s3541_s4 + $0x10] sm:$0xff] %v952_v26  ;;  %1042 = vmatmul.f32.vlgmr.msra.gmra.mxu0 %v952_v26  ;;  %1062 = vmatmul.f32.vlgmr.msra.gmra.mxu1 %v952_v26 }
 0x24d   :  { %1082 = vmatmul.f32.vlgmr.msra.gmra.mxu2 %v952_v26  ;;  %1102 = vmatmul.f32.vlgmr.msra.gmra.mxu3 %v952_v26 }
 0x24e   :  { %1466 = vmatpush.msra.mxu0 %v2838_v20  ;;  %1486 = vmatpush.msra.mxu1 %v3630_v39  ;;  %v3634_v20 = vld [vmem:[#allocation32_spill] sm:$0xff] }
 0x24f   :  { %1506 = vmatpush.msra.mxu2 %v3631_v19  ;;  %1526 = vmatpush.msra.mxu3 %v2846_v16  ;;  %v3637_v16 = vld [vmem:[#allocation35_spill] sm:$0xff] }
 0x250   :  { %1467 = vmatpush.msra.mxu0 %v3632_v28  ;;  %1487 = vmatpush.msra.mxu1 %v3633_v44 }
 0x251   :  { %1507 = vmatpush.msra.mxu2 %v2854_v31  ;;  %1527 = vmatpush.msra.mxu3 %v2858_v32  ;;  %v3638_v31 = vld [vmem:[#allocation36_spill] sm:$0xff]  ;;  %v3639_v32 = vld [vmem:[#allocation37_spill] sm:$0xff] }
 0x252   :  { %1468 = vmatpush.msra.mxu0 %v2862_v35  ;;  %1488 = vmatpush.msra.mxu1 %v2864_v34  ;;  %v3640_v35 = vld [vmem:[#allocation38_spill] sm:$0xff]  ;;  %v3641_v34 = vld [vmem:[#allocation39_spill] sm:$0xff] }
 0x253   :  { %1508 = vmatpush.msra.mxu2 %v2866_v36  ;;  %1528 = vmatpush.msra.mxu3 %v3634_v20  ;;  %v3642_v36 = vld [vmem:[#allocation40_spill] sm:$0xff] }
 0x254   :  { %1469 = vmatpush.msra.mxu0 %v3635_v6  ;;  %1489 = vmatpush.msra.mxu1 %v3636_v45 }
 0x255   :  { %1509 = vmatpush.msra.mxu2 %v3637_v16  ;;  %1529 = vmatpush.msra.mxu3 %v2882_v17 }
 0x256   :  { %1470 = vmatpush.msra.mxu0 %v2886_v18  ;;  %1490 = vmatpush.msra.mxu1 %v2888_v21 }
 0x257   :  { %1510 = vmatpush.msra.mxu2 %v2890_v33  ;;  %1530 = vmatpush.msra.mxu3 %v3638_v31  ;;  %v3647_v31 = vld [vmem:[#allocation12_spill] sm:$0xff] }
 0x258   :  { %1471 = vmatpush.msra.mxu0 %v2898_v49  ;;  %1491 = vmatpush.msra.mxu1 %v2900_v52 }
 0x259   :  { %1511 = vmatpush.msra.mxu2 %v3639_v32  ;;  %1531 = vmatpush.msra.mxu3 %v2906_v57 }
 0x25a   :  { %1472 = vmatpush.msra.mxu0 %v2910_v61  ;;  %1492 = vmatpush.msra.mxu1 %v3640_v35  ;;  %v3646_v61 = vld [vmem:[#allocation10_spill] sm:$0xff]  ;;  %v3648_v35 = vld [vmem:[#allocation13_spill] sm:$0xff] }
 0x25b   :  { %1512 = vmatpush.msra.mxu2 %v3641_v34  ;;  %1532 = vmatpush.msra.mxu3 %v3642_v36 }
 0x25c   :  { %1473 = vmatpush.msra.mxu0 %v2922_v1  ;;  %1493 = vmatpush.msra.mxu1 %v2924_v58 }
 0x25d   :  { %1513 = vmatpush.msra.mxu2 %v2926_v2  ;;  %1533 = vmatpush.msra.mxu3 %v2930_v7 }
 0x25e   :  { %1474 = vmatpush.msra.mxu0 %v2934_v10  ;;  %1494 = vmatpush.msra.mxu1 %v2936_v11 }
 0x25f   :  { %1514 = vmatpush.msra.mxu2 %v2938_v14  ;;  %1534 = vmatpush.msra.mxu3 %v2942_v15 }
 0x260   :  { %1475 = vmatpush.msra.mxu0 %v2946_v22  ;;  %1495 = vmatpush.msra.mxu1 %v2948_v24 }
 0x261   :  { %1515 = vmatpush.msra.mxu2 %v2950_v25  ;;  %1535 = vmatpush.msra.mxu3 %v2956_v12  ;;  %v3644_v12 = vld [vmem:[#allocation9_spill] sm:$0xff] }
 0x262   :  { %1476 = vmatpush.msra.mxu0 %v2960_v13  ;;  %1496 = vmatpush.msra.mxu1 %v2962_v9 }
 0x263   :  { %1516 = vmatpush.msra.mxu2 %v2964_v8  ;;  %1536 = vmatpush.msra.mxu3 %v2968_v38  ;;  %v3643_v8 = vld [vmem:[#allocation8_spill] sm:$0xff] }
 0x264   :  { %1477 = vmatpush.msra.mxu0 %v2972_v4  ;;  %1497 = vmatpush.msra.mxu1 %v2974_v29 }
 0x265   :  { %1517 = vmatpush.msra.mxu2 %v2976_v5  ;;  %1537 = vmatpush.msra.mxu3 %v3623_v53 }
 0x266   :  { %1478 = vmatpush.msra.mxu0 %v3624_v23  ;;  %1498 = vmatpush.msra.mxu1 %v3625_v30 }
 0x267   :  { %1518 = vmatpush.msra.mxu2 %v3626_v41  ;;  %1538 = vmatpush.msra.mxu3 %v3627_v59 }
 0x268   :  { %1479 = vmatpush.msra.mxu0 %v3628_v55  ;;  %1499 = vmatpush.msra.mxu1 %v3629_v40 }
 0x269   :  { %1519 = vmatpush.msra.mxu2 %v2998_v54  ;;  %1539 = vmatpush.msra.mxu3 %v3000_v37 }
 0x26a   :  { %1480 = vmatpush.msra.mxu0 %v3005_v51  ;;  %1500 = vmatpush.msra.mxu1 %v3007_v47 }
 0x26b   :  { %1520 = vmatpush.msra.mxu2 %v3011_v46  ;;  %1540 = vmatpush.msra.mxu3 %v3013_v0  ;;  %v3645_v0 = vld [vmem:[#allocation11_spill] sm:$0xff] }
 0x26c   :  { %1481 = vmatpush.msra.mxu0 %v3017_v43  ;;  %1501 = vmatpush.msra.mxu1 %v3019_v60 }
 0x26d   :  { %1521 = vmatpush.msra.mxu2 %v3023_v3  ;;  %1541 = vmatpush.msra.mxu3 %v3025_v56 }
 0x2c9   :  { %v1043_v5 = vpop.f32.mrf.mxu0  ;;  %v1063_v54 = vpop.f32.mrf.mxu1 }
 0x2ca   :  { %v1106_v9 = vadd.f32 %v1043_v5, %v3643_v8  ;;  %v1107_v51 = vadd.f32 %v1063_v54, %v3644_v12  ;;  %v3649_v8 = vld [vmem:[#allocation15_spill] sm:$0xff] }
 0x2cc   :  { %v2112_v13 = vmul.f32 -1.442695, %v1106_v9  ;;  %v2113_v47 = vmul.f32 -1.442695, %v1107_v51 }
 0x2ce   :  { %2184 = vpow2.f32 %v2112_v13 }
 0x2cf   :  { %2186 = vpow2.f32 %v2113_v47 }
 0x2d0   :  { %v1103_v46 = vpop.f32.mrf.mxu3  ;;  %v1083_v56 = vpop.f32.mrf.mxu2 }
 0x2d1   :  { %v1109_v24 = vadd.f32 %v1103_v46, %v3645_v0  ;;  %v1108_v1 = vadd.f32 %v1083_v56, %v3646_v61 }
 0x2d3   :  { %v2114_v25 = vmul.f32 -1.442695, %v1109_v24 }
 0x2d4   :  { %v2185_v17 = vpop.eup %2184 }
 0x2d5   :  { %v2187_v18 = vpop.eup %2186  ;;  %v1113_v21 = vadd.f32 1.0, %v2185_v17  ;;  %2188 = vpow2.f32 %v2114_v25 }
 0x2d6   :  { %v1132_v33 = vadd.f32 1.0, %v2187_v18  ;;  %v3650_v18 = vld [vmem:[#allocation14_spill] sm:$0xff] }
 0x2d7   :  { %2190 = vrcp.f32 %v1113_v21  ;;  %v1125_v14 = vand.u32 2147483648, %v1113_v21  ;;  %v1123_v38 = vand.u32 2147483647, %v1113_v21  ;;  %vm1119_vm7 = vweird.f32 %v1113_v21 }
 0x2d8   :  { %2192 = vrcp.f32 %v1132_v33  ;;  %v1144_v15 = vand.u32 2147483648, %v1132_v33  ;;  %v1142_v29 = vand.u32 2147483647, %v1132_v33  ;;  %vm1138_vm8 = vweird.f32 %v1132_v33 }
 0x2d9   :  { %v1126_v43 = vor.u32 1.1754944e-38, %v1125_v14  ;;  %vm1124_vm11 = vcmp.eq.f32.partialorder %v1123_v38, 8.507059e+37 }
 0x2da   :  { %v1145_v53 = vor.u32 1.1754944e-38, %v1144_v15  ;;  %vm1143_vm12 = vcmp.eq.f32.partialorder %v1142_v29, 8.507059e+37 }
 0x2db   :  { %v2189_v49 = vpop.eup %2188 }
 0x2dc   :  { %v1152_v52 = vadd.f32 1.0, %v2189_v49 }
 0x2dd   :  { %v2191_v57 = vpop.eup %2190 }
 0x2de   :  { %v2193_v58 = vpop.eup %2192  ;;  %v1115_v2 = vmul.f32 %v2191_v57, %v1113_v21  ;;  %2194 = vrcp.f32 %v1152_v52  ;;  %vm1120_vm5 = vweird.f32 %v2191_v57  ;;  %v1164_v39 = vand.u32 2147483648, %v1152_v52 }
 0x2df   :  { %v1134_v7 = vmul.f32 %v2193_v58, %v1132_v33  ;;  %2196 = vtanh.f32 %v1108_v1  ;;  %vm1139_vm6 = vweird.f32 %v2193_v58  ;;  %vm1121_vm9 = vmor %vm1119_vm7, %vm1120_vm5  ;;  %vm1158_vm14 = vweird.f32 %v1152_v52 }
 0x2e0   :  { %v1116_v10 = vsub.f32 1.0, %v1115_v2  ;;  %vm1140_vm10 = vmor %vm1138_vm8, %vm1139_vm6  ;;  %v1162_v19 = vand.u32 2147483647, %v1152_v52  ;;  %v1165_v44 = vor.u32 1.1754944e-38, %v1164_v39 }
 0x2e1   :  { %v1135_v11 = vsub.f32 1.0, %v1134_v7 }
 0x2e2   :  { %v1117_v22 = vmul.f32 %v2191_v57, %v1116_v10  ;;  %vm1163_vm0 = vcmp.eq.f32.partialorder %v1162_v19, 8.507059e+37  ;;  %v3223_v19 = vld [vmem:[#allocation5 + $0x1e8] sm:$0xff] }
 0x2e3   :  { %v1136_v4 = vmul.f32 %v2193_v58, %v1135_v11 }
 0x2e4   :  { %v2195_v3 = vpop.eup %2194  ;;  %v1118_v37 = vadd.f32 %v2191_v57, %v1117_v22 }
 0x2e5   :  { %v1137_v60 = vadd.f32 %v2193_v58, %v1136_v4  ;;  %v1154_v48 = vmul.f32 %v2195_v3, %v1152_v52  ;;  %v2197_v23 = vpop.eup %2196  ;;  %vm1159_vm13 = vweird.f32 %v2195_v3 }
 0x2e6   :  { %v1122_v62 = vsel %vm1121_vm9, %v2191_v57, %v1118_v37  ;;  %vm1160_vm15 = vmor %vm1158_vm14, %vm1159_vm13 }
 0x2e7   :  { %v1127_v30 = vsel %vm1124_vm11, %v1126_v43, %v1122_v62  ;;  %v1141_v63 = vsel %vm1140_vm10, %v2193_v58, %v1137_v60  ;;  %v1155_v41 = vsub.f32 1.0, %v1154_v48 }
 0x2e8   :  { %v1146_v59 = vsel %vm1143_vm12, %v1145_v53, %v1141_v63  ;;  %v1169_v55 = vmul.f32 %v2197_v23, %v1127_v30 }
 0x2e9   :  { %v1168_v40 = vmul.f32 %v1146_v59, %v3097_v27  ;;  %v1156_v42 = vmul.f32 %v2195_v3, %v1155_v41 }
 0x2eb   :  { %v3204_v50 = vadd.f32 %v1169_v55, %v1168_v40  ;;  %v1157_v26 = vadd.f32 %v2195_v3, %v1156_v42 }
 0x2ed   :  { %2198 = vtanh.f32 %v3204_v50  ;;  %v1161_v28 = vsel %vm1160_vm15, %v2195_v3, %v1157_v26 }
 0x2ee   :  { %v1166_v6 = vsel %vm1163_vm0, %v1165_v44, %v1161_v28  ;;  %v3225_v28 = vld [vmem:[#allocation5 + $0x1f0] sm:$0xff]  ;;  %v3229_v44 = vld [vmem:[#allocation5 + $0x1f8] sm:$0xff] }
 0x2f3   :  { %v2199_v20 = vpop.eup %2198 }
 0x2f4   :  { %v1172_v45 = vmul.f32 %v2199_v20, %v1166_v6  ;;  %v3233_v20 = vld [vmem:[#allocation5 + $0x1c0] sm:$0xff]  ;;  %v3235_v6 = vld [vmem:[#allocation5 + $0x1c8] sm:$0xff] }
 0x2f6   :  { %2115 = vst [vmem:[%s3541_s4 + $0x18] sm:$0xff] %v1172_v45  ;;  %1262 = vmatmul.f32.vlgmr.msrb.gmra.mxu0 %v1172_v45  ;;  %1282 = vmatmul.f32.vlgmr.msrb.gmra.mxu1 %v1172_v45 }
 0x2f7   :  { %1302 = vmatmul.f32.vlgmr.msrb.gmra.mxu2 %v1172_v45  ;;  %1322 = vmatmul.f32.vlgmr.msrb.gmra.mxu3 %v1172_v45  ;;  %v3237_v45 = vld [vmem:[#allocation5 + $0x1d0] sm:$0xff] }
 0x2f8   :  { %1706 = vmatpush.msrb.mxu1 %v3223_v19  ;;  %1726 = vmatpush.msrb.mxu2 %v3225_v28 }
 0x2f9   :  { %1746 = vmatpush.msrb.mxu3 %v3229_v44 }
 0x2fa   :  { %1707 = vmatpush.msrb.mxu1 %v3235_v6  ;;  %1727 = vmatpush.msrb.mxu2 %v3237_v45 }
 0x373   :  { %v1263_v27 = vpop.f32.mrf.mxu0  ;;  %v1283_v16 = vpop.f32.mrf.mxu1 }
 0x374   :  { %v1326_v32 = vadd.f32 %v1263_v27, %v3647_v31  ;;  %v1327_v34 = vadd.f32 %v1283_v16, %v3648_v35  ;;  %v3241_v27 = vld [vmem:[#allocation5 + $0x1d8] sm:$0xff]  ;;  %v3245_v16 = vld [vmem:[#allocation5 + $0x1a0] sm:$0xff]  ;;  %v3247_v31 = vld [vmem:[#allocation5 + $0x1a8] sm:$0xff] }
 0x375   :  { %1747 = vmatpush.msrb.mxu3 %v3241_v27  ;;  %1708 = vmatpush.msrb.mxu1 %v3247_v31  ;;  %v3253_v35 = vld [vmem:[#allocation5 + $0x1b8] sm:$0xff] }
 0x376   :  { %v2116_v36 = vmul.f32 -1.442695, %v1326_v32  ;;  %v2117_v5 = vmul.f32 -1.442695, %v1327_v34  ;;  %v3249_v32 = vld [vmem:[#allocation5 + $0x1b0] sm:$0xff]  ;;  %v3257_v34 = vld [vmem:[#allocation5 + $0x180] sm:$0xff] }
 0x377   :  { %1728 = vmatpush.msrb.mxu2 %v3249_v32  ;;  %1748 = vmatpush.msrb.mxu3 %v3253_v35 }
 0x378   :  { %2200 = vpow2.f32 %v2116_v36  ;;  %v3259_v36 = vld [vmem:[#allocation5 + $0x188] sm:$0xff] }
 0x379   :  { %2202 = vpow2.f32 %v2117_v5  ;;  %v3261_v5 = vld [vmem:[#allocation5 + $0x190] sm:$0xff]  ;;  %1709 = vmatpush.msrb.mxu1 %v3259_v36 }
 0x37a   :  { %v1323_v54 = vpop.f32.mrf.mxu3  ;;  %v1303_v0 = vpop.f32.mrf.mxu2  ;;  %1729 = vmatpush.msrb.mxu2 %v3261_v5 }
 0x37b   :  { %v1329_v9 = vadd.f32 %v1323_v54, %v3649_v8  ;;  %v1328_v21 = vadd.f32 %v1303_v0, %v3650_v18  ;;  %v3265_v54 = vld [vmem:[#allocation5 + $0x198] sm:$0xff]  ;;  %v3269_v8 = vld [vmem:[#allocation5 + $0x160] sm:$0xff] }
 0x37c   :  { %1749 = vmatpush.msrb.mxu3 %v3265_v54  ;;  %v3289_v0 = vld [vmem:[#allocation5 + $0x158] sm:$0xff] }
 0x37d   :  { %v2118_v12 = vmul.f32 -1.442695, %v1329_v9  ;;  %v3271_v9 = vld [vmem:[#allocation5 + $0x168] sm:$0xff]  ;;  %v3301_v18 = vld [vmem:[#allocation5 + $0x138] sm:$0xff] }
 0x37e   :  { %v2201_v51 = vpop.eup %2200  ;;  %1710 = vmatpush.msrb.mxu1 %v3271_v9 }
 0x37f   :  { %v2203_v13 = vpop.eup %2202  ;;  %v1333_v47 = vadd.f32 1.0, %v2201_v51  ;;  %2204 = vpow2.f32 %v2118_v12  ;;  %v3273_v12 = vld [vmem:[#allocation5 + $0x170] sm:$0xff]  ;;  %v3277_v51 = vld [vmem:[#allocation5 + $0x178] sm:$0xff] }
 0x380   :  { %v1352_v46 = vadd.f32 1.0, %v2203_v13  ;;  %1730 = vmatpush.msrb.mxu2 %v3273_v12  ;;  %1750 = vmatpush.msrb.mxu3 %v3277_v51  ;;  %v3281_v13 = vld [vmem:[#allocation5 + $0x140] sm:$0xff] }
 0x381   :  { %2206 = vrcp.f32 %v1333_v47  ;;  %v1345_v61 = vand.u32 2147483648, %v1333_v47  ;;  %v1343_v2 = vand.u32 2147483647, %v1333_v47  ;;  %vm1339_vm3 = vweird.f32 %v1333_v47 }
 0x382   :  { %2208 = vrcp.f32 %v1352_v46  ;;  %v1364_v1 = vand.u32 2147483648, %v1352_v46  ;;  %v1362_v10 = vand.u32 2147483647, %v1352_v46  ;;  %vm1358_vm4 = vweird.f32 %v1352_v46  ;;  %1751 = vmatpush.msrb.mxu3 %v3289_v0 }
 0x383   :  { %v1346_v15 = vor.u32 1.1754944e-38, %v1345_v61  ;;  %vm1344_vm7 = vcmp.eq.f32.partialorder %v1343_v2, 8.507059e+37  ;;  %v3321_v61 = vld [vmem:[#allocation5 + $0xf0] sm:$0xff] }
 0x384   :  { %v1365_v4 = vor.u32 1.1754944e-38, %v1364_v1  ;;  %vm1363_vm8 = vcmp.eq.f32.partialorder %v1362_v10, 8.507059e+37  ;;  %1752 = vmatpush.msrb.mxu3 %v3301_v18  ;;  %v3325_v1 = vld [vmem:[#allocation5 + $0xf8] sm:$0xff]  ;;  %v3331_v10 = vld [vmem:[#allocation5 + $0xc8] sm:$0xff] }
 0x385   :  { %v2205_v24 = vpop.eup %2204 }
 0x386   :  { %v1372_v25 = vadd.f32 1.0, %v2205_v24  ;;  %v3293_v24 = vld [vmem:[#allocation5 + $0x120] sm:$0xff] }
 0x387   :  { %v2207_v17 = vpop.eup %2206 }
 0x388   :  { %v2209_v33 = vpop.eup %2208  ;;  %v1335_v56 = vmul.f32 %v2207_v17, %v1333_v47  ;;  %2210 = vrcp.f32 %v1372_v25  ;;  %vm1340_vm1 = vweird.f32 %v2207_v17  ;;  %v1384_v41 = vand.u32 2147483648, %v1372_v25  ;;  %v3283_v47 = vld [vmem:[#allocation5 + $0x148] sm:$0xff] }
 0x389   :  { %v1354_v49 = vmul.f32 %v2209_v33, %v1352_v46  ;;  %2212 = vtanh.f32 %v1328_v21  ;;  %vm1359_vm2 = vweird.f32 %v2209_v33  ;;  %vm1341_vm5 = vmor %vm1339_vm3, %vm1340_vm1  ;;  %vm1378_vm10 = vweird.f32 %v1372_v25  ;;  %v3285_v46 = vld [vmem:[#allocation5 + $0x150] sm:$0xff]  ;;  %1711 = vmatpush.msrb.mxu1 %v3283_v47  ;;  %v3305_v21 = vld [vmem:[#allocation5 + $0x100] sm:$0xff] }
 0x38a   :  { %v1336_v52 = vsub.f32 1.0, %v1335_v56  ;;  %vm1360_vm6 = vmor %vm1358_vm4, %vm1359_vm2  ;;  %v1382_v59 = vand.u32 2147483647, %v1372_v25  ;;  %v1385_v40 = vor.u32 1.1754944e-38, %v1384_v41  ;;  %1731 = vmatpush.msrb.mxu2 %v3285_v46  ;;  %v3309_v56 = vld [vmem:[#allocation5 + $0x110] sm:$0xff]  ;;  %v3365_v41 = vld [vmem:[#allocation5 + $0x60] sm:$0xff] }
 0x38b   :  { %v1355_v57 = vsub.f32 1.0, %v1354_v49  ;;  %v3313_v49 = vld [vmem:[#allocation5 + $0x118] sm:$0xff]  ;;  %3653 = vst [vmem:[#allocation41_spill] sm:$0xff] %v3365_v41 }
 0x38c   :  { %v1337_v58 = vmul.f32 %v2207_v17, %v1336_v52  ;;  %vm1383_vm12 = vcmp.eq.f32.partialorder %v1382_v59, 8.507059e+37  ;;  %1753 = vmatpush.msrb.mxu3 %v3313_v49  ;;  %v3317_v52 = vld [vmem:[#allocation5 + $0xe0] sm:$0xff]  ;;  %v3367_v59 = vld [vmem:[#allocation5 + $0x68] sm:$0xff] }
 0x38d   :  { %v1356_v7 = vmul.f32 %v2209_v33, %v1355_v57  ;;  %v3319_v57 = vld [vmem:[#allocation5 + $0xe8] sm:$0xff]  ;;  %3654 = vst [vmem:[#allocation42_spill] sm:$0xff] %v3367_v59 }
 0x38e   :  { %v2211_v11 = vpop.eup %2210  ;;  %v1338_v14 = vadd.f32 %v2207_v17, %v1337_v58  ;;  %1754 = vmatpush.msrb.mxu3 %v3325_v1 }
 0x38f   :  { %v1357_v22 = vadd.f32 %v2209_v33, %v1356_v7  ;;  %v1374_v38 = vmul.f32 %v2211_v11, %v1372_v25  ;;  %v2213_v3 = vpop.eup %2212  ;;  %vm1379_vm9 = vweird.f32 %v2211_v11  ;;  %v3295_v25 = vld [vmem:[#allocation5 + $0x128] sm:$0xff]  ;;  %v3329_v7 = vld [vmem:[#allocation5 + $0xc0] sm:$0xff] }
 0x390   :  { %v1342_v29 = vsel %vm1341_vm5, %v2207_v17, %v1338_v14  ;;  %vm1380_vm11 = vmor %vm1378_vm10, %vm1379_vm9  ;;  %v3297_v17 = vld [vmem:[#allocation5 + $0x130] sm:$0xff]  ;;  %1712 = vmatpush.msrb.mxu1 %v3295_v25  ;;  %v3651_v14 = vld [vmem:[#allocation16_spill] sm:$0xff] }
 0x391   :  { %v1347_v37 = vsel %vm1344_vm7, %v1346_v15, %v1342_v29  ;;  %v1361_v43 = vsel %vm1360_vm6, %v2209_v33, %v1357_v22  ;;  %v1375_v60 = vsub.f32 1.0, %v1374_v38  ;;  %1732 = vmatpush.msrb.mxu2 %v3297_v17  ;;  %v3307_v33 = vld [vmem:[#allocation5 + $0x108] sm:$0xff]  ;;  %v3343_v29 = vld [vmem:[#allocation5 + $0xa0] sm:$0xff] }
 0x392   :  { %v1366_v48 = vsel %vm1363_vm8, %v1365_v4, %v1361_v43  ;;  %v1389_v53 = vmul.f32 %v2213_v3, %v1347_v37  ;;  %1713 = vmatpush.msrb.mxu1 %v3307_v33  ;;  %v3652_v22 = vld [vmem:[#allocation17_spill] sm:$0xff]  ;;  %v3339_v4 = vld [vmem:[#allocation5 + $0xd8] sm:$0xff]  ;;  %v3347_v37 = vld [vmem:[#allocation5 + $0xb0] sm:$0xff] }
 0x393   :  { %v1388_v62 = vmul.f32 %v1366_v48, %v3204_v50  ;;  %v1376_v23 = vmul.f32 %v2211_v11, %v1375_v60  ;;  %v3221_v50 = vld [vmem:[#allocation5 + $0x1e0] sm:$0xff]  ;;  %1733 = vmatpush.msrb.mxu2 %v3309_v56  ;;  %1755 = vmatpush.msrb.mxu3 %v3339_v4  ;;  %v3345_v3 = vld [vmem:[#allocation5 + $0xa8] sm:$0xff]  ;;  %v3351_v48 = vld [vmem:[#allocation5 + $0xb8] sm:$0xff] }
 0x394   :  { %1686 = vmatpush.msrb.mxu0 %v3221_v50  ;;  %1714 = vmatpush.msrb.mxu1 %v3319_v57 }
 0x395   :  { %v3215_v30 = vadd.f32 %v1389_v53, %v1388_v62  ;;  %v1377_v63 = vadd.f32 %v2211_v11, %v1376_v23  ;;  %1734 = vmatpush.msrb.mxu2 %v3321_v61  ;;  %1756 = vmatpush.msrb.mxu3 %v3351_v48  ;;  %v3355_v53 = vld [vmem:[#allocation5 + $0x80] sm:$0xff]  ;;  %v3357_v62 = vld [vmem:[#allocation5 + $0x88] sm:$0xff]  ;;  %v3359_v23 = vld [vmem:[#allocation5 + $0x90] sm:$0xff] }
 0x396   :  { %1687 = vmatpush.msrb.mxu0 %v3233_v20  ;;  %1715 = vmatpush.msrb.mxu1 %v3331_v10 }
 0x397   :  { %2214 = vtanh.f32 %v3215_v30  ;;  %v1381_v55 = vsel %vm1380_vm11, %v2211_v11, %v1377_v63  ;;  %v3333_v11 = vld [vmem:[#allocation5 + $0xd0] sm:$0xff]  ;;  %v3363_v63 = vld [vmem:[#allocation5 + $0x98] sm:$0xff] }
 0x398   :  { %v1386_v26 = vsel %vm1383_vm12, %v1385_v40, %v1381_v55  ;;  %1688 = vmatpush.msrb.mxu0 %v3245_v16  ;;  %1735 = vmatpush.msrb.mxu2 %v3333_v11  ;;  %v3371_v55 = vld [vmem:[#allocation5 + $0x70] sm:$0xff]  ;;  %v3373_v40 = vld [vmem:[#allocation5 + $0x78] sm:$0xff] }
 0x399   :  { %1716 = vmatpush.msrb.mxu1 %v3345_v3  ;;  %1757 = vmatpush.msrb.mxu3 %v3363_v63  ;;  %3655 = vst [vmem:[#allocation43_spill] sm:$0xff] %v3371_v55 }
 0x39a   :  { %1689 = vmatpush.msrb.mxu0 %v3257_v34  ;;  %1736 = vmatpush.msrb.mxu2 %v3347_v37  ;;  %3656 = vst [vmem:[#allocation44_spill] sm:$0xff] %v3373_v40 }
 0x39b   :  { %1717 = vmatpush.msrb.mxu1 %v3357_v62  ;;  %1758 = vmatpush.msrb.mxu3 %v3373_v40 }
 0x39c   :  { %1690 = vmatpush.msrb.mxu0 %v3269_v8  ;;  %1737 = vmatpush.msrb.mxu2 %v3359_v23 }
 0x39d   :  { %v2215_v42 = vpop.eup %2214  ;;  %1718 = vmatpush.msrb.mxu1 %v3367_v59 }
 0x39e   :  { %v1392_v39 = vmul.f32 %v2215_v42, %v1386_v26  ;;  %1691 = vmatpush.msrb.mxu0 %v3281_v13  ;;  %v3375_v42 = vld [vmem:[#allocation5 + $0x40] sm:$0xff]  ;;  %1738 = vmatpush.msrb.mxu2 %v3371_v55 }
 0x39f   :  { %3657 = vst [vmem:[#allocation45_spill] sm:$0xff] %v3375_v42 }
 0x3a0   :  { %2119 = vst [vmem:[%s3541_s4 + $0x20] sm:$0xff] %v1392_v39  ;;  %1482 = vmatmul.f32.vlgmr.msra.gmra.mxu0 %v1392_v39  ;;  %1502 = vmatmul.f32.vlgmr.msra.gmra.mxu1 %v1392_v39 }
 0x3a1   :  { %1522 = vmatmul.f32.vlgmr.msra.gmra.mxu2 %v1392_v39  ;;  %1542 = vmatmul.f32.vlgmr.msra.gmra.mxu3 %v1392_v39  ;;  %v3379_v39 = vld [vmem:[#allocation5 + $0x48] sm:$0xff] }
 0x3a2   :  { %1692 = vmatpush.msrb.mxu0 %v3293_v24  ;;  %3658 = vst [vmem:[#allocation46_spill] sm:$0xff] %v3379_v39  ;;  %1719 = vmatpush.msrb.mxu1 %v3379_v39  ;;  %v3408_v39 = vld [vmem:[#allocation5 + $0x18] sm:$0xff] }
 0x3a4   :  { %1693 = vmatpush.msrb.mxu0 %v3305_v21 }
 0x3a6   :  { %1694 = vmatpush.msrb.mxu0 %v3317_v52 }
 0x3a8   :  { %1695 = vmatpush.msrb.mxu0 %v3329_v7 }
 0x3aa   :  { %1696 = vmatpush.msrb.mxu0 %v3343_v29 }
 0x3ac   :  { %1697 = vmatpush.msrb.mxu0 %v3355_v53 }
 0x3ae   :  { %1698 = vmatpush.msrb.mxu0 %v3365_v41 }
 0x3b0   :  { %1699 = vmatpush.msrb.mxu0 %v3375_v42  ;;  %v3406_v42 = vld [vmem:[#allocation5 + $0x10] sm:$0xff] }
 0x41d   :  { %v1483_v58 = vpop.f32.mrf.mxu0  ;;  %v1503_v2 = vpop.f32.mrf.mxu1 }
 0x41e   :  { %v1546_v15 = vadd.f32 %v1483_v58, %v3651_v14  ;;  %v1547_v38 = vadd.f32 %v1503_v2, %v3652_v22  ;;  %v3381_v58 = vld [vmem:[#allocation5 + $0x50] sm:$0xff]  ;;  %v3383_v2 = vld [vmem:[#allocation5 + $0x58] sm:$0xff]  ;;  %v3388_v22 = vld [vmem:[#allocation5 + $0x20] sm:$0xff] }
 0x41f   :  { %v3659_v14 = vld [vmem:[#allocation19_spill] sm:$0xff]  ;;  %1739 = vmatpush.msrb.mxu2 %v3381_v58  ;;  %1759 = vmatpush.msrb.mxu3 %v3383_v2 }
 0x420   :  { %v2120_v43 = vmul.f32 -1.442695, %v1546_v15  ;;  %v2121_v60 = vmul.f32 -1.442695, %v1547_v38  ;;  %v3390_v38 = vld [vmem:[#allocation5 + $0x28] sm:$0xff]  ;;  %1700 = vmatpush.msrb.mxu0 %v3388_v22 }
 0x421   :  { %1720 = vmatpush.msrb.mxu1 %v3390_v38 }
 0x422   :  { %2216 = vpow2.f32 %v2120_v43  ;;  %v3394_v43 = vld [vmem:[#allocation5 + $0x30] sm:$0xff] }
 0x423   :  { %2218 = vpow2.f32 %v2121_v60  ;;  %v3396_v60 = vld [vmem:[#allocation5 + $0x38] sm:$0xff]  ;;  %1740 = vmatpush.msrb.mxu2 %v3394_v43 }
 0x424   :  { %v1543_v26 = vpop.f32.mrf.mxu3  ;;  %1760 = vmatpush.msrb.mxu3 %v3396_v60 }
 0x425   :  { %v1549_v15 = vadd.f32 %v1543_v26, %v3659_v14  ;;  %v3400_v26 = vld [vmem:[#allocation5] sm:$0xff]  ;;  %v3402_v14 = vld [vmem:[#allocation5 + $0x8] sm:$0xff]  ;;  %1741 = vmatpush.msrb.mxu2 %v3406_v42 }
 0x426   :  { %1701 = vmatpush.msrb.mxu0 %v3400_v26  ;;  %1721 = vmatpush.msrb.mxu1 %v3402_v14 }
 0x427   :  { %v2122_v59 = vmul.f32 -1.442695, %v1549_v15  ;;  %1761 = vmatpush.msrb.mxu3 %v3408_v39  ;;  %1946 = vmatpush.msra.mxu2 %v3225_v28 }
 0x428   :  { %v2217_v40 = vpop.eup %2216  ;;  %1906 = vmatpush.msra.mxu0 %v3221_v50  ;;  %1926 = vmatpush.msra.mxu1 %v3223_v19  ;;  %v3660_v19 = vld [vmem:[#allocation18_spill] sm:$0xff] }
 0x429   :  { %v2219_v55 = vpop.eup %2218  ;;  %v3410_v41 = vadd.f32 1.0, %v2217_v40  ;;  %2220 = vpow2.f32 %v2122_v59  ;;  %1966 = vmatpush.msra.mxu3 %v3229_v44  ;;  %v1523_v59 = vpop.f32.mrf.mxu2  ;;  %1947 = vmatpush.msra.mxu2 %v3237_v45 }
 0x42a   :  { %v3414_v15 = vadd.f32 1.0, %v2219_v55  ;;  %1907 = vmatpush.msra.mxu0 %v3233_v20  ;;  %1927 = vmatpush.msra.mxu1 %v3235_v6  ;;  %v1548_v28 = vadd.f32 %v1523_v59, %v3660_v19 }
 0x42b   :  { %2222 = vrcp.f32 %v3410_v41  ;;  %1967 = vmatpush.msra.mxu3 %v3241_v27  ;;  %1948 = vmatpush.msra.mxu2 %v3249_v32  ;;  %vm1559_vm15 = vweird.f32 %v3410_v41 }
 0x42c   :  { %2224 = vrcp.f32 %v3414_v15  ;;  %1908 = vmatpush.msra.mxu0 %v3245_v16  ;;  %1928 = vmatpush.msra.mxu1 %v3247_v31  ;;  %v1565_v16 = vand.u32 2147483648, %v3410_v41  ;;  %v1584_v31 = vand.u32 2147483648, %v3414_v15  ;;  %vm1578_vm0 = vweird.f32 %v3414_v15 }
 0x42d   :  { %1968 = vmatpush.msra.mxu3 %v3253_v35  ;;  %1949 = vmatpush.msra.mxu2 %v3261_v5  ;;  %v1563_v35 = vand.u32 2147483647, %v3410_v41 }
 0x42e   :  { %1909 = vmatpush.msra.mxu0 %v3257_v34  ;;  %1929 = vmatpush.msra.mxu1 %v3259_v36  ;;  %v1582_v36 = vand.u32 2147483647, %v3414_v15 }
 0x42f   :  { %v2221_v55 = vpop.eup %2220  ;;  %1969 = vmatpush.msra.mxu3 %v3265_v54  ;;  %1950 = vmatpush.msra.mxu2 %v3273_v12  ;;  %vm1564_vm3 = vcmp.eq.f32.partialorder %v1563_v35, 8.507059e+37 }
 0x430   :  { %v3430_v40 = vadd.f32 1.0, %v2221_v55  ;;  %1910 = vmatpush.msra.mxu0 %v3269_v8  ;;  %1930 = vmatpush.msra.mxu1 %v3271_v9  ;;  %v1566_v8 = vor.u32 1.1754944e-38, %v1565_v16  ;;  %vm1583_vm4 = vcmp.eq.f32.partialorder %v1582_v36, 8.507059e+37 }
 0x431   :  { %v2223_v50 = vpop.eup %2222  ;;  %1970 = vmatpush.msra.mxu3 %v3277_v51  ;;  %1951 = vmatpush.msra.mxu2 %v3285_v46  ;;  %v1585_v51 = vor.u32 1.1754944e-38, %v1584_v31 }
 0x432   :  { %v2225_v44 = vpop.eup %2224  ;;  %v1555_v20 = vmul.f32 %v2223_v50, %v3410_v41  ;;  %2226 = vrcp.f32 %v3430_v40  ;;  %vm1560_vm13 = vweird.f32 %v2223_v50  ;;  %1911 = vmatpush.msra.mxu0 %v3281_v13  ;;  %1931 = vmatpush.msra.mxu1 %v3283_v47  ;;  %vm1598_vm6 = vweird.f32 %v3430_v40 }
 0x433   :  { %v1574_v6 = vmul.f32 %v2225_v44, %v3414_v15  ;;  %2228 = vtanh.f32 %v1548_v28  ;;  %vm1579_vm14 = vweird.f32 %v2225_v44  ;;  %1971 = vmatpush.msra.mxu3 %v3289_v0  ;;  %vm1561_vm1 = vmor %vm1559_vm15, %vm1560_vm13  ;;  %1952 = vmatpush.msra.mxu2 %v3297_v17 }
 0x434   :  { %v1556_v45 = vsub.f32 1.0, %v1555_v20  ;;  %1912 = vmatpush.msra.mxu0 %v3293_v24  ;;  %1932 = vmatpush.msra.mxu1 %v3295_v25  ;;  %vm1580_vm2 = vmor %vm1578_vm0, %vm1579_vm14 }
 0x435   :  { %v1575_v27 = vsub.f32 1.0, %v1574_v6  ;;  %1972 = vmatpush.msra.mxu3 %v3301_v18  ;;  %1953 = vmatpush.msra.mxu2 %v3309_v56  ;;  %v1604_v56 = vand.u32 2147483648, %v3430_v40 }
 0x436   :  { %v1557_v32 = vmul.f32 %v2223_v50, %v1556_v45  ;;  %1913 = vmatpush.msra.mxu0 %v3305_v21  ;;  %1933 = vmatpush.msra.mxu1 %v3307_v33 }
 0x437   :  { %v1576_v34 = vmul.f32 %v2225_v44, %v1575_v27  ;;  %1973 = vmatpush.msra.mxu3 %v3313_v49  ;;  %1954 = vmatpush.msra.mxu2 %v3321_v61  ;;  %v1602_v49 = vand.u32 2147483647, %v3430_v40  ;;  %v3662_v61 = vld [vmem:[#allocation42_spill] sm:$0xff] }
 0x438   :  { %v3456_v5 = vpop.eup %2226  ;;  %v1558_v54 = vadd.f32 %v2223_v50, %v1557_v32  ;;  %1914 = vmatpush.msra.mxu0 %v3317_v52  ;;  %1934 = vmatpush.msra.mxu1 %v3319_v57  ;;  %v3661_v57 = vld [vmem:[#allocation41_spill] sm:$0xff] }
 0x439   :  { %v1577_v9 = vadd.f32 %v2225_v44, %v1576_v34  ;;  %v1594_v12 = vmul.f32 %v3456_v5, %v3430_v40  ;;  %v2229_v47 = vpop.eup %2228  ;;  %1974 = vmatpush.msra.mxu3 %v3325_v1  ;;  %1955 = vmatpush.msra.mxu2 %v3333_v11  ;;  %vm1599_vm5 = vweird.f32 %v3456_v5  ;;  %v1605_v1 = vor.u32 1.1754944e-38, %v1604_v56  ;;  %v3665_v11 = vld [vmem:[#allocation45_spill] sm:$0xff] }
 0x43a   :  { %v1562_v13 = vsel %vm1561_vm1, %v2223_v50, %v1558_v54  ;;  %1915 = vmatpush.msra.mxu0 %v3329_v7  ;;  %1935 = vmatpush.msra.mxu1 %v3331_v10  ;;  %vm1600_vm7 = vmor %vm1598_vm6, %vm1599_vm5  ;;  %v3663_v7 = vld [vmem:[#allocation43_spill] sm:$0xff]  ;;  %v3664_v10 = vld [vmem:[#allocation44_spill] sm:$0xff]  ;;  %vm1603_vm8 = vcmp.eq.f32.partialorder %v1602_v49, 8.507059e+37 }
 0x43b   :  { %v1567_v46 = vsel %vm1564_vm3, %v1566_v8, %v1562_v13  ;;  %v1581_v0 = vsel %vm1580_vm2, %v2225_v44, %v1577_v9  ;;  %v1595_v24 = vsub.f32 1.0, %v1594_v12  ;;  %1975 = vmatpush.msra.mxu3 %v3339_v4  ;;  %1956 = vmatpush.msra.mxu2 %v3347_v37  ;;  %v3666_v4 = vld [vmem:[#allocation46_spill] sm:$0xff] }
 0x43c   :  { %v1586_v25 = vsel %vm1583_vm4, %v1585_v51, %v1581_v0  ;;  %v1609_v17 = vmul.f32 %v2229_v47, %v1567_v46  ;;  %1916 = vmatpush.msra.mxu0 %v3343_v29  ;;  %1936 = vmatpush.msra.mxu1 %v3345_v3  ;;  %v3670_v50 = vld [vmem:[#allocation22_spill] sm:$0xff] }
 0x43d   :  { %v1608_v18 = vmul.f32 %v1586_v25, %v3215_v30  ;;  %v1596_v21 = vmul.f32 %v3456_v5, %v1595_v24  ;;  %1976 = vmatpush.msra.mxu3 %v3351_v48  ;;  %1957 = vmatpush.msra.mxu2 %v3359_v23 }
 0x43e   :  { %1917 = vmatpush.msra.mxu0 %v3355_v53  ;;  %1937 = vmatpush.msra.mxu1 %v3357_v62  ;;  %v3667_v62 = vld [vmem:[#allocation20_spill] sm:$0xff] }
 0x43f   :  { %v3480_v33 = vadd.f32 %v1609_v17, %v1608_v18  ;;  %v1597_v30 = vadd.f32 %v3456_v5, %v1596_v21  ;;  %1977 = vmatpush.msra.mxu3 %v3363_v63  ;;  %1958 = vmatpush.msra.mxu2 %v3663_v7  ;;  %v3668_v63 = vld [vmem:[#allocation21_spill] sm:$0xff] }
 0x440   :  { %1918 = vmatpush.msra.mxu0 %v3661_v57  ;;  %1938 = vmatpush.msra.mxu1 %v3662_v61 }
 0x441   :  { %2230 = vtanh.f32 %v3480_v33  ;;  %v1601_v52 = vsel %vm1600_vm7, %v3456_v5, %v1597_v30  ;;  %1978 = vmatpush.msra.mxu3 %v3664_v10  ;;  %1959 = vmatpush.msra.mxu2 %v3381_v58 }
 0x442   :  { %1919 = vmatpush.msra.mxu0 %v3665_v11  ;;  %1939 = vmatpush.msra.mxu1 %v3666_v4  ;;  %v1606_v3 = vsel %vm1603_vm8, %v1605_v1, %v1601_v52  ;;  %v3671_v11 = vld [vmem:[#allocation24_spill] sm:$0xff] }
 0x443   :  { %1979 = vmatpush.msra.mxu3 %v3383_v2  ;;  %1960 = vmatpush.msra.mxu2 %v3394_v43 }
 0x444   :  { %1920 = vmatpush.msra.mxu0 %v3388_v22  ;;  %1940 = vmatpush.msra.mxu1 %v3390_v38  ;;  %v3669_v38 = vld [vmem:[#allocation23_spill] sm:$0xff] }
 0x445   :  { %1980 = vmatpush.msra.mxu3 %v3396_v60  ;;  %1961 = vmatpush.msra.mxu2 %v3406_v42 }
 0x446   :  { %1921 = vmatpush.msra.mxu0 %v3400_v26  ;;  %1941 = vmatpush.msra.mxu1 %v3402_v14 }
 0x447   :  { %v2231_v29 = vpop.eup %2230  ;;  %1981 = vmatpush.msra.mxu3 %v3408_v39 }
 0x448   :  { %v1612_v37 = vmul.f32 %v2231_v29, %v1606_v3  ;;  %v3672_v29 = vld [vmem:[#allocation25_spill] sm:$0xff] }
 0x44a   :  { %2123 = vst [vmem:[%s3541_s4 + $0x28] sm:$0xff] %v1612_v37  ;;  %1702 = vmatmul.f32.vlgmr.msrb.gmra.mxu0 %v1612_v37  ;;  %1722 = vmatmul.f32.vlgmr.msrb.gmra.mxu1 %v1612_v37 }
 0x44b   :  { %1742 = vmatmul.f32.vlgmr.msrb.gmra.mxu2 %v1612_v37  ;;  %1762 = vmatmul.f32.vlgmr.msrb.gmra.mxu3 %v1612_v37 }
 0x4c7   :  { %v1703_v48 = vpop.f32.mrf.mxu0  ;;  %v1723_v53 = vpop.f32.mrf.mxu1 }
 0x4c8   :  { %v1766_v23 = vadd.f32 %v1703_v48, %v3667_v62  ;;  %v1767_v41 = vadd.f32 %v1723_v53, %v3668_v63  ;;  %v3673_v62 = vld [vmem:[#allocation27_spill] sm:$0xff] }
 0x4ca   :  { %v2124_v58 = vmul.f32 -1.442695, %v1766_v23  ;;  %v2125_v2 = vmul.f32 -1.442695, %v1767_v41 }
 0x4cc   :  { %2232 = vpow2.f32 %v2124_v58 }
 0x4cd   :  { %2234 = vpow2.f32 %v2125_v2 }
 0x4ce   :  { %v1763_v22 = vpop.f32.mrf.mxu3  ;;  %v1743_v39 = vpop.f32.mrf.mxu2 }
 0x4cf   :  { %v1769_v43 = vadd.f32 %v1763_v22, %v3669_v38  ;;  %v1768_v19 = vadd.f32 %v1743_v39, %v3670_v50 }
 0x4d1   :  { %v2126_v60 = vmul.f32 -1.442695, %v1769_v43 }
 0x4d2   :  { %v2233_v26 = vpop.eup %2232 }
 0x4d3   :  { %v2235_v14 = vpop.eup %2234  ;;  %v1773_v15 = vadd.f32 1.0, %v2233_v26  ;;  %2236 = vpow2.f32 %v2126_v60 }
 0x4d4   :  { %v1792_v42 = vadd.f32 1.0, %v2235_v14  ;;  %v3674_v14 = vld [vmem:[#allocation26_spill] sm:$0xff] }
 0x4d5   :  { %2238 = vrcp.f32 %v1773_v15  ;;  %v1785_v27 = vand.u32 2147483648, %v1773_v15  ;;  %v1783_v32 = vand.u32 2147483647, %v1773_v15  ;;  %vm1779_vm11 = vweird.f32 %v1773_v15 }
 0x4d6   :  { %2240 = vrcp.f32 %v1792_v42  ;;  %v1804_v16 = vand.u32 2147483648, %v1792_v42  ;;  %v1802_v34 = vand.u32 2147483647, %v1792_v42  ;;  %vm1798_vm12 = vweird.f32 %v1792_v42 }
 0x4d7   :  { %v1786_v54 = vor.u32 1.1754944e-38, %v1785_v27  ;;  %vm1784_vm15 = vcmp.eq.f32.partialorder %v1783_v32, 8.507059e+37 }
 0x4d8   :  { %v1805_v12 = vor.u32 1.1754944e-38, %v1804_v16  ;;  %vm1803_vm0 = vcmp.eq.f32.partialorder %v1802_v34, 8.507059e+37 }
 0x4d9   :  { %v2237_v59 = vpop.eup %2236 }
 0x4da   :  { %v1812_v55 = vadd.f32 1.0, %v2237_v59 }
 0x4db   :  { %v2239_v40 = vpop.eup %2238 }
 0x4dc   :  { %v2241_v28 = vpop.eup %2240  ;;  %v1775_v44 = vmul.f32 %v2239_v40, %v1773_v15  ;;  %2242 = vrcp.f32 %v1812_v55  ;;  %vm1780_vm9 = vweird.f32 %v2239_v40  ;;  %v1824_v56 = vand.u32 2147483648, %v1812_v55 }
 0x4dd   :  { %v1794_v20 = vmul.f32 %v2241_v28, %v1792_v42  ;;  %2244 = vtanh.f32 %v1768_v19  ;;  %vm1799_vm10 = vweird.f32 %v2241_v28  ;;  %vm1781_vm13 = vmor %vm1779_vm11, %vm1780_vm9  ;;  %vm1818_vm2 = vweird.f32 %v1812_v55 }
 0x4de   :  { %v1776_v6 = vsub.f32 1.0, %v1775_v44  ;;  %vm1800_vm14 = vmor %vm1798_vm12, %vm1799_vm10  ;;  %v1822_v49 = vand.u32 2147483647, %v1812_v55  ;;  %v1825_v57 = vor.u32 1.1754944e-38, %v1824_v56 }
 0x4df   :  { %v1795_v45 = vsub.f32 1.0, %v1794_v20 }
 0x4e0   :  { %v1777_v31 = vmul.f32 %v2239_v40, %v1776_v6  ;;  %vm1823_vm4 = vcmp.eq.f32.partialorder %v1822_v49, 8.507059e+37 }
 0x4e1   :  { %v1796_v35 = vmul.f32 %v2241_v28, %v1795_v45 }
 0x4e2   :  { %v2243_v36 = vpop.eup %2242  ;;  %v1778_v5 = vadd.f32 %v2239_v40, %v1777_v31 }
 0x4e3   :  { %v1797_v8 = vadd.f32 %v2241_v28, %v1796_v35  ;;  %v1814_v9 = vmul.f32 %v2243_v36, %v1812_v55  ;;  %v2245_v13 = vpop.eup %2244  ;;  %vm1819_vm1 = vweird.f32 %v2243_v36 }
 0x4e4   :  { %v1782_v51 = vsel %vm1781_vm13, %v2239_v40, %v1778_v5  ;;  %vm1820_vm3 = vmor %vm1818_vm2, %vm1819_vm1 }
 0x4e5   :  { %v1787_v47 = vsel %vm1784_vm15, %v1786_v54, %v1782_v51  ;;  %v1801_v46 = vsel %vm1800_vm14, %v2241_v28, %v1797_v8  ;;  %v1815_v0 = vsub.f32 1.0, %v1814_v9 }
 0x4e6   :  { %v1806_v24 = vsel %vm1803_vm0, %v1805_v12, %v1801_v46  ;;  %v1829_v25 = vmul.f32 %v2245_v13, %v1787_v47 }
 0x4e7   :  { %v1828_v17 = vmul.f32 %v1806_v24, %v3480_v33  ;;  %v1816_v18 = vmul.f32 %v2243_v36, %v1815_v0 }
 0x4e9   :  { %v3523_v21 = vadd.f32 %v1829_v25, %v1828_v17  ;;  %v1817_v30 = vadd.f32 %v2243_v36, %v1816_v18 }
 0x4eb   :  { %2246 = vtanh.f32 %v3523_v21  ;;  %v1821_v52 = vsel %vm1820_vm3, %v2243_v36, %v1817_v30 }
 0x4ec   :  { %v1826_v1 = vsel %vm1823_vm4, %v1825_v57, %v1821_v52 }
 0x4f1   :  { %v2247_v61 = vpop.eup %2246 }
 0x4f2   :  { %v1832_v7 = vmul.f32 %v2247_v61, %v1826_v1 }
 0x4f4   :  { %2127 = vst [vmem:[%s3541_s4 + $0x30] sm:$0xff] %v1832_v7  ;;  %1922 = vmatmul.f32.vlgmr.msra.gmra.mxu0 %v1832_v7  ;;  %1942 = vmatmul.f32.vlgmr.msra.gmra.mxu1 %v1832_v7 }
 0x4f5   :  { %1962 = vmatmul.f32.vlgmr.msra.gmra.mxu2 %v1832_v7  ;;  %1982 = vmatmul.f32.vlgmr.msra.gmra.mxu3 %v1832_v7 }
 0x571   :  { %v1923_v33 = vpop.f32.mrf.mxu0  ;;  %v1943_v10 = vpop.f32.mrf.mxu1 }
 0x572   :  { %v1986_v4 = vadd.f32 %v1923_v33, %v3671_v11  ;;  %v1987_v3 = vadd.f32 %v1943_v10, %v3672_v29 }
 0x574   :  { %v2128_v37 = vmul.f32 -1.442695, %v1986_v4  ;;  %v2129_v48 = vmul.f32 -1.442695, %v1987_v3 }
 0x576   :  { %2248 = vpow2.f32 %v2128_v37 }
 0x577   :  { %2250 = vpow2.f32 %v2129_v48 }
 0x578   :  { %v1983_v53 = vpop.f32.mrf.mxu3  ;;  %v1963_v38 = vpop.f32.mrf.mxu2 }
 0x579   :  { %v1989_v23 = vadd.f32 %v1983_v53, %v3673_v62  ;;  %v1988_v15 = vadd.f32 %v1963_v38, %v3674_v14 }
 0x57b   :  { %v2130_v63 = vmul.f32 -1.442695, %v1989_v23 }
 0x57c   :  { %v2249_v41 = vpop.eup %2248 }
 0x57d   :  { %v2251_v58 = vpop.eup %2250  ;;  %v1993_v2 = vadd.f32 1.0, %v2249_v41  ;;  %2252 = vpow2.f32 %v2130_v63 }
 0x57e   :  { %v2012_v22 = vadd.f32 1.0, %v2251_v58 }
 0x57f   :  { %2254 = vrcp.f32 %v1993_v2  ;;  %v2005_v50 = vand.u32 2147483648, %v1993_v2  ;;  %v2003_v44 = vand.u32 2147483647, %v1993_v2  ;;  %vm1999_vm7 = vweird.f32 %v1993_v2 }
 0x580   :  { %2256 = vrcp.f32 %v2012_v22  ;;  %v2024_v19 = vand.u32 2147483648, %v2012_v22  ;;  %v2022_v6 = vand.u32 2147483647, %v2012_v22  ;;  %vm2018_vm8 = vweird.f32 %v2012_v22 }
 0x581   :  { %v2006_v16 = vor.u32 1.1754944e-38, %v2005_v50  ;;  %vm2004_vm11 = vcmp.eq.f32.partialorder %v2003_v44, 8.507059e+37 }
 0x582   :  { %v2025_v35 = vor.u32 1.1754944e-38, %v2024_v19  ;;  %vm2023_vm12 = vcmp.eq.f32.partialorder %v2022_v6, 8.507059e+37 }
 0x583   :  { %v2253_v43 = vpop.eup %2252 }
 0x584   :  { %v2032_v60 = vadd.f32 1.0, %v2253_v43 }
 0x585   :  { %v2255_v26 = vpop.eup %2254 }
 0x586   :  { %v2257_v42 = vpop.eup %2256  ;;  %v1995_v39 = vmul.f32 %v2255_v26, %v1993_v2  ;;  %2258 = vrcp.f32 %v2032_v60  ;;  %vm2000_vm5 = vweird.f32 %v2255_v26  ;;  %v2044_v0 = vand.u32 2147483648, %v2032_v60 }
 0x587   :  { %v2014_v59 = vmul.f32 %v2257_v42, %v2012_v22  ;;  %2260 = vtanh.f32 %v1988_v15  ;;  %vm2019_vm6 = vweird.f32 %v2257_v42  ;;  %vm2001_vm9 = vmor %vm1999_vm7, %vm2000_vm5  ;;  %vm2038_vm14 = vweird.f32 %v2032_v60 }
 0x588   :  { %v1996_v55 = vsub.f32 1.0, %v1995_v39  ;;  %vm2020_vm10 = vmor %vm2018_vm8, %vm2019_vm6  ;;  %v2042_v24 = vand.u32 2147483647, %v2032_v60  ;;  %v2045_v17 = vor.u32 1.1754944e-38, %v2044_v0 }
 0x589   :  { %v2015_v40 = vsub.f32 1.0, %v2014_v59 }
 0x58a   :  { %v1997_v28 = vmul.f32 %v2255_v26, %v1996_v55  ;;  %vm2043_vm0 = vcmp.eq.f32.partialorder %v2042_v24, 8.507059e+37 }
 0x58b   :  { %v2016_v20 = vmul.f32 %v2257_v42, %v2015_v40 }
 0x58c   :  { %v2259_v45 = vpop.eup %2258  ;;  %v1998_v27 = vadd.f32 %v2255_v26, %v1997_v28 }
 0x58d   :  { %v2017_v31 = vadd.f32 %v2257_v42, %v2016_v20  ;;  %v2034_v32 = vmul.f32 %v2259_v45, %v2032_v60  ;;  %v2261_v36 = vpop.eup %2260  ;;  %vm2039_vm13 = vweird.f32 %v2259_v45 }
 0x58e   :  { %v2002_v34 = vsel %vm2001_vm9, %v2255_v26, %v1998_v27  ;;  %vm2040_vm15 = vmor %vm2038_vm14, %vm2039_vm13 }
 0x58f   :  { %v2007_v5 = vsel %vm2004_vm11, %v2006_v16, %v2002_v34  ;;  %v2021_v54 = vsel %vm2020_vm10, %v2257_v42, %v2017_v31  ;;  %v2035_v8 = vsub.f32 1.0, %v2034_v32 }
 0x590   :  { %v2026_v9 = vsel %vm2023_vm12, %v2025_v35, %v2021_v54  ;;  %v2049_v12 = vmul.f32 %v2261_v36, %v2007_v5 }
 0x591   :  { %v2048_v51 = vmul.f32 %v2026_v9, %v3523_v21  ;;  %v2036_v13 = vmul.f32 %v2259_v45, %v2035_v8 }
 0x593   :  { %v2050_v47 = vadd.f32 %v2049_v12, %v2048_v51  ;;  %v2037_v46 = vadd.f32 %v2259_v45, %v2036_v13 }
 0x595   :  { %2262 = vtanh.f32 %v2050_v47  ;;  %v2041_v25 = vsel %vm2040_vm15, %v2259_v45, %v2037_v46 }
 0x596   :  { %v2046_v30 = vsel %vm2043_vm0, %v2045_v17, %v2041_v25 }
 0x59b   :  { %v2263_v18 = vpop.eup %2262 }
 0x59c   :  { %v2052_v56 = vmul.f32 %v2263_v18, %v2046_v30 }
 0x59e   :  { %2131 = vst [vmem:[%s3541_s4 + $0x38] sm:$0xff] %v2052_v56 }
 0x59f   :  { %2061 = vsyncpa [#allocation6], 1 }

</bundles_post_ra>
